<compile_context>
chip_gen: v7x
topology: tpu7x:2x2x1
jax: 0.10.0
libtpu: 0.0.40
codegen_flags: <defaults>
</compile_context>

<pallas_src>
import functools

import jax
import jax.numpy as jnp
from jax.experimental import pallas as pl
from jax.experimental.pallas import tpu as pltpu


# ----------------------------------------------------------------------------
# Pallas kernel: one CHUNK of molecules (M = Bc*E rows) per grid step
# ----------------------------------------------------------------------------
def molecule_kernel(x_ref, dst_ref, bias_ref, slab_ref, out_ref, *,
                    num_heads: int, H: int, layout: dict):
    x = x_ref[...]                                       # (M, H) float32
    M = x.shape[0]
    HD = H // num_heads
    H2, H3 = 2 * H, 3 * H

    def w(name):                                         # static slab sub-slice (cheap)
        r0, nr, nc = layout[name]
        return slab_ref[r0:r0 + nr, 0:nc]

    def mm(a, wn, bn):                                   # weights pre-transposed in wrapper
        return jnp.dot(a, w(wn), preferred_element_type=jnp.float32) + w(bn)

    # ---------------- DMPNN layer ----------------
    msg = jnp.maximum(mm(x, "wmsg", "bmsg"), 0.0)        # (M, H)

    # block-diagonal scatter-add as ONE one-hot MXU matmul; dst pre-offset per chunk.
    dst = dst_ref[...]                                   # (1, M) int32
    row_ids = jax.lax.broadcasted_iota(jnp.int32, (M, M), 0)
    scatter = (row_ids == dst).astype(jnp.float32)       # scatter[i, e] = (dst[e] == i)
    agg = jnp.dot(scatter, msg, preferred_element_type=jnp.float32)

    # GRUCell(input=agg, hidden=x): single fused (M,2H)x(2H,4H) matmul.
    g = mm(jnp.concatenate([agg, x], axis=-1), "wgru", "bgru")   # (M, 4H)
    r = jax.nn.sigmoid(g[:, 0:H])
    z = jax.nn.sigmoid(g[:, H:H2])
    n = jnp.tanh(g[:, H2:H3] + r * g[:, H3:])
    ef = (1.0 - z) * n + z * x                           # (M, H)

    # ---------------- GlobalAttention (MHA batched via block-diag mask) ----------------
    qkv = mm(ef, "wqkv", "bqkv")                         # (M, 3H); q pre-scaled in wrapper
    bias = bias_ref[...]                                 # (M, M): 0 in-molecule, -1e30 off
    heads = []
    for h in range(num_heads):                           # static head loop
        q_h = qkv[:, h * HD:(h + 1) * HD]
        k_h = qkv[:, H + h * HD:H + (h + 1) * HD]
        v_h = qkv[:, H2 + h * HD:H2 + (h + 1) * HD]
        s = jax.lax.dot_general(q_h, k_h, (((1,), (1,)), ((), ())),
                                preferred_element_type=jnp.float32) + bias
        s = s - jnp.max(s, axis=-1, keepdims=True)
        p = jnp.exp(s)
        p = p * pl.reciprocal(jnp.sum(p, axis=-1, keepdims=True), approx=True)
        heads.append(jnp.dot(p, v_h, preferred_element_type=jnp.float32))
    attn = mm(jnp.concatenate(heads, axis=-1), "wo", "bo")

    # residual + LayerNorm
    y = attn + ef
    mu = jnp.mean(y, axis=-1, keepdims=True)
    var = jnp.mean((y - mu) ** 2, axis=-1, keepdims=True)
    y = (y - mu) * jax.lax.rsqrt(var + 1e-5) * w("lng") + w("lnb")

    y = jnp.maximum(mm(y, "wga", "bga"), 0.0)            # GlobalAttention.linear + relu

    # ---------------- FFN (dropout == identity in eval) ----------------
    h1 = jnp.maximum(mm(y, "wf1", "bf1"), 0.0)
    out_ref[...] = mm(h1, "wf2", "bf2").astype(out_ref.dtype)     # (M, OUT_PAD) lane-dense


# ----------------------------------------------------------------------------
# Weight packing: one lane-padded f32 slab, fused GRU / QKV weights
# ----------------------------------------------------------------------------
def _build_slab(params, H, FFN_H, OUT_PAD, num_heads):
    H2, H3, H4 = 2 * H, 3 * H, 4 * H
    LANES = max(128, ((max(H4, H3, FFN_H, OUT_PAD, H) + 127) // 128) * 128)
    HD = H // num_heads
    scale = 1.0 / (HD ** 0.5)

    wih, whh = params["wih"], params["whh"]
    bih, bhh = params["bih"], params["bhh"]
    zH = jnp.zeros((H, H), jnp.float32)
    # fused GRU weight: rows [agg ; x], cols [r | z | gi_n | gh_n]
    w_gru = jnp.concatenate([
        jnp.concatenate([wih[:H].T, wih[H:H2].T, wih[H2:].T, zH], axis=1),
        jnp.concatenate([whh[:H].T, whh[H:H2].T, zH, whh[H2:].T], axis=1),
    ], axis=0)                                                        # (2H, 4H)
    b_gru = jnp.concatenate([bih[:, :H] + bhh[:, :H],
                             bih[:, H:H2] + bhh[:, H:H2],
                             bih[:, H2:], bhh[:, H2:]], axis=1)       # (1, 4H)

    # fused QKV with softmax scale folded into the q columns/bias
    qscale = jnp.concatenate([jnp.full((H,), scale, jnp.float32),
                              jnp.ones((2 * H,), jnp.float32)])
    w_qkv = params["inw"].T * qscale[None, :]                         # (H, 3H)
    b_qkv = params["inb"] * qscale[None, :]                           # (1, 3H)

    OUT = params["f2w"].shape[0]
    f2w_t = jnp.zeros((FFN_H, OUT_PAD), jnp.float32).at[:, :OUT].set(params["f2w"].T)
    f2b_p = jnp.zeros((1, OUT_PAD), jnp.float32).at[:, :OUT].set(params["f2b"])

    sections = [
        ("wmsg", params["wmsg"].T), ("wgru", w_gru), ("wqkv", w_qkv),
        ("wo", params["outw"].T), ("wga", params["gaw"].T),
        ("wf1", params["f1w"].T), ("wf2", f2w_t),
        ("bmsg", params["bmsg"]), ("bgru", b_gru), ("bqkv", b_qkv),
        ("bo", params["outb"]), ("lng", params["lng"]), ("lnb", params["lnb"]),
        ("bga", params["gab"]), ("bf1", params["f1b"]), ("bf2", f2b_p),
    ]
    layout, row = {}, 0
    for name, arr in sections:
        nr, nc = arr.shape
        layout[name] = (row, nr, nc)
        row += ((nr + 7) // 8) * 8                      # 8-align every section start
    total = ((row + 7) // 8) * 8
    slab = jnp.zeros((total, LANES), jnp.float32)
    for name, arr in sections:
        r0, nr, nc = layout[name]
        slab = slab.at[r0:r0 + nr, :nc].set(arr.astype(jnp.float32))
    return slab, layout


# ----------------------------------------------------------------------------
# Wrapper
# ----------------------------------------------------------------------------
def molecule_model_forward(params, x, edge_index, *, num_heads=4, num_chunks=None):
    """x: (B, E, H) float32; edge_index: (B, 2, E) int; returns (B, E, OUT)."""
    B, E, H = x.shape
    OUT = params["f2w"].shape[0]
    FFN_H = params["f1w"].shape[0]
    OUT_PAD = ((OUT + 127) // 128) * 128                 # lane-dense output slab

    # one chunk on single-TC chips (v5e/v6e); two parallel chunks on dual-TC v7x
    if num_chunks is None:
        num_chunks = 1
        try:
            kind = jax.devices()[0].device_kind.lower()
            if "v7" in kind or "7x" in kind:
                num_chunks = 2
        except Exception:
            pass
    if B % num_chunks != 0:
        num_chunks = 1
    Bc = B // num_chunks
    M = Bc * E                                           # rows per grid step

    slab, layout = _build_slab(params, H, FFN_H, OUT_PAD, num_heads)

    x_chunks = x.astype(jnp.float32).reshape(num_chunks, M, H)

    # lane-dense dst row, pre-offset by local molecule index within the chunk
    dst = edge_index[:, 1, :].astype(jnp.int32)                       # (B, E)
    local_off = (jnp.arange(B, dtype=jnp.int32) % Bc) * E
    dst_local = (dst + local_off[:, None]).reshape(num_chunks, 1, M)

    # block-diagonal additive attention mask (same for every chunk)
    mol_id = jnp.arange(M, dtype=jnp.int32) // E
    attn_bias = jnp.where(mol_id[:, None] == mol_id[None, :], 0.0, -1e30).astype(jnp.float32)

    grid_spec = pltpu.PrefetchScalarGridSpec(
        num_scalar_prefetch=0,
        grid=(num_chunks,),
        in_specs=[
            pl.BlockSpec((None, M, H), lambda c: (c, 0, 0)),          # x       (per chunk)
            pl.BlockSpec((None, 1, M), lambda c: (c, 0, 0)),          # dst     (per chunk)
            pl.BlockSpec(attn_bias.shape, lambda c: (0, 0)),          # mask    (resident)
            pl.BlockSpec(slab.shape, lambda c: (0, 0)),               # weights (resident)
        ],
        out_specs=pl.BlockSpec((None, M, OUT_PAD), lambda c: (c, 0, 0)),
    )

    out_padded = pl.pallas_call(
        functools.partial(molecule_kernel, num_heads=num_heads, H=H, layout=layout),
        out_shape=jax.ShapeDtypeStruct((num_chunks, M, OUT_PAD), jnp.float32),
        grid_spec=grid_spec,
        compiler_params=pltpu.CompilerParams(
            dimension_semantics=("parallel",)),                        # dual-TC split on v7x
    )(x_chunks, dst_local, attn_bias, slab)

    return out_padded.reshape(B, E, OUT_PAD)[:, :, :OUT]


# ----------------------------------------------------------------------------
# Pure-JAX reference (same math, no Pallas) for verification
# ----------------------------------------------------------------------------
def _reference_single(params, x, dst, *, num_heads=4):
    E, H = x.shape
    HD = H // num_heads
    msg = jnp.maximum(x @ params["wmsg"].T + params["bmsg"], 0.0)
    agg = jnp.zeros_like(x).at[dst].add(msg)
    gi = agg @ params["wih"].T + params["bih"]
    gh = x @ params["whh"].T + params["bhh"]
    r = jax.nn.sigmoid(gi[:, :H] + gh[:, :H])
    z = jax.nn.sigmoid(gi[:, H:2 * H] + gh[:, H:2 * H])
    n = jnp.tanh(gi[:, 2 * H:] + r * gh[:, 2 * H:])
    ef = (1 - z) * n + z * x
    qkv = ef @ params["inw"].T + params["inb"]
    q, k, v = qkv[:, :H], qkv[:, H:2 * H], qkv[:, 2 * H:]
    heads = []
    for h in range(num_heads):
        qh = q[:, h * HD:(h + 1) * HD] / (HD ** 0.5)
        s = qh @ k[:, h * HD:(h + 1) * HD].T
        p = jax.nn.softmax(s, axis=-1)
        heads.append(p @ v[:, h * HD:(h + 1) * HD])
    attn = jnp.concatenate(heads, -1) @ params["outw"].T + params["outb"]
    y = attn + ef
    mu = y.mean(-1, keepdims=True)
    var = ((y - mu) ** 2).mean(-1, keepdims=True)
    y = (y - mu) / jnp.sqrt(var + 1e-5) * params["lng"] + params["lnb"]
    y = jnp.maximum(y @ params["gaw"].T + params["gab"], 0.0)
    h1 = jnp.maximum(y @ params["f1w"].T + params["f1b"], 0.0)
    return h1 @ params["f2w"].T + params["f2b"]


def reference_forward(params, x, edge_index, *, num_heads=4):
    fn = lambda xb, eb: _reference_single(params, xb, eb[1], num_heads=num_heads)
    return jax.vmap(fn)(x, edge_index)


# ----------------------------------------------------------------------------
# Main
# ----------------------------------------------------------------------------
if __name__ == "__main__":
    B, E, H, NH, FFN_H, OUT = 8, 16, 32, 4, 64, 8

    key = jax.random.PRNGKey(0)
    ks = jax.random.split(key, 24)
    rnd = lambda k, s, sc=0.1: (jax.random.normal(k, s) * sc).astype(jnp.float32)

    params = {
        # DMPNN
        "wmsg": rnd(ks[0], (H, H)),        "bmsg": rnd(ks[1], (1, H)),
        "wih":  rnd(ks[2], (3 * H, H)),    "whh":  rnd(ks[3], (3 * H, H)),
        "bih":  rnd(ks[4], (1, 3 * H)),    "bhh":  rnd(ks[5], (1, 3 * H)),
        # GlobalAttention (MultiheadAttention + LayerNorm + Linear)
        "inw":  rnd(ks[6], (3 * H, H)),    "inb":  rnd(ks[7], (1, 3 * H)),
        "outw": rnd(ks[8], (H, H)),        "outb": rnd(ks[9], (1, H)),
        "lng":  1.0 + rnd(ks[10], (1, H)), "lnb":  rnd(ks[11], (1, H)),
        "gaw":  rnd(ks[12], (H, H)),       "gab":  rnd(ks[13], (1, H)),
        # FFN (ffn_num_layers = 2)
        "f1w":  rnd(ks[14], (FFN_H, H)),   "f1b":  rnd(ks[15], (1, FFN_H)),
        "f2w":  rnd(ks[16], (OUT, FFN_H)), "f2b":  rnd(ks[17], (1, OUT)),
    }

    x = rnd(ks[18], (B, E, H), sc=1.0)

    # per-molecule edge indices; dst is a permutation (scatter add == set here)
    dst_keys = jax.random.split(ks[19], B)
    src_keys = jax.random.split(ks[20], B)
    dsts = jnp.stack([jax.random.permutation(k, E) for k in dst_keys]).astype(jnp.int32)
    srcs = jnp.stack([jax.random.permutation(k, E) for k in src_keys]).astype(jnp.int32)
    edge_index = jnp.stack([srcs, dsts], axis=1)                  # (B, 2, E)

    out = molecule_model_forward(params, x, edge_index, num_heads=NH)
    out = jax.block_until_ready(out)

    ref = reference_forward(params, x, edge_index, num_heads=NH)
    assert out.shape == (B, E, OUT)
    assert jnp.allclose(out, ref, atol=1e-3, rtol=1e-3), "mismatch vs JAX reference"

    print("KERNEL_OK")
</pallas_src>

<mosaic_0001>
module attributes {stable_mosaic.version = 11 : i64} {
  func.func @molecule_kernel(%arg0: i32, %arg1: memref<1x128x32xf32, #tpu.memory_space<vmem>>, %arg2: memref<1x1x128xi32, #tpu.memory_space<vmem>>, %arg3: memref<128x128xf32, #tpu.memory_space<vmem>>, %arg4: memref<360x128xf32, #tpu.memory_space<vmem>>, %arg5: memref<1x128x128xf32, #tpu.memory_space<vmem>>) attributes {dimension_semantics = [#tpu.dimension_semantics<parallel>], iteration_bounds = array<i64: 1>, scalar_prefetch = 0 : i64, scratch_operands = 0 : i64, tpu.core_type = #tpu.core_type<tc>, window_params = [{transform_indices = @transform_0, window_bounds = array<i64: 1, 128, 32>}, {transform_indices = @transform_1, window_bounds = array<i64: 1, 1, 128>}, {pipeline_mode = #tpu.pipeline_mode<synchronous>, transform_indices = @transform_2, window_bounds = array<i64: 128, 128>}, {pipeline_mode = #tpu.pipeline_mode<synchronous>, transform_indices = @transform_3, window_bounds = array<i64: 360, 128>}, {transform_indices = @transform_4, window_bounds = array<i64: 1, 128, 128>}]} {
    %c0 = arith.constant 0 : index
    %c0_0 = arith.constant 0 : index
    %c0_1 = arith.constant 0 : index
    %0 = vector.load %arg1[%c0, %c0_0, %c0_1] : memref<1x128x32xf32, #tpu.memory_space<vmem>>, vector<1x128x32xf32>
    %1 = vector.shape_cast %0 : vector<1x128x32xf32> to vector<128x32xf32>
    %c0_2 = arith.constant 0 : index
    %c0_3 = arith.constant 0 : index
    %2 = vector.load %arg4[%c0_2, %c0_3] : memref<360x128xf32, #tpu.memory_space<vmem>>, vector<32x32xf32>
    %cst = arith.constant dense<0.000000e+00> : vector<128x32xf32>
    %3 = tpu.matmul %1, %2, %cst {dimension_numbers = #tpu.dot_dimension_numbers<[1], [0], [0], [1], [0, 0, 1, 1], [], []>} : vector<128x32xf32>, vector<32x32xf32>, vector<128x32xf32> -> vector<128x32xf32>
    %c288 = arith.constant 288 : index
    %c0_4 = arith.constant 0 : index
    %4 = vector.load %arg4[%c288, %c0_4] : memref<360x128xf32, #tpu.memory_space<vmem>>, vector<1x32xf32>
    %5 = vector.broadcast %4 : vector<1x32xf32> to vector<128x32xf32>
    %6 = arith.addf %3, %5 : vector<128x32xf32>
    %cst_5 = arith.constant 0.000000e+00 : f32
    %7 = vector.broadcast %cst_5 : f32 to vector<128x32xf32>
    %8 = arith.maximumf %6, %7 : vector<128x32xf32>
    %c0_6 = arith.constant 0 : index
    %c0_7 = arith.constant 0 : index
    %c0_8 = arith.constant 0 : index
    %9 = vector.load %arg2[%c0_6, %c0_7, %c0_8] : memref<1x1x128xi32, #tpu.memory_space<vmem>>, vector<1x1x128xi32>
    %10 = vector.shape_cast %9 : vector<1x1x128xi32> to vector<1x128xi32>
    %11 = tpu.iota {dimensions = array<i32: 0>} : vector<128x128xi32>
    %12 = vector.broadcast %10 : vector<1x128xi32> to vector<128x128xi32>
    %13 = arith.cmpi eq, %11, %12 : vector<128x128xi32>
    %14 = arith.extui %13 : vector<128x128xi1> to vector<128x128xi32>
    %15 = arith.sitofp %14 : vector<128x128xi32> to vector<128x128xf32>
    %cst_9 = arith.constant dense<0.000000e+00> : vector<128x32xf32>
    %16 = tpu.matmul %15, %8, %cst_9 {dimension_numbers = #tpu.dot_dimension_numbers<[1], [0], [0], [1], [0, 0, 1, 1], [], []>} : vector<128x128xf32>, vector<128x32xf32>, vector<128x32xf32> -> vector<128x32xf32>
    %17 = tpu.concatenate %16, %1 in 1 : vector<128x32xf32>, vector<128x32xf32> -> vector<128x64xf32>
    %c32 = arith.constant 32 : index
    %c0_10 = arith.constant 0 : index
    %18 = vector.load %arg4[%c32, %c0_10] : memref<360x128xf32, #tpu.memory_space<vmem>>, vector<64x128xf32>
    %cst_11 = arith.constant dense<0.000000e+00> : vector<128x128xf32>
    %19 = tpu.matmul %17, %18, %cst_11 {dimension_numbers = #tpu.dot_dimension_numbers<[1], [0], [0], [1], [0, 0, 1, 1], [], []>} : vector<128x64xf32>, vector<64x128xf32>, vector<128x128xf32> -> vector<128x128xf32>
    %c296 = arith.constant 296 : index
    %c0_12 = arith.constant 0 : index
    %20 = vector.load %arg4[%c296, %c0_12] : memref<360x128xf32, #tpu.memory_space<vmem>>, vector<1x128xf32>
    %21 = vector.broadcast %20 : vector<1x128xf32> to vector<128x128xf32>
    %22 = arith.addf %19, %21 : vector<128x128xf32>
    %23 = vector.extract_strided_slice %22 {offsets = [0, 0], sizes = [128, 32], strides = [1, 1]} : vector<128x128xf32> to vector<128x32xf32>
    %24 = arith.negf %23 : vector<128x32xf32>
    %25 = math.exp %24 : vector<128x32xf32>
    %cst_13 = arith.constant 1.000000e+00 : f32
    %26 = vector.broadcast %cst_13 : f32 to vector<128x32xf32>
    %27 = arith.addf %26, %25 : vector<128x32xf32>
    %28 = arith.divf %26, %27 : vector<128x32xf32>
    %29 = vector.extract_strided_slice %22 {offsets = [0, 32], sizes = [128, 32], strides = [1, 1]} : vector<128x128xf32> to vector<128x32xf32>
    %30 = arith.negf %29 : vector<128x32xf32>
    %31 = math.exp %30 : vector<128x32xf32>
    %cst_14 = arith.constant 1.000000e+00 : f32
    %32 = vector.broadcast %cst_14 : f32 to vector<128x32xf32>
    %33 = arith.addf %32, %31 : vector<128x32xf32>
    %34 = arith.divf %32, %33 : vector<128x32xf32>
    %35 = vector.extract_strided_slice %22 {offsets = [0, 64], sizes = [128, 32], strides = [1, 1]} : vector<128x128xf32> to vector<128x32xf32>
    %36 = vector.extract_strided_slice %22 {offsets = [0, 96], sizes = [128, 32], strides = [1, 1]} : vector<128x128xf32> to vector<128x32xf32>
    %37 = arith.mulf %28, %36 : vector<128x32xf32>
    %38 = arith.addf %35, %37 : vector<128x32xf32>
    %39 = math.tanh %38 : vector<128x32xf32>
    %cst_15 = arith.constant 1.000000e+00 : f32
    %40 = vector.broadcast %cst_15 : f32 to vector<128x32xf32>
    %41 = arith.subf %40, %34 : vector<128x32xf32>
    %42 = arith.mulf %41, %39 : vector<128x32xf32>
    %43 = arith.mulf %34, %1 : vector<128x32xf32>
    %44 = arith.addf %42, %43 : vector<128x32xf32>
    %c96 = arith.constant 96 : index
    %c0_16 = arith.constant 0 : index
    %45 = vector.load %arg4[%c96, %c0_16] : memref<360x128xf32, #tpu.memory_space<vmem>>, vector<32x96xf32>
    %cst_17 = arith.constant dense<0.000000e+00> : vector<128x96xf32>
    %46 = tpu.matmul %44, %45, %cst_17 {dimension_numbers = #tpu.dot_dimension_numbers<[1], [0], [0], [1], [0, 0, 1, 1], [], []>} : vector<128x32xf32>, vector<32x96xf32>, vector<128x96xf32> -> vector<128x96xf32>
    %c304 = arith.constant 304 : index
    %c0_18 = arith.constant 0 : index
    %47 = vector.load %arg4[%c304, %c0_18] : memref<360x128xf32, #tpu.memory_space<vmem>>, vector<1x96xf32>
    %48 = vector.broadcast %47 : vector<1x96xf32> to vector<128x96xf32>
    %49 = arith.addf %46, %48 : vector<128x96xf32>
    %c0_19 = arith.constant 0 : index
    %c0_20 = arith.constant 0 : index
    %50 = vector.load %arg3[%c0_19, %c0_20] : memref<128x128xf32, #tpu.memory_space<vmem>>, vector<128x128xf32>
    %51 = vector.extract_strided_slice %49 {offsets = [0, 0], sizes = [128, 8], strides = [1, 1]} : vector<128x96xf32> to vector<128x8xf32>
    %52 = vector.extract_strided_slice %49 {offsets = [0, 32], sizes = [128, 8], strides = [1, 1]} : vector<128x96xf32> to vector<128x8xf32>
    %53 = vector.extract_strided_slice %49 {offsets = [0, 64], sizes = [128, 8], strides = [1, 1]} : vector<128x96xf32> to vector<128x8xf32>
    %cst_21 = arith.constant dense<0.000000e+00> : vector<128x128xf32>
    %54 = tpu.matmul %51, %52, %cst_21 {dimension_numbers = #tpu.dot_dimension_numbers<[1], [1], [0], [0], [0, 0, 1, 0], [], []>} : vector<128x8xf32>, vector<128x8xf32>, vector<128x128xf32> -> vector<128x128xf32>
    %55 = arith.addf %54, %50 : vector<128x128xf32>
    %cst_22 = arith.constant dense<0xFF800000> : vector<128xf32>
    %56 = vector.multi_reduction <maximumf>, %55, %cst_22 [1] : vector<128x128xf32> to vector<128xf32>
    %57 = vector.shape_cast %56 : vector<128xf32> to vector<128x1xf32>
    %58 = vector.broadcast %57 : vector<128x1xf32> to vector<128x128xf32>
    %59 = arith.subf %55, %58 : vector<128x128xf32>
    %60 = math.exp %59 : vector<128x128xf32>
    %cst_23 = arith.constant dense<0.000000e+00> : vector<128xf32>
    %61 = vector.multi_reduction <add>, %60, %cst_23 [1] : vector<128x128xf32> to vector<128xf32>
    %62 = vector.shape_cast %61 : vector<128xf32> to vector<128x1xf32>
    %63 = tpu.reciprocal %62 {approx = true} : vector<128x1xf32> -> vector<128x1xf32>
    %64 = vector.broadcast %63 : vector<128x1xf32> to vector<128x128xf32>
    %65 = arith.mulf %60, %64 : vector<128x128xf32>
    %cst_24 = arith.constant dense<0.000000e+00> : vector<128x8xf32>
    %66 = tpu.matmul %65, %53, %cst_24 {dimension_numbers = #tpu.dot_dimension_numbers<[1], [0], [0], [1], [0, 0, 1, 1], [], []>} : vector<128x128xf32>, vector<128x8xf32>, vector<128x8xf32> -> vector<128x8xf32>
    %67 = vector.extract_strided_slice %49 {offsets = [0, 8], sizes = [128, 8], strides = [1, 1]} : vector<128x96xf32> to vector<128x8xf32>
    %68 = vector.extract_strided_slice %49 {offsets = [0, 40], sizes = [128, 8], strides = [1, 1]} : vector<128x96xf32> to vector<128x8xf32>
    %69 = vector.extract_strided_slice %49 {offsets = [0, 72], sizes = [128, 8], strides = [1, 1]} : vector<128x96xf32> to vector<128x8xf32>
    %cst_25 = arith.constant dense<0.000000e+00> : vector<128x128xf32>
    %70 = tpu.matmul %67, %68, %cst_25 {dimension_numbers = #tpu.dot_dimension_numbers<[1], [1], [0], [0], [0, 0, 1, 0], [], []>} : vector<128x8xf32>, vector<128x8xf32>, vector<128x128xf32> -> vector<128x128xf32>
    %71 = arith.addf %70, %50 : vector<128x128xf32>
    %cst_26 = arith.constant dense<0xFF800000> : vector<128xf32>
    %72 = vector.multi_reduction <maximumf>, %71, %cst_26 [1] : vector<128x128xf32> to vector<128xf32>
    %73 = vector.shape_cast %72 : vector<128xf32> to vector<128x1xf32>
    %74 = vector.broadcast %73 : vector<128x1xf32> to vector<128x128xf32>
    %75 = arith.subf %71, %74 : vector<128x128xf32>
    %76 = math.exp %75 : vector<128x128xf32>
    %cst_27 = arith.constant dense<0.000000e+00> : vector<128xf32>
    %77 = vector.multi_reduction <add>, %76, %cst_27 [1] : vector<128x128xf32> to vector<128xf32>
    %78 = vector.shape_cast %77 : vector<128xf32> to vector<128x1xf32>
    %79 = tpu.reciprocal %78 {approx = true} : vector<128x1xf32> -> vector<128x1xf32>
    %80 = vector.broadcast %79 : vector<128x1xf32> to vector<128x128xf32>
    %81 = arith.mulf %76, %80 : vector<128x128xf32>
    %cst_28 = arith.constant dense<0.000000e+00> : vector<128x8xf32>
    %82 = tpu.matmul %81, %69, %cst_28 {dimension_numbers = #tpu.dot_dimension_numbers<[1], [0], [0], [1], [0, 0, 1, 1], [], []>} : vector<128x128xf32>, vector<128x8xf32>, vector<128x8xf32> -> vector<128x8xf32>
    %83 = vector.extract_strided_slice %49 {offsets = [0, 16], sizes = [128, 8], strides = [1, 1]} : vector<128x96xf32> to vector<128x8xf32>
    %84 = vector.extract_strided_slice %49 {offsets = [0, 48], sizes = [128, 8], strides = [1, 1]} : vector<128x96xf32> to vector<128x8xf32>
    %85 = vector.extract_strided_slice %49 {offsets = [0, 80], sizes = [128, 8], strides = [1, 1]} : vector<128x96xf32> to vector<128x8xf32>
    %cst_29 = arith.constant dense<0.000000e+00> : vector<128x128xf32>
    %86 = tpu.matmul %83, %84, %cst_29 {dimension_numbers = #tpu.dot_dimension_numbers<[1], [1], [0], [0], [0, 0, 1, 0], [], []>} : vector<128x8xf32>, vector<128x8xf32>, vector<128x128xf32> -> vector<128x128xf32>
    %87 = arith.addf %86, %50 : vector<128x128xf32>
    %cst_30 = arith.constant dense<0xFF800000> : vector<128xf32>
    %88 = vector.multi_reduction <maximumf>, %87, %cst_30 [1] : vector<128x128xf32> to vector<128xf32>
    %89 = vector.shape_cast %88 : vector<128xf32> to vector<128x1xf32>
    %90 = vector.broadcast %89 : vector<128x1xf32> to vector<128x128xf32>
    %91 = arith.subf %87, %90 : vector<128x128xf32>
    %92 = math.exp %91 : vector<128x128xf32>
    %cst_31 = arith.constant dense<0.000000e+00> : vector<128xf32>
    %93 = vector.multi_reduction <add>, %92, %cst_31 [1] : vector<128x128xf32> to vector<128xf32>
    %94 = vector.shape_cast %93 : vector<128xf32> to vector<128x1xf32>
    %95 = tpu.reciprocal %94 {approx = true} : vector<128x1xf32> -> vector<128x1xf32>
    %96 = vector.broadcast %95 : vector<128x1xf32> to vector<128x128xf32>
    %97 = arith.mulf %92, %96 : vector<128x128xf32>
    %cst_32 = arith.constant dense<0.000000e+00> : vector<128x8xf32>
    %98 = tpu.matmul %97, %85, %cst_32 {dimension_numbers = #tpu.dot_dimension_numbers<[1], [0], [0], [1], [0, 0, 1, 1], [], []>} : vector<128x128xf32>, vector<128x8xf32>, vector<128x8xf32> -> vector<128x8xf32>
    %99 = vector.extract_strided_slice %49 {offsets = [0, 24], sizes = [128, 8], strides = [1, 1]} : vector<128x96xf32> to vector<128x8xf32>
    %100 = vector.extract_strided_slice %49 {offsets = [0, 56], sizes = [128, 8], strides = [1, 1]} : vector<128x96xf32> to vector<128x8xf32>
    %101 = vector.extract_strided_slice %49 {offsets = [0, 88], sizes = [128, 8], strides = [1, 1]} : vector<128x96xf32> to vector<128x8xf32>
    %cst_33 = arith.constant dense<0.000000e+00> : vector<128x128xf32>
    %102 = tpu.matmul %99, %100, %cst_33 {dimension_numbers = #tpu.dot_dimension_numbers<[1], [1], [0], [0], [0, 0, 1, 0], [], []>} : vector<128x8xf32>, vector<128x8xf32>, vector<128x128xf32> -> vector<128x128xf32>
    %103 = arith.addf %102, %50 : vector<128x128xf32>
    %cst_34 = arith.constant dense<0xFF800000> : vector<128xf32>
    %104 = vector.multi_reduction <maximumf>, %103, %cst_34 [1] : vector<128x128xf32> to vector<128xf32>
    %105 = vector.shape_cast %104 : vector<128xf32> to vector<128x1xf32>
    %106 = vector.broadcast %105 : vector<128x1xf32> to vector<128x128xf32>
    %107 = arith.subf %103, %106 : vector<128x128xf32>
    %108 = math.exp %107 : vector<128x128xf32>
    %cst_35 = arith.constant dense<0.000000e+00> : vector<128xf32>
    %109 = vector.multi_reduction <add>, %108, %cst_35 [1] : vector<128x128xf32> to vector<128xf32>
    %110 = vector.shape_cast %109 : vector<128xf32> to vector<128x1xf32>
    %111 = tpu.reciprocal %110 {approx = true} : vector<128x1xf32> -> vector<128x1xf32>
    %112 = vector.broadcast %111 : vector<128x1xf32> to vector<128x128xf32>
    %113 = arith.mulf %108, %112 : vector<128x128xf32>
    %cst_36 = arith.constant dense<0.000000e+00> : vector<128x8xf32>
    %114 = tpu.matmul %113, %101, %cst_36 {dimension_numbers = #tpu.dot_dimension_numbers<[1], [0], [0], [1], [0, 0, 1, 1], [], []>} : vector<128x128xf32>, vector<128x8xf32>, vector<128x8xf32> -> vector<128x8xf32>
    %115 = tpu.concatenate %66, %82, %98, %114 in 1 : vector<128x8xf32>, vector<128x8xf32>, vector<128x8xf32>, vector<128x8xf32> -> vector<128x32xf32>
    %c128 = arith.constant 128 : index
    %c0_37 = arith.constant 0 : index
    %116 = vector.load %arg4[%c128, %c0_37] : memref<360x128xf32, #tpu.memory_space<vmem>>, vector<32x32xf32>
    %cst_38 = arith.constant dense<0.000000e+00> : vector<128x32xf32>
    %117 = tpu.matmul %115, %116, %cst_38 {dimension_numbers = #tpu.dot_dimension_numbers<[1], [0], [0], [1], [0, 0, 1, 1], [], []>} : vector<128x32xf32>, vector<32x32xf32>, vector<128x32xf32> -> vector<128x32xf32>
    %c312 = arith.constant 312 : index
    %c0_39 = arith.constant 0 : index
    %118 = vector.load %arg4[%c312, %c0_39] : memref<360x128xf32, #tpu.memory_space<vmem>>, vector<1x32xf32>
    %119 = vector.broadcast %118 : vector<1x32xf32> to vector<128x32xf32>
    %120 = arith.addf %117, %119 : vector<128x32xf32>
    %121 = arith.addf %120, %44 : vector<128x32xf32>
    %cst_40 = arith.constant dense<0.000000e+00> : vector<128xf32>
    %122 = vector.multi_reduction <add>, %121, %cst_40 [1] : vector<128x32xf32> to vector<128xf32>
    %123 = vector.shape_cast %122 : vector<128xf32> to vector<128x1xf32>
    %cst_41 = arith.constant 3.200000e+01 : f32
    %124 = vector.broadcast %cst_41 : f32 to vector<128x1xf32>
    %125 = arith.divf %123, %124 : vector<128x1xf32>
    %126 = vector.broadcast %125 : vector<128x1xf32> to vector<128x32xf32>
    %127 = arith.subf %121, %126 : vector<128x32xf32>
    %128 = arith.mulf %127, %127 : vector<128x32xf32>
    %cst_42 = arith.constant dense<0.000000e+00> : vector<128xf32>
    %129 = vector.multi_reduction <add>, %128, %cst_42 [1] : vector<128x32xf32> to vector<128xf32>
    %130 = vector.shape_cast %129 : vector<128xf32> to vector<128x1xf32>
    %cst_43 = arith.constant 3.200000e+01 : f32
    %131 = vector.broadcast %cst_43 : f32 to vector<128x1xf32>
    %132 = arith.divf %130, %131 : vector<128x1xf32>
    %133 = vector.broadcast %125 : vector<128x1xf32> to vector<128x32xf32>
    %134 = arith.subf %121, %133 : vector<128x32xf32>
    %cst_44 = arith.constant 9.99999974E-6 : f32
    %135 = vector.broadcast %cst_44 : f32 to vector<128x1xf32>
    %136 = arith.addf %132, %135 : vector<128x1xf32>
    %137 = math.rsqrt %136 : vector<128x1xf32>
    %138 = vector.broadcast %137 : vector<128x1xf32> to vector<128x32xf32>
    %139 = arith.mulf %134, %138 : vector<128x32xf32>
    %c320 = arith.constant 320 : index
    %c0_45 = arith.constant 0 : index
    %140 = vector.load %arg4[%c320, %c0_45] : memref<360x128xf32, #tpu.memory_space<vmem>>, vector<1x32xf32>
    %141 = vector.broadcast %140 : vector<1x32xf32> to vector<128x32xf32>
    %142 = arith.mulf %139, %141 : vector<128x32xf32>
    %c328 = arith.constant 328 : index
    %c0_46 = arith.constant 0 : index
    %143 = vector.load %arg4[%c328, %c0_46] : memref<360x128xf32, #tpu.memory_space<vmem>>, vector<1x32xf32>
    %144 = vector.broadcast %143 : vector<1x32xf32> to vector<128x32xf32>
    %145 = arith.addf %142, %144 : vector<128x32xf32>
    %c160 = arith.constant 160 : index
    %c0_47 = arith.constant 0 : index
    %146 = vector.load %arg4[%c160, %c0_47] : memref<360x128xf32, #tpu.memory_space<vmem>>, vector<32x32xf32>
    %cst_48 = arith.constant dense<0.000000e+00> : vector<128x32xf32>
    %147 = tpu.matmul %145, %146, %cst_48 {dimension_numbers = #tpu.dot_dimension_numbers<[1], [0], [0], [1], [0, 0, 1, 1], [], []>} : vector<128x32xf32>, vector<32x32xf32>, vector<128x32xf32> -> vector<128x32xf32>
    %c336 = arith.constant 336 : index
    %c0_49 = arith.constant 0 : index
    %148 = vector.load %arg4[%c336, %c0_49] : memref<360x128xf32, #tpu.memory_space<vmem>>, vector<1x32xf32>
    %149 = vector.broadcast %148 : vector<1x32xf32> to vector<128x32xf32>
    %150 = arith.addf %147, %149 : vector<128x32xf32>
    %cst_50 = arith.constant 0.000000e+00 : f32
    %151 = vector.broadcast %cst_50 : f32 to vector<128x32xf32>
    %152 = arith.maximumf %150, %151 : vector<128x32xf32>
    %c192 = arith.constant 192 : index
    %c0_51 = arith.constant 0 : index
    %153 = vector.load %arg4[%c192, %c0_51] : memref<360x128xf32, #tpu.memory_space<vmem>>, vector<32x64xf32>
    %cst_52 = arith.constant dense<0.000000e+00> : vector<128x64xf32>
    %154 = tpu.matmul %152, %153, %cst_52 {dimension_numbers = #tpu.dot_dimension_numbers<[1], [0], [0], [1], [0, 0, 1, 1], [], []>} : vector<128x32xf32>, vector<32x64xf32>, vector<128x64xf32> -> vector<128x64xf32>
    %c344 = arith.constant 344 : index
    %c0_53 = arith.constant 0 : index
    %155 = vector.load %arg4[%c344, %c0_53] : memref<360x128xf32, #tpu.memory_space<vmem>>, vector<1x64xf32>
    %156 = vector.broadcast %155 : vector<1x64xf32> to vector<128x64xf32>
    %157 = arith.addf %154, %156 : vector<128x64xf32>
    %cst_54 = arith.constant 0.000000e+00 : f32
    %158 = vector.broadcast %cst_54 : f32 to vector<128x64xf32>
    %159 = arith.maximumf %157, %158 : vector<128x64xf32>
    %c224 = arith.constant 224 : index
    %c0_55 = arith.constant 0 : index
    %160 = vector.load %arg4[%c224, %c0_55] : memref<360x128xf32, #tpu.memory_space<vmem>>, vector<64x128xf32>
    %cst_56 = arith.constant dense<0.000000e+00> : vector<128x128xf32>
    %161 = tpu.matmul %159, %160, %cst_56 {dimension_numbers = #tpu.dot_dimension_numbers<[1], [0], [0], [1], [0, 0, 1, 1], [], []>} : vector<128x64xf32>, vector<64x128xf32>, vector<128x128xf32> -> vector<128x128xf32>
    %c352 = arith.constant 352 : index
    %c0_57 = arith.constant 0 : index
    %162 = vector.load %arg4[%c352, %c0_57] : memref<360x128xf32, #tpu.memory_space<vmem>>, vector<1x128xf32>
    %163 = vector.broadcast %162 : vector<1x128xf32> to vector<128x128xf32>
    %164 = arith.addf %161, %163 : vector<128x128xf32>
    %c0_58 = arith.constant 0 : index
    %c0_59 = arith.constant 0 : index
    %c0_60 = arith.constant 0 : index
    %165 = vector.load %arg5[%c0_58, %c0_59, %c0_60] : memref<1x128x128xf32, #tpu.memory_space<vmem>>, vector<1x128x128xf32>
    %166 = vector.shape_cast %165 : vector<1x128x128xf32> to vector<128x128xf32>
    %167 = vector.shape_cast %164 : vector<128x128xf32> to vector<1x128x128xf32>
    tpu.vector_store %arg5[%c0_58, %c0_59, %c0_60], %167 {strides = array<i32>} : memref<1x128x128xf32, #tpu.memory_space<vmem>>, vector<1x128x128xf32>,
    return
  }
  func.func @transform_0(%arg0: i32) -> (i32, i32, i32) {
    %c0_i32 = arith.constant 0 : i32
    %c0_i32_0 = arith.constant 0 : i32
    %c0_i32_1 = arith.constant 0 : i32
    return %arg0, %c0_i32, %c0_i32_0 : i32, i32, i32
  }
  func.func @transform_1(%arg0: i32) -> (i32, i32, i32) {
    %c0_i32 = arith.constant 0 : i32
    %c0_i32_0 = arith.constant 0 : i32
    %c0_i32_1 = arith.constant 0 : i32
    return %arg0, %c0_i32, %c0_i32_0 : i32, i32, i32
  }
  func.func @transform_2(%arg0: i32) -> (i32, i32) {
    %c0_i32 = arith.constant 0 : i32
    %c0_i32_0 = arith.constant 0 : i32
    %c0_i32_1 = arith.constant 0 : i32
    return %c0_i32, %c0_i32_0 : i32, i32
  }
  func.func @transform_3(%arg0: i32) -> (i32, i32) {
    %c0_i32 = arith.constant 0 : i32
    %c0_i32_0 = arith.constant 0 : i32
    %c0_i32_1 = arith.constant 0 : i32
    return %c0_i32, %c0_i32_0 : i32, i32
  }
  func.func @transform_4(%arg0: i32) -> (i32, i32, i32) {
    %c0_i32 = arith.constant 0 : i32
    %c0_i32_0 = arith.constant 0 : i32
    %c0_i32_1 = arith.constant 0 : i32
    return %arg0, %c0_i32, %c0_i32_0 : i32, i32, i32
  }
}

</mosaic_0001>

<bundles_post_ra>
// kernel: tpu_custom_call.1
= control target key start
LH: loop header
LB: loop body
LE: loop exit
PB: predicated region body
PF: predicated region fallthrough
CT: control target
= control target key end

     0   :  { %9 = vsyncpa [#allocation3], 0  ;;  %s10523_s0 = inlined_call_operand.vmem [shape: f32[1,128,32], index: 0, kind: input, shape index: {}]   ;;  %s10524_s1 = inlined_call_operand.vmem [shape: s32[1,1,128], index: 1, kind: input, shape index: {}]   ;;  %s10525_s2 = inlined_call_operand.vmem [shape: f32[128,128], index: 2, kind: input, shape index: {}]   ;;  %s10526_s3 = inlined_call_operand.hbm [shape: f32[360,128], index: 3, kind: input, shape index: {}]   ;;  %s10527_s4 = inlined_call_operand.hbm [shape: f32[1,128,128], index: 4, kind: output, shape index: {}]  }
   0x1   :  { %10 = vsyncpa [#allocation4], 0  ;;  %s7923_s15 = smov [#allocation2]   ;;  %s7875_s19 = scalar_lea.hbm %s10526_s3, 5760 }
   0x2   :  { %s22_s16 = sshll.u32 %s7923_s15, 4  ;;  %p7876_p0 = scmp.ne.s32.totalorder %s10526_s3, %s7875_s19  ;;  %s23_s16 = int_to_ptr.vmem [resolvable:$true] %s22_s16 }
   0x3   :  { %p7879_p1 = scmp.lt.u32.totalorder %s7875_s19, %s10526_s3 }
   0x5   :  { %p7881_p2 = pnand %p7879_p1, %p7876_p0 }
   0x7   :  { %7884 = shalt.err (!%p7881_p2)
}
   0x8   :  { %s7885_s24 = scalar_lea.vmem %s23_s16, 5760  ;;  %p7890_p4 = scmp.lt.s32.totalorder %s23_s16, %s23_s16 }
   0x9   :  { %p7886_p3 = scmp.ne.s32.totalorder %s23_s16, %s7885_s24  ;;  %p7891_p5 = scmp.lt.s32.totalorder %s7885_s24, %s7885_s24 }
   0xb   :  { %p7892_p6 = por %p7891_p5, %p7890_p4 }
   0xd   :  { %p7893_p7 = pnand %p7892_p6, %p7886_p3 }
   0xf   :  { %7896 = shalt.err (!%p7893_p7)
}
  0x10   :  { %s7924_s25 = smov 128   ;;  %s7925_s26 = smov 8  }
  0x11   :  { %28 = dma.hbm_to_vmem [thread:$0]  %s10526_s3, 5760, %s23_s16, [#allocation3], %s7924_s25, %s7924_s25, %s7925_s26  }
  0x12   :  { %7919 = dma.done.wait [#allocation3], 5760  }
  0x13   :  { %7920 = vsyncadd [#allocation3], 4294961536  ;;  %vm57_vm0 = vcmask 261120   ;;  %v48_v0 = vld [vmem:[#allocation2] sm:$0xff]  ;;  %v49_v1 = vld [vmem:[#allocation2 + $0x8] sm:$0xff]  ;;  %v268_v22 = vlaneseq  ;;  %v7926_v26 = vmov 1.0  }
  0x14   :  { %v50_v2 = vld [vmem:[#allocation2 + $0x10] sm:$0xff]  ;;  %v6708_v3 = vpack.c.bf16 %v49_v1, %v48_v0  ;;  %v51_v4 = vld [vmem:[#allocation2 + $0x18] sm:$0xff]  ;;  %v7985_v5 = vld [vmem:[%s10523_s0] sm:$0xff]  ;;  %s7929_s11 = smov 96   ;;  %s7930_s16 = smov 88  }
  0x15   :  { %v6712_v6 = vpack.c.bf16 %v51_v4, %v50_v2  ;;  %5972 = vmatprep.mubr.msk.f32.mxu0 %vm57_vm0, %v7985_v5  ;;  %v7992_v7 = vld [vmem:[%s10523_s0 + $0x8] sm:$0xff]  ;;  %v7997_v8 = vld [vmem:[%s10523_s0 + $0x10] sm:$0xff]  ;;  %v8006_v9 = vld [vmem:[%s10523_s0 + $0x18] sm:$0xff]  ;;  %v269_v23 = vshrl.u32 %v268_v22, 7  ;;  %s7932_s19 = smov 56   ;;  %s7933_s20 = smov 80  }
  0x16   :  { %6709 = vmatprep.subr.bf16.mxu0 %v6708_v3  ;;  %v8011_v10 = vld [vmem:[%s10523_s0 + $0x20] sm:$0xff]  ;;  %v8020_v11 = vld [vmem:[%s10523_s0 + $0x28] sm:$0xff]  ;;  %v8025_v12 = vld [vmem:[%s10523_s0 + $0x30] sm:$0xff]  ;;  %s7934_s21 = smov 112   ;;  %s7935_s22 = smov 48  }
  0x17   :  { %6711 = vmatpush3.bf16.msra.mxu0 %v6708_v3  ;;  %v8034_v13 = vld [vmem:[%s10523_s0 + $0x38] sm:$0xff]  ;;  %v8039_v14 = vld [vmem:[%s10523_s0 + $0x40] sm:$0xff]  ;;  %v8048_v15 = vld [vmem:[%s10523_s0 + $0x48] sm:$0xff]  ;;  %v8099_v25 = vadd.s32 8, %v269_v23  ;;  %v8105_v27 = vadd.s32 16, %v269_v23  ;;  %v8107_v28 = vadd.s32 24, %v269_v23 }
  0x18   :  { %6713 = vmatprep.subr.bf16.mxu0 %v6712_v6  ;;  %v8053_v16 = vld [vmem:[%s10523_s0 + $0x50] sm:$0xff]  ;;  %v8062_v17 = vld [vmem:[%s10523_s0 + $0x58] sm:$0xff]  ;;  %v8067_v18 = vld [vmem:[%s10523_s0 + $0x60] sm:$0xff]  ;;  %v8113_v29 = vadd.s32 32, %v269_v23  ;;  %v8115_v30 = vadd.s32 40, %v269_v23  ;;  %v8121_v31 = vadd.s32 48, %v269_v23 }
  0x19   :  { %v8076_v19 = vld [vmem:[%s10523_s0 + $0x68] sm:$0xff]  ;;  %v8081_v20 = vld [vmem:[%s10523_s0 + $0x70] sm:$0xff]  ;;  %v8090_v21 = vld [vmem:[%s10523_s0 + $0x78] sm:$0xff]  ;;  %v8123_v32 = vadd.s32 56, %v269_v23  ;;  %v8129_v33 = vadd.s32 64, %v269_v23  ;;  %v8131_v34 = vadd.s32 72, %v269_v23 }
  0x1a   :  { %v8097_v24 = vld [vmem:[%s10524_s1] ss:$0 sm:$0xff]  ;;  %v8137_v35 = vadd.s32 80, %v269_v23  ;;  %v8139_v36 = vadd.s32 88, %v269_v23  ;;  %v8145_v37 = vadd.s32 96, %v269_v23  ;;  %v8147_v38 = vadd.s32 104, %v269_v23 }
  0x1b   :  { %6715 = vmatpush3.bf16.msra.mxu0 %v6712_v6  ;;  %vm289_vm1 = vcmp.eq.s32.totalorder %v269_v23, %v8097_v24  ;;  %vm290_vm2 = vcmp.eq.s32.totalorder %v8099_v25, %v8097_v24  ;;  %vm291_vm3 = vcmp.eq.s32.totalorder %v8105_v27, %v8097_v24  ;;  %vm292_vm4 = vcmp.eq.s32.totalorder %v8107_v28, %v8097_v24  ;;  %v546_v41 = vld [vmem:[#allocation2 + $0x20] sm:$0xff]  ;;  %v547_v42 = vld [vmem:[#allocation2 + $0x28] sm:$0xff]  ;;  %v548_v43 = vld [vmem:[#allocation2 + $0x30] sm:$0xff]  ;;  %s7927_s0 = smov 32   ;;  %s7928_s1 = smov 64  }
  0x1c   :  { %6028 = vmatprep.mubr.msk.f32.mxu1 %vm289_vm1, %v7926_v26  ;;  %vm293_vm5 = vcmp.eq.s32.totalorder %v8113_v29, %v8097_v24  ;;  %vm294_vm6 = vcmp.eq.s32.totalorder %v8115_v30, %v8097_v24  ;;  %vm295_vm7 = vcmp.eq.s32.totalorder %v8121_v31, %v8097_v24  ;;  %vm296_vm8 = vcmp.eq.s32.totalorder %v8123_v32, %v8097_v24  ;;  %v549_v45 = vld [vmem:[#allocation2 + $0x38] sm:$0xff]  ;;  %v550_v47 = vld [vmem:[#allocation2 + $0x40] sm:$0xff]  ;;  %v551_v48 = vld [vmem:[#allocation2 + $0x48] sm:$0xff]  ;;  %s7936_s29 = smov 72   ;;  %s7939_s5 = smov 16  }
  0x1d   :  { %vm297_vm9 = vcmp.eq.s32.totalorder %v8129_v33, %v8097_v24  ;;  %vm298_vm10 = vcmp.eq.s32.totalorder %v8131_v34, %v8097_v24  ;;  %vm299_vm11 = vcmp.eq.s32.totalorder %v8137_v35, %v8097_v24  ;;  %vm300_vm12 = vcmp.eq.s32.totalorder %v8139_v36, %v8097_v24  ;;  %482 = vrot.lane.b32.xlu0 %v7985_v5, %s7927_s0  ;;  %v552_v50 = vld [vmem:[#allocation2 + $0x50] sm:$0xff]  ;;  %v553_v51 = vld [vmem:[#allocation2 + $0x58] sm:$0xff]  ;;  %v8193_v53 = vld [vmem:[#allocation2 + $0x120] ss:$0 sm:$0xff]  ;;  %s7940_s6 = smov 24   ;;  %s7941_s7 = smov [#allocation5]  }
  0x1e   :  { %5973 = vmatmul.mubr.msk.f32.vlgmr.msra.gmra.mrb[0].mxu0 %vm57_vm0, %v7992_v7  ;;  %vm301_vm13 = vcmp.eq.s32.totalorder %v8145_v37, %v8097_v24  ;;  %vm302_vm14 = vcmp.eq.s32.totalorder %v8147_v38, %v8097_v24  ;;  %v8153_v39 = vadd.s32 112, %v269_v23  ;;  %v8155_v40 = vadd.s32 120, %v269_v23  ;;  %486 = vrot.lane.b32.xlu1 %v7997_v8, %s7927_s0  ;;  %s5218_s8 = sshll.u32 %s7941_s7, 4  ;;  %s5219_s8 = int_to_ptr.vmem [resolvable:$true] %s5218_s8 }
  0x1f   :  { %5975 = vmatprep.mubr.msk.f32.mxu0 %vm57_vm0, %v7997_v8  ;;  %v6748_v44 = vpack.c.bf16 %v547_v42, %v546_v41  ;;  %v6752_v46 = vpack.c.bf16 %v549_v45, %v548_v43  ;;  %v6756_v49 = vpack.c.bf16 %v551_v48, %v550_v47  ;;  %v6760_v52 = vpack.c.bf16 %v553_v51, %v552_v50  ;;  %s7897_s9 = scalar_lea.vmem %s5219_s8, 2048  ;;  %p7902_p9 = scmp.lt.s32.totalorder %s5219_s8, %s5219_s8 }
  0x20   :  { %vm303_vm15 = vcmp.eq.s32.totalorder %v8153_v39, %v8097_v24  ;;  %vm304_vm1 = vcmp.eq.s32.totalorder %v8155_v40, %v8097_v24  ;;  %p7898_p8 = scmp.ne.s32.totalorder %s5219_s8, %s7897_s9  ;;  %p7903_p10 = scmp.lt.s32.totalorder %s7897_s9, %s7897_s9 }
  0x21   :  { %6749 = vmatprep.subr.bf16.mxu0 %v6748_v44  ;;  %484 = vrot.lane.b32.xlu0 %v7992_v7, %s7927_s0 }
  0x22   :  { %5976 = vmatmul.mubr.msk.f32.gmra.mrb[2].mxu0 %vm57_vm0, %v8006_v9  ;;  %488 = vrot.lane.b32.xlu1 %v8006_v9, %s7927_s0  ;;  %p7904_p11 = por %p7903_p10, %p7902_p9 }
  0x23   :  { %5978 = vmatprep.mubr.msk.f32.mxu0 %vm57_vm0, %v8011_v10  ;;  %6751 = vmatpush3.bf16.msra.mxu0 %v6748_v44 }
  0x24   :  { %6753 = vmatprep.subr.bf16.mxu0 %v6752_v46  ;;  %p7905_p12 = pnand %p7904_p11, %p7898_p8 }
  0x25   :  { %490 = vrot.lane.b32.xlu0 %v8011_v10, %s7927_s0 }
  0x26   :  { %5979 = vmatmul.mubr.msk.f32.gmra.mrb[4].mxu0 %vm57_vm0, %v8020_v11  ;;  %492 = vrot.lane.b32.xlu1 %v8020_v11, %s7927_s0 }
  0x27   :  { %5981 = vmatprep.mubr.msk.f32.mxu0 %vm57_vm0, %v8025_v12  ;;  %6755 = vmatpush3.bf16.msra.mxu0 %v6752_v46 }
  0x28   :  { %6757 = vmatprep.subr.bf16.mxu0 %v6756_v49 }
  0x29   :  { %494 = vrot.lane.b32.xlu0 %v8025_v12, %s7927_s0 }
  0x2a   :  { %5982 = vmatmul.mubr.msk.f32.gmra.mrb[6].mxu0 %vm57_vm0, %v8034_v13  ;;  %496 = vrot.lane.b32.xlu1 %v8034_v13, %s7927_s0 }
  0x2b   :  { %5984 = vmatprep.mubr.msk.f32.mxu0 %vm57_vm0, %v8039_v14  ;;  %6759 = vmatpush3.bf16.msra.mxu0 %v6756_v49 }
  0x2c   :  { %6761 = vmatprep.subr.bf16.mxu0 %v6760_v52 }
  0x2d   :  { %498 = vrot.lane.b32.xlu0 %v8039_v14, %s7927_s0 }
  0x2e   :  { %5985 = vmatmul.mubr.msk.f32.gmra.mrb[8].mxu0 %vm57_vm0, %v8048_v15  ;;  %500 = vrot.lane.b32.xlu1 %v8048_v15, %s7927_s0 }
  0x2f   :  { %5987 = vmatprep.mubr.msk.f32.mxu0 %vm57_vm0, %v8053_v16  ;;  %6763 = vmatpush3.bf16.msra.mxu0 %v6760_v52 }
  0x31   :  { %502 = vrot.lane.b32.xlu0 %v8053_v16, %s7927_s0 }
  0x32   :  { %5988 = vmatmul.mubr.msk.f32.gmra.mrb[10].mxu0 %vm57_vm0, %v8062_v17  ;;  %504 = vrot.lane.b32.xlu1 %v8062_v17, %s7927_s0 }
  0x33   :  { %5990 = vmatprep.mubr.msk.f32.mxu0 %vm57_vm0, %v8067_v18 }
  0x35   :  { %506 = vrot.lane.b32.xlu0 %v8067_v18, %s7927_s0 }
  0x36   :  { %5991 = vmatmul.mubr.msk.f32.gmra.mrb[12].mxu0 %vm57_vm0, %v8076_v19  ;;  %508 = vrot.lane.b32.xlu1 %v8076_v19, %s7927_s0 }
  0x37   :  { %5993 = vmatprep.mubr.msk.f32.mxu0 %vm57_vm0, %v8081_v20 }
  0x39   :  { %510 = vrot.lane.b32.xlu0 %v8081_v20, %s7927_s0 }
  0x3a   :  { %5994 = vmatmul.mubr.msk.f32.gmra.mrb[14].mxu0 %vm57_vm0, %v8090_v21  ;;  %512 = vrot.lane.b32.xlu1 %v8090_v21, %s7927_s0 }
  0x8f   :  { %v8273_v27 = vpop.permute.xlu0 %482 }
  0x90   :  { %v8271_v25 = vpop.permute.xlu1 %486 }
  0x93   :  { %v8277_v29 = vpop.permute.xlu0 %484 }
  0x94   :  { %v8275_v28 = vpop.permute.xlu1 %488 }
  0x97   :  { %v8281_v31 = vpop.permute.xlu0 %490 }
  0x98   :  { %v8279_v30 = vpop.permute.xlu1 %492 }
  0x9b   :  { %v8290_v35 = vpop.permute.xlu0 %494 }
  0x9c   :  { %v8285_v24 = vpop.permute.xlu1 %496 }
  0xf1   :  { %v5974_v54 = vpop.f32.mrb[0].mxu0 }
  0xf2   :  { %v178_v55 = vadd.f32 %v5974_v54, %v8193_v53  ;;  %v172_v56 = vpop.f32.mrb[1].mxu0 }
  0xf3   :  { %v173_v57 = vadd.f32 %v8193_v53, %v172_v56 }
  0xf4   :  { %v252_v58 = vmax.f32 %v178_v55, 0.0 }
  0xf5   :  { %v251_v59 = vmax.f32 %v173_v57, 0.0  ;;  %v5977_v60 = vpop.f32.mrb[2].mxu0 }
  0xf6   :  { %v188_v61 = vadd.f32 %v5977_v60, %v8193_v53  ;;  %v182_v62 = vpop.f32.mrb[3].mxu0 }
  0xf7   :  { %v183_v63 = vadd.f32 %v8193_v53, %v182_v62  ;;  %v6716_v0 = vpack.c.bf16 %v252_v58, %v251_v59 }
  0xf8   :  { %v254_v1 = vmax.f32 %v188_v61, 0.0 }
  0xf9   :  { %v253_v2 = vmax.f32 %v183_v63, 0.0  ;;  %v5980_v3 = vpop.f32.mrb[4].mxu0  ;;  %6717 = vmatprep.subr.bf16.mxu1 %v6716_v0 }
  0xfa   :  { %v198_v4 = vadd.f32 %v5980_v3, %v8193_v53  ;;  %v192_v5 = vpop.f32.mrb[5].mxu0  ;;  %6719 = vmatpush3.bf16.msra.mxu1 %v6716_v0 }
  0xfb   :  { %v6720_v6 = vpack.c.bf16 %v254_v1, %v253_v2  ;;  %v193_v7 = vadd.f32 %v8193_v53, %v192_v5  ;;  %v8303_v2 = vpop.permute.xlu0 %498 }
  0xfc   :  { %v256_v8 = vmax.f32 %v198_v4, 0.0 }
  0xfd   :  { %v255_v9 = vmax.f32 %v193_v7, 0.0  ;;  %v5983_v10 = vpop.f32.mrb[6].mxu0  ;;  %6721 = vmatprep.subr.bf16.mxu1 %v6720_v6 }
  0xfe   :  { %v208_v11 = vadd.f32 %v5983_v10, %v8193_v53  ;;  %v202_v12 = vpop.f32.mrb[7].mxu0  ;;  %6723 = vmatpush3.bf16.msra.mxu1 %v6720_v6 }
  0xff   :  { %v6724_v13 = vpack.c.bf16 %v256_v8, %v255_v9  ;;  %v203_v14 = vadd.f32 %v8193_v53, %v202_v12  ;;  %v8316_v9 = vpop.permute.xlu0 %502 }
 0x100   :  { %v258_v15 = vmax.f32 %v208_v11, 0.0 }
 0x101   :  { %v257_v16 = vmax.f32 %v203_v14, 0.0  ;;  %v5986_v17 = vpop.f32.mrb[8].mxu0  ;;  %6725 = vmatprep.subr.bf16.mxu1 %v6724_v13 }
 0x102   :  { %v218_v18 = vadd.f32 %v5986_v17, %v8193_v53  ;;  %v212_v19 = vpop.f32.mrb[9].mxu0  ;;  %6727 = vmatpush3.bf16.msra.mxu1 %v6724_v13 }
 0x103   :  { %v6728_v20 = vpack.c.bf16 %v258_v15, %v257_v16  ;;  %v213_v21 = vadd.f32 %v8193_v53, %v212_v19 }
 0x104   :  { %v260_v22 = vmax.f32 %v218_v18, 0.0  ;;  %v8329_v18 = vpop.permute.xlu0 %506 }
 0x105   :  { %v259_v23 = vmax.f32 %v213_v21, 0.0  ;;  %v5989_v41 = vpop.f32.mrb[10].mxu0  ;;  %6729 = vmatprep.subr.bf16.mxu1 %v6728_v20 }
 0x106   :  { %v228_v42 = vadd.f32 %v5989_v41, %v8193_v53  ;;  %v222_v43 = vpop.f32.mrb[11].mxu0  ;;  %6731 = vmatpush3.bf16.msra.mxu1 %v6728_v20 }
 0x107   :  { %v6732_v44 = vpack.c.bf16 %v260_v22, %v259_v23  ;;  %v223_v45 = vadd.f32 %v8193_v53, %v222_v43 }
 0x108   :  { %v262_v46 = vmax.f32 %v228_v42, 0.0  ;;  %v8342_v42 = vpop.permute.xlu0 %510 }
 0x109   :  { %v261_v47 = vmax.f32 %v223_v45, 0.0  ;;  %v5992_v48 = vpop.f32.mrb[12].mxu0  ;;  %6733 = vmatprep.subr.bf16.mxu1 %v6732_v44 }
 0x10a   :  { %v238_v49 = vadd.f32 %v5992_v48, %v8193_v53  ;;  %v232_v50 = vpop.f32.mrb[13].mxu0  ;;  %6735 = vmatpush3.bf16.msra.mxu1 %v6732_v44 }
 0x10b   :  { %v6736_v51 = vpack.c.bf16 %v262_v46, %v261_v47  ;;  %v233_v52 = vadd.f32 %v8193_v53, %v232_v50  ;;  %v5280_v47 = vld [vmem:[#allocation2 + $0x128] ss:$0 sm:$0xff] }
 0x10c   :  { %v264_v54 = vmax.f32 %v238_v49, 0.0 }
 0x10d   :  { %v263_v55 = vmax.f32 %v233_v52, 0.0  ;;  %v5995_v56 = vpop.f32.mrb[14].mxu0  ;;  %6737 = vmatprep.subr.bf16.mxu1 %v6736_v51 }
 0x10e   :  { %v248_v57 = vadd.f32 %v5995_v56, %v8193_v53  ;;  %v242_v58 = vpop.f32.mrb[15].mxu0  ;;  %6739 = vmatpush3.bf16.msra.mxu1 %v6736_v51 }
 0x10f   :  { %v6740_v59 = vpack.c.bf16 %v264_v54, %v263_v55  ;;  %v243_v60 = vadd.f32 %v8193_v53, %v242_v58  ;;  %v8299_v53 = vpop.permute.xlu1 %500 }
 0x110   :  { %v266_v61 = vmax.f32 %v248_v57, 0.0 }
 0x111   :  { %v265_v62 = vmax.f32 %v243_v60, 0.0  ;;  %6741 = vmatprep.subr.bf16.mxu1 %v6740_v59 }
 0x112   :  { %6743 = vmatpush3.bf16.msra.mxu1 %v6740_v59 }
 0x113   :  { %v6744_v63 = vpack.c.bf16 %v266_v61, %v265_v62  ;;  %v8313_v8 = vpop.permute.xlu1 %504 }
 0x115   :  { %6745 = vmatprep.subr.bf16.mxu1 %v6744_v63 }
 0x116   :  { %6747 = vmatpush3.bf16.msra.mxu1 %v6744_v63 }
 0x117   :  { %v8325_v15 = vpop.permute.xlu1 %508 }
 0x119   :  { %6029 = vmatmul.mubr.msk.f32.vlgmr.msra.gmra.mrb[0].mxu1 %vm290_vm2, %v7926_v26  ;;  %vm559_vm2 = vcmask 523264  }
 0x11a   :  { %6031 = vmatprep.mubr.msk.f32.mxu1 %vm291_vm3, %v7926_v26  ;;  %vm1451_vm3 = vcmask 64512  }
 0x11b   :  { %v8339_v41 = vpop.permute.xlu1 %512 }
 0x11d   :  { %6032 = vmatmul.mubr.msk.f32.gmra.mrb[2].mxu1 %vm292_vm4, %v7926_v26  ;;  %vm8755_vm4 = vmpackc.low %vm1451_vm3, %vm1451_vm3 }
 0x11e   :  { %6034 = vmatprep.mubr.msk.f32.mxu1 %vm293_vm5, %v7926_v26  ;;  %vm4036_vm5 = vcmask 130048  }
 0x121   :  { %6035 = vmatmul.mubr.msk.f32.gmra.mrb[4].mxu1 %vm294_vm6, %v7926_v26  ;;  %vm4053_vm6 = vcmask 195584  }
 0x122   :  { %6037 = vmatprep.mubr.msk.f32.mxu1 %vm295_vm7, %v7926_v26 }
 0x125   :  { %6038 = vmatmul.mubr.msk.f32.gmra.mrb[6].mxu1 %vm296_vm8, %v7926_v26 }
 0x126   :  { %6040 = vmatprep.mubr.msk.f32.mxu1 %vm297_vm9, %v7926_v26 }
 0x129   :  { %6041 = vmatmul.mubr.msk.f32.gmra.mrb[8].mxu1 %vm298_vm10, %v7926_v26 }
 0x12a   :  { %6043 = vmatprep.mubr.msk.f32.mxu1 %vm299_vm11, %v7926_v26 }
 0x12d   :  { %6044 = vmatmul.mubr.msk.f32.gmra.mrb[10].mxu1 %vm300_vm12, %v7926_v26 }
 0x12e   :  { %6046 = vmatprep.mubr.msk.f32.mxu1 %vm301_vm13, %v7926_v26 }
 0x131   :  { %6047 = vmatmul.mubr.msk.f32.gmra.mrb[12].mxu1 %vm302_vm14, %v7926_v26 }
 0x132   :  { %6049 = vmatprep.mubr.msk.f32.mxu1 %vm303_vm15, %v7926_v26 }
 0x135   :  { %6050 = vmatmul.mubr.msk.f32.gmra.mrb[14].mxu1 %vm304_vm1, %v7926_v26 }
 0x1ec   :  { %v6030_v32 = vpop.f32.mrb[0].mxu1 }
 0x1ed   :  { %v403_v33 = vpop.f32.mrb[1].mxu1  ;;  %v531_v26 = vsel %vm57_vm0, %v6030_v32, %v8277_v29 }
 0x1ee   :  { %v530_v34 = vsel %vm57_vm0, %v403_v33, %v8273_v27 }
 0x1ef   :  { %6068 = vmatprep.mubr.msk.f32.mxu0 %vm559_vm2, %v530_v34 }
 0x1f0   :  { %v6033_v36 = vpop.f32.mrb[2].mxu1  ;;  %6069 = vmatmul.mubr.msk.f32.vlgmr.msra.gmra.mrb[16].mxu0 %vm559_vm2, %v531_v26 }
 0x1f1   :  { %v413_v37 = vpop.f32.mrb[3].mxu1  ;;  %v533_v38 = vsel %vm57_vm0, %v6033_v36, %v8275_v28 }
 0x1f2   :  { %v532_v39 = vsel %vm57_vm0, %v413_v37, %v8271_v25 }
 0x1f3   :  { %6071 = vmatprep.mubr.msk.f32.mxu0 %vm559_vm2, %v532_v39 }
 0x1f4   :  { %v6036_v40 = vpop.f32.mrb[4].mxu1  ;;  %6072 = vmatmul.mubr.msk.f32.gmra.mrb[18].mxu0 %vm559_vm2, %v533_v38 }
 0x1f5   :  { %v423_v0 = vpop.f32.mrb[5].mxu1  ;;  %v535_v1 = vsel %vm57_vm0, %v6036_v40, %v8279_v30 }
 0x1f6   :  { %v534_v3 = vsel %vm57_vm0, %v423_v0, %v8281_v31 }
 0x1f7   :  { %6074 = vmatprep.mubr.msk.f32.mxu0 %vm559_vm2, %v534_v3 }
 0x1f8   :  { %v6039_v4 = vpop.f32.mrb[6].mxu1  ;;  %6075 = vmatmul.mubr.msk.f32.gmra.mrb[20].mxu0 %vm559_vm2, %v535_v1 }
 0x1f9   :  { %v433_v5 = vpop.f32.mrb[7].mxu1  ;;  %v537_v6 = vsel %vm57_vm0, %v6039_v4, %v8285_v24 }
 0x1fa   :  { %v536_v7 = vsel %vm57_vm0, %v433_v5, %v8290_v35 }
 0x1fb   :  { %6077 = vmatprep.mubr.msk.f32.mxu0 %vm559_vm2, %v536_v7 }
 0x1fc   :  { %v6042_v10 = vpop.f32.mrb[8].mxu1  ;;  %6078 = vmatmul.mubr.msk.f32.gmra.mrb[22].mxu0 %vm559_vm2, %v537_v6 }
 0x1fd   :  { %v443_v11 = vpop.f32.mrb[9].mxu1  ;;  %v539_v12 = vsel %vm57_vm0, %v6042_v10, %v8299_v53 }
 0x1fe   :  { %v538_v13 = vsel %vm57_vm0, %v443_v11, %v8303_v2 }
 0x1ff   :  { %6080 = vmatprep.mubr.msk.f32.mxu0 %vm559_vm2, %v538_v13 }
 0x200   :  { %v6045_v14 = vpop.f32.mrb[10].mxu1  ;;  %6081 = vmatmul.mubr.msk.f32.gmra.mrb[24].mxu0 %vm559_vm2, %v539_v12 }
 0x201   :  { %v453_v16 = vpop.f32.mrb[11].mxu1  ;;  %v541_v17 = vsel %vm57_vm0, %v6045_v14, %v8313_v8 }
 0x202   :  { %v540_v19 = vsel %vm57_vm0, %v453_v16, %v8316_v9 }
 0x203   :  { %6083 = vmatprep.mubr.msk.f32.mxu0 %vm559_vm2, %v540_v19 }
 0x204   :  { %v6048_v20 = vpop.f32.mrb[12].mxu1  ;;  %6084 = vmatmul.mubr.msk.f32.gmra.mrb[26].mxu0 %vm559_vm2, %v541_v17 }
 0x205   :  { %v463_v21 = vpop.f32.mrb[13].mxu1  ;;  %v543_v22 = vsel %vm57_vm0, %v6048_v20, %v8325_v15 }
 0x206   :  { %v542_v23 = vsel %vm57_vm0, %v463_v21, %v8329_v18 }
 0x207   :  { %6086 = vmatprep.mubr.msk.f32.mxu0 %vm559_vm2, %v542_v23 }
 0x208   :  { %v6051_v43 = vpop.f32.mrb[14].mxu1  ;;  %6087 = vmatmul.mubr.msk.f32.gmra.mrb[28].mxu0 %vm559_vm2, %v543_v22 }
 0x209   :  { %v473_v44 = vpop.f32.mrb[15].mxu1  ;;  %v545_v45 = vsel %vm57_vm0, %v6051_v43, %v8339_v41 }
 0x20a   :  { %v544_v46 = vsel %vm57_vm0, %v473_v44, %v8342_v42 }
 0x20b   :  { %6089 = vmatprep.mubr.msk.f32.mxu0 %vm559_vm2, %v544_v46 }
 0x20c   :  { %6090 = vmatmul.mubr.msk.f32.gmra.mrb[30].mxu0 %vm559_vm2, %v545_v45 }
 0x2c3   :  { %v6070_v48 = vpop.f32.mrb[16].mxu0 }
 0x2c4   :  { %v8351_v49 = vadd.f32 %v6070_v48, %v5280_v47  ;;  %v674_v50 = vpop.f32.mrb[17].mxu0 }
 0x2c5   :  { %v8353_v51 = vadd.f32 %v5280_v47, %v674_v50 }
 0x2c6   :  { %867 = vrot.lane.b32.xlu1 %v8351_v49, %s7927_s0  ;;  %v5298_v11 = vmul.f32 -1.442695, %v8351_v49 }
 0x2c7   :  { %865 = vrot.lane.b32.xlu0 %v8353_v51, %s7927_s0  ;;  %v6073_v52 = vpop.f32.mrb[18].mxu0  ;;  %v5297_v12 = vmul.f32 -1.442695, %v8353_v51 }
 0x2c8   :  { %v8359_v54 = vadd.f32 %v6073_v52, %v5280_v47  ;;  %v684_v55 = vpop.f32.mrb[19].mxu0  ;;  %7475 = vpow2.f32 %v5298_v11 }
 0x2c9   :  { %v8361_v56 = vadd.f32 %v5280_v47, %v684_v55  ;;  %7477 = vpow2.f32 %v5297_v12 }
 0x2ca   :  { %871 = vrot.lane.b32.xlu1 %v8359_v54, %s7927_s0  ;;  %v5300_v13 = vmul.f32 -1.442695, %v8359_v54 }
 0x2cb   :  { %869 = vrot.lane.b32.xlu0 %v8361_v56, %s7927_s0  ;;  %v6076_v57 = vpop.f32.mrb[20].mxu0  ;;  %v5299_v14 = vmul.f32 -1.442695, %v8361_v56 }
 0x2cc   :  { %v8367_v58 = vadd.f32 %v6076_v57, %v5280_v47  ;;  %v694_v59 = vpop.f32.mrb[21].mxu0  ;;  %7479 = vpow2.f32 %v5300_v13 }
 0x2cd   :  { %v8369_v60 = vadd.f32 %v5280_v47, %v694_v59  ;;  %7481 = vpow2.f32 %v5299_v14 }
 0x2ce   :  { %875 = vrot.lane.b32.xlu1 %v8367_v58, %s7927_s0  ;;  %v5302_v16 = vmul.f32 -1.442695, %v8367_v58 }
 0x2cf   :  { %873 = vrot.lane.b32.xlu0 %v8369_v60, %s7927_s0  ;;  %v6079_v61 = vpop.f32.mrb[22].mxu0  ;;  %v5301_v17 = vmul.f32 -1.442695, %v8369_v60 }
 0x2d0   :  { %v8375_v62 = vadd.f32 %v6079_v61, %v5280_v47  ;;  %v704_v63 = vpop.f32.mrb[23].mxu0  ;;  %7483 = vpow2.f32 %v5302_v16 }
 0x2d1   :  { %v8377_v32 = vadd.f32 %v5280_v47, %v704_v63  ;;  %7485 = vpow2.f32 %v5301_v17 }
 0x2d2   :  { %879 = vrot.lane.b32.xlu1 %v8375_v62, %s7927_s0  ;;  %v5304_v19 = vmul.f32 -1.442695, %v8375_v62  ;;  %v7476_v20 = vpop.eup %7475 }
 0x2d3   :  { %877 = vrot.lane.b32.xlu0 %v8377_v32, %s7927_s0  ;;  %v6082_v33 = vpop.f32.mrb[24].mxu0  ;;  %v5303_v21 = vmul.f32 -1.442695, %v8377_v32  ;;  %v7478_v22 = vpop.eup %7477  ;;  %v802_v23 = vadd.f32 1.0, %v7476_v20 }
 0x2d4   :  { %v8383_v34 = vadd.f32 %v6082_v33, %v5280_v47  ;;  %v714_v26 = vpop.f32.mrb[25].mxu0  ;;  %7487 = vpow2.f32 %v5304_v19  ;;  %v801_v46 = vadd.f32 1.0, %v7478_v22 }
 0x2d5   :  { %v8385_v36 = vadd.f32 %v5280_v47, %v714_v26  ;;  %7489 = vpow2.f32 %v5303_v21 }
 0x2d6   :  { %883 = vrot.lane.b32.xlu1 %v8383_v34, %s7927_s0  ;;  %v7480_v43 = vpop.eup %7479  ;;  %v5306_v44 = vmul.f32 -1.442695, %v8383_v34  ;;  %7491 = vrcp.f32 %v802_v23 }
 0x2d7   :  { %881 = vrot.lane.b32.xlu0 %v8385_v36, %s7927_s0  ;;  %v6085_v37 = vpop.f32.mrb[26].mxu0  ;;  %v5305_v45 = vmul.f32 -1.442695, %v8385_v36  ;;  %v804_v48 = vadd.f32 1.0, %v7480_v43 }
 0x2d8   :  { %v8391_v38 = vadd.f32 %v6085_v37, %v5280_v47  ;;  %v724_v39 = vpop.f32.mrb[27].mxu0  ;;  %7493 = vpow2.f32 %v5306_v44 }
 0x2d9   :  { %v8393_v40 = vadd.f32 %v5280_v47, %v724_v39  ;;  %7495 = vpow2.f32 %v5305_v45 }
 0x2da   :  { %887 = vrot.lane.b32.xlu1 %v8391_v38, %s7927_s0  ;;  %v5308_v52 = vmul.f32 -1.442695, %v8391_v38  ;;  %7497 = vrcp.f32 %v801_v46 }
 0x2db   :  { %885 = vrot.lane.b32.xlu0 %v8393_v40, %s7927_s0  ;;  %v6088_v0 = vpop.f32.mrb[28].mxu0  ;;  %v5307_v55 = vmul.f32 -1.442695, %v8393_v40  ;;  %7499 = vrcp.f32 %v804_v48 }
 0x2dc   :  { %v8399_v1 = vadd.f32 %v6088_v0, %v5280_v47  ;;  %v734_v3 = vpop.f32.mrb[29].mxu0  ;;  %7501 = vpow2.f32 %v5308_v52 }
 0x2dd   :  { %v8401_v4 = vadd.f32 %v5280_v47, %v734_v3  ;;  %7503 = vpow2.f32 %v5307_v55 }
 0x2de   :  { %891 = vrot.lane.b32.xlu1 %v8399_v1, %s7927_s0  ;;  %v5310_v33 = vmul.f32 -1.442695, %v8399_v1 }
 0x2df   :  { %889 = vrot.lane.b32.xlu0 %v8401_v4, %s7927_s0  ;;  %v6091_v5 = vpop.f32.mrb[30].mxu0  ;;  %v5309_v26 = vmul.f32 -1.442695, %v8401_v4 }
 0x2e0   :  { %v8407_v6 = vadd.f32 %v6091_v5, %v5280_v47  ;;  %v744_v7 = vpop.f32.mrb[31].mxu0 }
 0x2e1   :  { %v8409_v10 = vadd.f32 %v5280_v47, %v744_v7  ;;  %v7482_v47 = vpop.eup %7481 }
 0x2e2   :  { %895 = vrot.lane.b32.xlu1 %v8407_v6, %s7927_s0  ;;  %v7484_v50 = vpop.eup %7483  ;;  %v803_v57 = vadd.f32 1.0, %v7482_v47  ;;  %v5312_v3 = vmul.f32 -1.442695, %v8407_v6 }
 0x2e3   :  { %893 = vrot.lane.b32.xlu0 %v8409_v10, %s7927_s0  ;;  %v7486_v59 = vpop.eup %7485  ;;  %v806_v61 = vadd.f32 1.0, %v7484_v50  ;;  %v5311_v7 = vmul.f32 -1.442695, %v8409_v10 }
 0x2e4   :  { %v7488_v63 = vpop.eup %7487  ;;  %7505 = vrcp.f32 %v803_v57  ;;  %v805_v37 = vadd.f32 1.0, %v7486_v59 }
 0x2e5   :  { %v7490_v39 = vpop.eup %7489  ;;  %7507 = vrcp.f32 %v806_v61  ;;  %v808_v0 = vadd.f32 1.0, %v7488_v63 }
 0x2e6   :  { %7509 = vpow2.f32 %v5310_v33  ;;  %v8430_v5 = vpop.eup %7491  ;;  %v807_v12 = vadd.f32 1.0, %v7490_v39 }
 0x2e7   :  { %7511 = vpow2.f32 %v5309_v26  ;;  %v7494_v11 = vpop.eup %7493 }
 0x2e8   :  { %7513 = vrcp.f32 %v805_v37  ;;  %v7496_v13 = vpop.eup %7495  ;;  %v810_v21 = vadd.f32 1.0, %v7494_v11 }
 0x2e9   :  { %7515 = vrcp.f32 %v808_v0  ;;  %v8433_v16 = vpop.eup %7497  ;;  %v809_v43 = vadd.f32 1.0, %v7496_v13 }
 0x2ea   :  { %7517 = vpow2.f32 %v5312_v3  ;;  %v8436_v20 = vpop.eup %7499 }
 0x2eb   :  { %7519 = vpow2.f32 %v5311_v7  ;;  %v7502_v23 = vpop.eup %7501 }
 0x2ec   :  { %7521 = vrcp.f32 %v807_v12  ;;  %v7504_v44 = vpop.eup %7503  ;;  %v812_v52 = vadd.f32 1.0, %v7502_v23 }
 0x2ed   :  { %7523 = vrcp.f32 %v810_v21  ;;  %v811_v59 = vadd.f32 1.0, %v7504_v44 }
 0x2ee   :  { %v8441_v46 = vpop.eup %7505  ;;  %7525 = vrcp.f32 %v809_v43 }
 0x2ef   :  { %v8444_v50 = vpop.eup %7507  ;;  %7527 = vrcp.f32 %v812_v52 }
 0x2f0   :  { %v7510_v57 = vpop.eup %7509  ;;  %7529 = vrcp.f32 %v811_v59 }
 0x2f1   :  { %v7512_v61 = vpop.eup %7511  ;;  %v814_v0 = vadd.f32 1.0, %v7510_v57 }
 0x2f2   :  { %v8449_v33 = vpop.eup %7513  ;;  %v813_v11 = vadd.f32 1.0, %v7512_v61 }
 0x2f3   :  { %v8452_v39 = vpop.eup %7515  ;;  %7531 = vrcp.f32 %v814_v0 }
 0x2f4   :  { %v7518_v7 = vpop.eup %7517  ;;  %7533 = vrcp.f32 %v813_v11 }
 0x2f5   :  { %v7520_v12 = vpop.eup %7519  ;;  %v816_v21 = vadd.f32 1.0, %v7518_v7 }
 0x2f6   :  { %v815_v23 = vadd.f32 1.0, %v7520_v12 }
 0x2f7   :  { %7535 = vrcp.f32 %v816_v21 }
 0x2f8   :  { %7537 = vrcp.f32 %v815_v23 }
 0x338   :  { %v868_v14 = vpop.permute.xlu1 %867 }
 0x339   :  { %v914_v17 = vmul.f32 %v8430_v5, %v868_v14  ;;  %v866_v19 = vpop.permute.xlu0 %865  ;;  %v8457_v14 = vpop.eup %7521 }
 0x33a   :  { %v913_v22 = vmul.f32 %v8433_v16, %v866_v19  ;;  %v8462_v43 = vpop.eup %7523 }
 0x33b   :  { %947 = vrot.lane.b32.xlu1 %v914_v17, %s7928_s1 }
 0x33c   :  { %v872_v45 = vpop.permute.xlu1 %871  ;;  %945 = vrot.lane.b32.xlu0 %v913_v22, %s7928_s1 }
 0x33d   :  { %v916_v47 = vmul.f32 %v8436_v20, %v872_v45  ;;  %v870_v48 = vpop.permute.xlu0 %869  ;;  %v8465_v45 = vpop.eup %7525 }
 0x33e   :  { %v915_v55 = vmul.f32 %v8441_v46, %v870_v48 }
 0x33f   :  { %951 = vrot.lane.b32.xlu1 %v916_v47, %s7928_s1 }
 0x340   :  { %v876_v63 = vpop.permute.xlu1 %875  ;;  %949 = vrot.lane.b32.xlu0 %v915_v55, %s7928_s1  ;;  %v8470_v55 = vpop.eup %7527 }
 0x341   :  { %v918_v26 = vmul.f32 %v8444_v50, %v876_v63  ;;  %v874_v37 = vpop.permute.xlu0 %873  ;;  %v8473_v59 = vpop.eup %7529 }
 0x342   :  { %v917_v3 = vmul.f32 %v8449_v33, %v874_v37  ;;  %v8478_v37 = vpop.eup %7531 }
 0x343   :  { %955 = vrot.lane.b32.xlu1 %v918_v26, %s7928_s1 }
 0x344   :  { %v880_v13 = vpop.permute.xlu1 %879  ;;  %953 = vrot.lane.b32.xlu0 %v917_v3, %s7928_s1  ;;  %v8481_v3 = vpop.eup %7533 }
 0x345   :  { %v920_v17 = vmul.f32 %v8452_v39, %v880_v13  ;;  %v878_v19 = vpop.permute.xlu0 %877  ;;  %v8486_v13 = vpop.eup %7535 }
 0x346   :  { %v919_v22 = vmul.f32 %v8457_v14, %v878_v19  ;;  %v8489_v19 = vpop.eup %7537 }
 0x347   :  { %959 = vrot.lane.b32.xlu1 %v920_v17, %s7928_s1 }
 0x348   :  { %v884_v44 = vpop.permute.xlu1 %883  ;;  %957 = vrot.lane.b32.xlu0 %v919_v22, %s7928_s1 }
 0x349   :  { %v922_v47 = vmul.f32 %v8462_v43, %v884_v44  ;;  %v882_v48 = vpop.permute.xlu0 %881 }
 0x34a   :  { %v921_v52 = vmul.f32 %v8465_v45, %v882_v48 }
 0x34b   :  { %963 = vrot.lane.b32.xlu1 %v922_v47, %s7928_s1 }
 0x34c   :  { %v888_v57 = vpop.permute.xlu1 %887  ;;  %961 = vrot.lane.b32.xlu0 %v921_v52, %s7928_s1 }
 0x34d   :  { %v924_v61 = vmul.f32 %v8470_v55, %v888_v57  ;;  %v886_v63 = vpop.permute.xlu0 %885 }
 0x34e   :  { %v923_v26 = vmul.f32 %v8473_v59, %v886_v63 }
 0x34f   :  { %967 = vrot.lane.b32.xlu1 %v924_v61, %s7928_s1 }
 0x350   :  { %v892_v0 = vpop.permute.xlu1 %891  ;;  %965 = vrot.lane.b32.xlu0 %v923_v26, %s7928_s1 }
 0x351   :  { %v926_v7 = vmul.f32 %v8478_v37, %v892_v0  ;;  %v890_v11 = vpop.permute.xlu0 %889 }
 0x352   :  { %v925_v12 = vmul.f32 %v8481_v3, %v890_v11 }
 0x353   :  { %971 = vrot.lane.b32.xlu1 %v926_v7, %s7928_s1 }
 0x354   :  { %v896_v17 = vpop.permute.xlu1 %895  ;;  %969 = vrot.lane.b32.xlu0 %v925_v12, %s7928_s1 }
 0x355   :  { %v928_v21 = vmul.f32 %v8486_v13, %v896_v17  ;;  %v894_v22 = vpop.permute.xlu0 %893 }
 0x356   :  { %v927_v23 = vmul.f32 %v8489_v19, %v894_v22 }
 0x357   :  { %975 = vrot.lane.b32.xlu1 %v928_v21, %s7928_s1 }
 0x358   :  { %973 = vrot.lane.b32.xlu0 %v927_v23, %s7928_s1 }
 0x3ad   :  { %v948_v44 = vpop.permute.xlu1 %947 }
 0x3ae   :  { %v994_v47 = vadd.f32 %v948_v44, %v8351_v49  ;;  %v946_v48 = vpop.permute.xlu0 %945 }
 0x3af   :  { %v993_v52 = vadd.f32 %v946_v48, %v8353_v51 }
 0x3b0   :  { %7539 = vtanh.f32 %v994_v47 }
 0x3b1   :  { %7541 = vtanh.f32 %v993_v52  ;;  %v952_v57 = vpop.permute.xlu1 %951 }
 0x3b2   :  { %v996_v61 = vadd.f32 %v952_v57, %v8359_v54  ;;  %v950_v63 = vpop.permute.xlu0 %949 }
 0x3b3   :  { %v995_v26 = vadd.f32 %v950_v63, %v8361_v56 }
 0x3b4   :  { %7543 = vtanh.f32 %v996_v61 }
 0x3b5   :  { %7545 = vtanh.f32 %v995_v26  ;;  %v956_v0 = vpop.permute.xlu1 %955 }
 0x3b6   :  { %v998_v7 = vadd.f32 %v956_v0, %v8367_v58  ;;  %v954_v11 = vpop.permute.xlu0 %953 }
 0x3b7   :  { %v997_v12 = vadd.f32 %v954_v11, %v8369_v60 }
 0x3b8   :  { %7547 = vtanh.f32 %v998_v7 }
 0x3b9   :  { %7549 = vtanh.f32 %v997_v12  ;;  %v960_v49 = vpop.permute.xlu1 %959 }
 0x3ba   :  { %v7540_v51 = vpop.eup %7539  ;;  %v1000_v17 = vadd.f32 %v960_v49, %v8375_v62  ;;  %v958_v21 = vpop.permute.xlu0 %957 }
 0x3bb   :  { %v7542_v22 = vpop.eup %7541  ;;  %v999_v54 = vadd.f32 %v958_v21, %v8377_v32  ;;  %1059 = vrot.lane.b32.xlu1 %v7540_v51, %s7929_s11  ;;  %v1154_v21 = vld [vmem:[#allocation2 + $0x68] sm:$0xff] }
 0x3bc   :  { %7551 = vtanh.f32 %v1000_v17  ;;  %1057 = vrot.lane.b32.xlu0 %v7542_v22, %s7929_s11  ;;  %v1153_v17 = vld [vmem:[#allocation2 + $0x60] sm:$0xff]  ;;  %v1155_v22 = vld [vmem:[#allocation2 + $0x70] sm:$0xff] }
 0x3bd   :  { %7553 = vtanh.f32 %v999_v54  ;;  %v964_v56 = vpop.permute.xlu1 %963  ;;  %v1156_v54 = vld [vmem:[#allocation2 + $0x78] sm:$0xff] }
 0x3be   :  { %v7544_v58 = vpop.eup %7543  ;;  %v1002_v60 = vadd.f32 %v964_v56, %v8383_v34  ;;  %v962_v23 = vpop.permute.xlu0 %961  ;;  %v6768_v56 = vpack.c.bf16 %v1156_v54, %v1155_v22  ;;  %v1031_v22 = vsub.f32 1.0, %v8457_v14 }
 0x3bf   :  { %v7546_v44 = vpop.eup %7545  ;;  %v1001_v47 = vadd.f32 %v962_v23, %v8385_v36  ;;  %1063 = vrot.lane.b32.xlu1 %v7544_v58, %s7929_s11 }
 0x3c0   :  { %7555 = vtanh.f32 %v1002_v60  ;;  %1061 = vrot.lane.b32.xlu0 %v7546_v44, %s7929_s11  ;;  %v1026_v44 = vsub.f32 1.0, %v8430_v5 }
 0x3c1   :  { %7557 = vtanh.f32 %v1001_v47  ;;  %v968_v62 = vpop.permute.xlu1 %967 }
 0x3c2   :  { %v7548_v32 = vpop.eup %7547  ;;  %v1004_v48 = vadd.f32 %v968_v62, %v8391_v38  ;;  %v966_v52 = vpop.permute.xlu0 %965  ;;  %v1025_v62 = vsub.f32 1.0, %v8433_v16 }
 0x3c3   :  { %v7550_v57 = vpop.eup %7549  ;;  %v1003_v61 = vadd.f32 %v966_v52, %v8393_v40  ;;  %1067 = vrot.lane.b32.xlu1 %v7548_v32, %s7929_s11  ;;  %v1122_v32 = vmul.f32 %v8430_v5, %v8277_v29  ;;  %v1123_v5 = vmul.f32 %v8441_v46, %v8271_v25  ;;  %v1125_v25 = vmul.f32 %v8449_v33, %v8281_v31 }
 0x3c4   :  { %7559 = vtanh.f32 %v1004_v48  ;;  %1065 = vrot.lane.b32.xlu0 %v7550_v57, %s7929_s11  ;;  %v1121_v57 = vmul.f32 %v8433_v16, %v8273_v27  ;;  %v1030_v16 = vsub.f32 1.0, %v8444_v50  ;;  %v1127_v31 = vmul.f32 %v8457_v14, %v8290_v35 }
 0x3c5   :  { %7561 = vtanh.f32 %v1003_v61  ;;  %v972_v34 = vpop.permute.xlu1 %971  ;;  %v1129_v35 = vmul.f32 %v8465_v45, %v8303_v2  ;;  %v1131_v2 = vmul.f32 %v8473_v59, %v8316_v9  ;;  %v1133_v9 = vmul.f32 %v8481_v3, %v8329_v18 }
 0x3c6   :  { %v7552_v36 = vpop.eup %7551  ;;  %v1006_v63 = vadd.f32 %v972_v34, %v8399_v1  ;;  %v970_v26 = vpop.permute.xlu0 %969  ;;  %v1135_v18 = vmul.f32 %v8489_v19, %v8342_v42 }
 0x3c7   :  { %v7554_v0 = vpop.eup %7553  ;;  %v1005_v7 = vadd.f32 %v970_v26, %v8401_v4  ;;  %1071 = vrot.lane.b32.xlu1 %v7552_v36, %s7929_s11  ;;  %v1028_v36 = vsub.f32 1.0, %v8436_v20 }
 0x3c8   :  { %7563 = vtanh.f32 %v1006_v63  ;;  %1069 = vrot.lane.b32.xlu0 %v7554_v0, %s7929_s11  ;;  %v1027_v0 = vsub.f32 1.0, %v8441_v46 }
 0x3c9   :  { %7565 = vtanh.f32 %v1005_v7  ;;  %v976_v38 = vpop.permute.xlu1 %975  ;;  %v1124_v7 = vmul.f32 %v8436_v20, %v8275_v28  ;;  %v1126_v28 = vmul.f32 %v8444_v50, %v8279_v30  ;;  %v1128_v30 = vmul.f32 %v8452_v39, %v8285_v24 }
 0x3ca   :  { %v7556_v40 = vpop.eup %7555  ;;  %v1008_v11 = vadd.f32 %v976_v38, %v8407_v6  ;;  %v974_v12 = vpop.permute.xlu0 %973  ;;  %v6764_v6 = vpack.c.bf16 %v1154_v21, %v1153_v17  ;;  %v1130_v24 = vmul.f32 %v8462_v43, %v8299_v53  ;;  %v1132_v53 = vmul.f32 %v8470_v55, %v8313_v8 }
 0x3cb   :  { %v7558_v49 = vpop.eup %7557  ;;  %v1007_v51 = vadd.f32 %v974_v12, %v8409_v10  ;;  %1075 = vrot.lane.b32.xlu1 %v7556_v40, %s7929_s11  ;;  %v1134_v8 = vmul.f32 %v8478_v37, %v8325_v15  ;;  %v1136_v15 = vmul.f32 %v8486_v13, %v8339_v41 }
 0x3cc   :  { %7567 = vtanh.f32 %v1008_v11  ;;  %1073 = vrot.lane.b32.xlu0 %v7558_v49, %s7929_s11  ;;  %6765 = vmatprep.subr.bf16.mxu1 %v6764_v6  ;;  %v1029_v49 = vsub.f32 1.0, %v8449_v33 }
 0x3cd   :  { %7569 = vtanh.f32 %v1007_v51  ;;  %6767 = vmatpush3.bf16.msra.mxu1 %v6764_v6 }
 0x3ce   :  { %v7560_v1 = vpop.eup %7559  ;;  %6769 = vmatprep.subr.bf16.mxu1 %v6768_v56 }
 0x3cf   :  { %v7562_v4 = vpop.eup %7561  ;;  %1079 = vrot.lane.b32.xlu1 %v7560_v1, %s7929_s11 }
 0x3d0   :  { %1077 = vrot.lane.b32.xlu0 %v7562_v4, %s7929_s11  ;;  %v1032_v4 = vsub.f32 1.0, %v8452_v39 }
 0x3d1   :  { %6771 = vmatpush3.bf16.msra.mxu1 %v6768_v56  ;;  %v1034_v56 = vsub.f32 1.0, %v8462_v43 }
 0x3d2   :  { %v7564_v58 = vpop.eup %7563 }
 0x3d3   :  { %v7566_v10 = vpop.eup %7565  ;;  %1083 = vrot.lane.b32.xlu1 %v7564_v58, %s7929_s11 }
 0x3d4   :  { %1081 = vrot.lane.b32.xlu0 %v7566_v10, %s7929_s11 }
 0x3d6   :  { %v7568_v60 = vpop.eup %7567 }
 0x3d7   :  { %v7570_v23 = vpop.eup %7569  ;;  %1087 = vrot.lane.b32.xlu1 %v7568_v60, %s7929_s11  ;;  %v1033_v60 = vsub.f32 1.0, %v8465_v45 }
 0x3d8   :  { %1085 = vrot.lane.b32.xlu0 %v7570_v23, %s7929_s11 }
 0x42d   :  { %v1060_v47 = vpop.permute.xlu1 %1059 }
 0x42e   :  { %v1106_v48 = vmul.f32 %v1060_v47, %v1026_v44  ;;  %v1058_v52 = vpop.permute.xlu0 %1057  ;;  %v1036_v47 = vsub.f32 1.0, %v8470_v55 }
 0x42f   :  { %v1105_v61 = vmul.f32 %v1058_v52, %v1025_v62 }
 0x430   :  { %v1138_v34 = vadd.f32 %v1122_v32, %v1106_v48  ;;  %v1035_v48 = vsub.f32 1.0, %v8473_v59 }
 0x431   :  { %v1137_v63 = vadd.f32 %v1121_v57, %v1105_v61  ;;  %v1064_v26 = vpop.permute.xlu1 %1063  ;;  %v1038_v61 = vsub.f32 1.0, %v8478_v37 }
 0x432   :  { %v1108_v38 = vmul.f32 %v1064_v26, %v1028_v36  ;;  %1180 = vrot.lane.b32.xlu1 %v1138_v34, %s7929_s11  ;;  %v1062_v29 = vpop.permute.xlu0 %1061 }
 0x433   :  { %v1107_v40 = vmul.f32 %v1062_v29, %v1027_v0  ;;  %1178 = vrot.lane.b32.xlu0 %v1137_v63, %s7929_s11  ;;  %v1037_v63 = vsub.f32 1.0, %v8481_v3 }
 0x434   :  { %v1140_v27 = vadd.f32 %v1124_v7, %v1108_v38  ;;  %v1040_v7 = vsub.f32 1.0, %v8486_v13 }
 0x435   :  { %v1139_v11 = vadd.f32 %v1123_v5, %v1107_v40  ;;  %v1068_v12 = vpop.permute.xlu1 %1067  ;;  %v1039_v5 = vsub.f32 1.0, %v8489_v19 }
 0x436   :  { %v1110_v20 = vmul.f32 %v1068_v12, %v1030_v16  ;;  %1184 = vrot.lane.b32.xlu1 %v1140_v27, %s7929_s11  ;;  %v1066_v51 = vpop.permute.xlu0 %1065 }
 0x437   :  { %v1109_v46 = vmul.f32 %v1066_v51, %v1029_v49  ;;  %1182 = vrot.lane.b32.xlu0 %v1139_v11, %s7929_s11 }
 0x438   :  { %v1142_v1 = vadd.f32 %v1126_v28, %v1110_v20 }
 0x439   :  { %v1141_v17 = vadd.f32 %v1125_v25, %v1109_v46  ;;  %v1072_v21 = vpop.permute.xlu1 %1071 }
 0x43a   :  { %v1112_v50 = vmul.f32 %v1072_v21, %v1032_v4  ;;  %1188 = vrot.lane.b32.xlu1 %v1142_v1, %s7929_s11  ;;  %v1070_v6 = vpop.permute.xlu0 %1069 }
 0x43b   :  { %v1111_v33 = vmul.f32 %v1070_v6, %v1031_v22  ;;  %1186 = vrot.lane.b32.xlu0 %v1141_v17, %s7929_s11  ;;  %v5313_v22 = vld [vmem:[#allocation2 + $0x130] ss:$0 sm:$0xff] }
 0x43c   :  { %v1144_v54 = vadd.f32 %v1128_v30, %v1112_v50 }
 0x43d   :  { %v1143_v58 = vadd.f32 %v1127_v31, %v1111_v33  ;;  %v1076_v10 = vpop.permute.xlu1 %1075 }
 0x43e   :  { %v1114_v39 = vmul.f32 %v1076_v10, %v1034_v56  ;;  %1192 = vrot.lane.b32.xlu1 %v1144_v54, %s7929_s11  ;;  %v1074_v23 = vpop.permute.xlu0 %1073 }
 0x43f   :  { %v1113_v14 = vmul.f32 %v1074_v23, %v1033_v60  ;;  %1190 = vrot.lane.b32.xlu0 %v1143_v58, %s7929_s11 }
 0x440   :  { %v1146_v44 = vadd.f32 %v1130_v24, %v1114_v39 }
 0x441   :  { %v1145_v62 = vadd.f32 %v1129_v35, %v1113_v14  ;;  %v1080_v32 = vpop.permute.xlu1 %1079 }
 0x442   :  { %v1116_v43 = vmul.f32 %v1080_v32, %v1036_v47  ;;  %1196 = vrot.lane.b32.xlu1 %v1146_v44, %s7929_s11  ;;  %v1078_v52 = vpop.permute.xlu0 %1077 }
 0x443   :  { %v1115_v45 = vmul.f32 %v1078_v52, %v1035_v48  ;;  %1194 = vrot.lane.b32.xlu0 %v1145_v62, %s7929_s11 }
 0x444   :  { %v1148_v57 = vadd.f32 %v1132_v53, %v1116_v43 }
 0x445   :  { %v1147_v34 = vadd.f32 %v1131_v2, %v1115_v45  ;;  %v1084_v36 = vpop.permute.xlu1 %1083 }
 0x446   :  { %v1118_v55 = vmul.f32 %v1084_v36, %v1038_v61  ;;  %1200 = vrot.lane.b32.xlu1 %v1148_v57, %s7929_s11  ;;  %v1082_v26 = vpop.permute.xlu0 %1081 }
 0x447   :  { %v1117_v59 = vmul.f32 %v1082_v26, %v1037_v63  ;;  %1198 = vrot.lane.b32.xlu0 %v1147_v34, %s7929_s11 }
 0x448   :  { %v1150_v0 = vadd.f32 %v1134_v8, %v1118_v55 }
 0x449   :  { %v1149_v38 = vadd.f32 %v1133_v9, %v1117_v59  ;;  %v1088_v29 = vpop.permute.xlu1 %1087 }
 0x44a   :  { %v1120_v37 = vmul.f32 %v1088_v29, %v1040_v7  ;;  %1204 = vrot.lane.b32.xlu1 %v1150_v0, %s7929_s11  ;;  %v1086_v40 = vpop.permute.xlu0 %1085 }
 0x44b   :  { %v1119_v3 = vmul.f32 %v1086_v40, %v1039_v5  ;;  %1202 = vrot.lane.b32.xlu0 %v1149_v38, %s7929_s11 }
 0x44c   :  { %v1152_v27 = vadd.f32 %v1136_v15, %v1120_v37 }
 0x44d   :  { %v1151_v16 = vadd.f32 %v1135_v18, %v1119_v3 }
 0x44e   :  { %1208 = vrot.lane.b32.xlu1 %v1152_v27, %s7929_s11 }
 0x44f   :  { %1206 = vrot.lane.b32.xlu0 %v1151_v16, %s7929_s11 }
 0x4a4   :  { %v8591_v11 = vpop.permute.xlu1 %1180 }
 0x4a5   :  { %10564 = vst [vmem:[#allocation8_spill] sm:$0xff] %v8591_v11  ;;  %v8593_v12 = vpop.permute.xlu0 %1178 }
 0x4a6   :  { %10565 = vst [vmem:[#allocation9_spill] sm:$0xff] %v8593_v12  ;;  %6100 = vmatprep.mubr.msk.f32.mxu1 %vm57_vm0, %v8593_v12 }
 0x4a7   :  { %6101 = vmatmul.mubr.msk.f32.vlgmr.msra.gmra.mrb[16].mxu1 %vm57_vm0, %v8591_v11 }
 0x4a8   :  { %v8599_v41 = vpop.permute.xlu1 %1184 }
 0x4a9   :  { %10566 = vst [vmem:[#allocation10_spill] sm:$0xff] %v8599_v41  ;;  %v8601_v42 = vpop.permute.xlu0 %1182 }
 0x4aa   :  { %10567 = vst [vmem:[#allocation11_spill] sm:$0xff] %v8601_v42  ;;  %6103 = vmatprep.mubr.msk.f32.mxu1 %vm57_vm0, %v8601_v42 }
 0x4ab   :  { %6104 = vmatmul.mubr.msk.f32.gmra.mrb[18].mxu1 %vm57_vm0, %v8599_v41 }
 0x4ac   :  { %v8607_v13 = vpop.permute.xlu1 %1188 }
 0x4ad   :  { %10568 = vst [vmem:[#allocation12_spill] sm:$0xff] %v8607_v13  ;;  %v8609_v19 = vpop.permute.xlu0 %1186 }
 0x4ae   :  { %10569 = vst [vmem:[#allocation13_spill] sm:$0xff] %v8609_v19  ;;  %6106 = vmatprep.mubr.msk.f32.mxu1 %vm57_vm0, %v8609_v19  ;;  %v8961_v19 = vld [vmem:[%s10525_s2 + $0x78] sm:$0xff] }
 0x4af   :  { %6107 = vmatmul.mubr.msk.f32.gmra.mrb[20].mxu1 %vm57_vm0, %v8607_v13  ;;  %10593 = vst [vmem:[#allocation35_spill] sm:$0xff] %v8961_v19 }
 0x4b0   :  { %v8615_v49 = vpop.permute.xlu1 %1192 }
 0x4b1   :  { %10570 = vst [vmem:[#allocation14_spill] sm:$0xff] %v8615_v49  ;;  %v8617_v28 = vpop.permute.xlu0 %1190 }
 0x4b2   :  { %10571 = vst [vmem:[#allocation15_spill] sm:$0xff] %v8617_v28  ;;  %6109 = vmatprep.mubr.msk.f32.mxu1 %vm57_vm0, %v8617_v28  ;;  %v8943_v28 = vld [vmem:[%s10525_s2 + $0x68] sm:$0xff] }
 0x4b3   :  { %6110 = vmatmul.mubr.msk.f32.gmra.mrb[22].mxu1 %vm57_vm0, %v8615_v49  ;;  %10591 = vst [vmem:[#allocation33_spill] sm:$0xff] %v8943_v28  ;;  %v8956_v49 = vld [vmem:[%s10525_s2 + $0x70] sm:$0xff] }
 0x4b4   :  { %v8623_v20 = vpop.permute.xlu1 %1196  ;;  %10592 = vst [vmem:[#allocation34_spill] sm:$0xff] %v8956_v49 }
 0x4b5   :  { %10572 = vst [vmem:[#allocation16_spill] sm:$0xff] %v8623_v20  ;;  %v8625_v51 = vpop.permute.xlu0 %1194 }
 0x4b6   :  { %10573 = vst [vmem:[#allocation17_spill] sm:$0xff] %v8625_v51  ;;  %6112 = vmatprep.mubr.msk.f32.mxu1 %vm57_vm0, %v8625_v51  ;;  %v8925_v51 = vld [vmem:[%s10525_s2 + $0x58] sm:$0xff] }
 0x4b7   :  { %6113 = vmatmul.mubr.msk.f32.gmra.mrb[24].mxu1 %vm57_vm0, %v8623_v20  ;;  %10589 = vst [vmem:[#allocation31_spill] sm:$0xff] %v8925_v51  ;;  %v8938_v20 = vld [vmem:[%s10525_s2 + $0x60] sm:$0xff] }
 0x4b8   :  { %v8631_v25 = vpop.permute.xlu1 %1200  ;;  %10590 = vst [vmem:[#allocation32_spill] sm:$0xff] %v8938_v20 }
 0x4b9   :  { %10574 = vst [vmem:[#allocation18_spill] sm:$0xff] %v8631_v25  ;;  %v8633_v46 = vpop.permute.xlu0 %1198 }
 0x4ba   :  { %10575 = vst [vmem:[#allocation19_spill] sm:$0xff] %v8633_v46  ;;  %6115 = vmatprep.mubr.msk.f32.mxu1 %vm57_vm0, %v8633_v46  ;;  %v8907_v46 = vld [vmem:[%s10525_s2 + $0x48] sm:$0xff] }
 0x4bb   :  { %6116 = vmatmul.mubr.msk.f32.gmra.mrb[26].mxu1 %vm57_vm0, %v8631_v25  ;;  %10587 = vst [vmem:[#allocation29_spill] sm:$0xff] %v8907_v46  ;;  %v8920_v25 = vld [vmem:[%s10525_s2 + $0x50] sm:$0xff] }
 0x4bc   :  { %v8639_v1 = vpop.permute.xlu1 %1204  ;;  %10588 = vst [vmem:[#allocation30_spill] sm:$0xff] %v8920_v25 }
 0x4bd   :  { %10576 = vst [vmem:[#allocation20_spill] sm:$0xff] %v8639_v1  ;;  %v8641_v4 = vpop.permute.xlu0 %1202 }
 0x4be   :  { %10577 = vst [vmem:[#allocation21_spill] sm:$0xff] %v8641_v4  ;;  %6118 = vmatprep.mubr.msk.f32.mxu1 %vm57_vm0, %v8641_v4  ;;  %v8889_v4 = vld [vmem:[%s10525_s2 + $0x38] sm:$0xff] }
 0x4bf   :  { %6119 = vmatmul.mubr.msk.f32.gmra.mrb[28].mxu1 %vm57_vm0, %v8639_v1  ;;  %10585 = vst [vmem:[#allocation27_spill] sm:$0xff] %v8889_v4  ;;  %v8902_v1 = vld [vmem:[%s10525_s2 + $0x40] sm:$0xff] }
 0x4c0   :  { %v8649_v21 = vpop.permute.xlu1 %1208  ;;  %10586 = vst [vmem:[#allocation28_spill] sm:$0xff] %v8902_v1 }
 0x4c1   :  { %v8647_v17 = vpop.permute.xlu0 %1206  ;;  %10579 = vst [vmem:[#allocation23_spill] sm:$0xff] %v8649_v21 }
 0x4c2   :  { %10578 = vst [vmem:[#allocation22_spill] sm:$0xff] %v8647_v17  ;;  %6121 = vmatprep.mubr.msk.f32.mxu1 %vm57_vm0, %v8647_v17 }
 0x4c3   :  { %6122 = vmatmul.mubr.msk.f32.gmra.mrb[30].mxu1 %vm57_vm0, %v8649_v21 }
 0x57a   :  { %v6102_v30 = vpop.f32.mrb[16].mxu1 }
 0x57b   :  { %v8655_v50 = vadd.f32 %v6102_v30, %v5313_v22  ;;  %v1308_v6 = vpop.f32.mrb[17].mxu1 }
 0x57c   :  { %v8657_v31 = vadd.f32 %v5313_v22, %v1308_v6 }
 0x57e   :  { %v6105_v33 = vpop.f32.mrb[18].mxu1  ;;  %6156 = vmatprep.mubr.msk.f32.mxu0 %vm1451_vm3, %v8657_v31  ;;  %v8663_v54 = vpack.i.bf16 %v8655_v50, %v8657_v31 }
 0x57f   :  { %v8665_v56 = vadd.f32 %v6105_v33, %v5313_v22  ;;  %v1318_v58 = vpop.f32.mrb[19].mxu1 }
 0x580   :  { %v8667_v10 = vadd.f32 %v5313_v22, %v1318_v58  ;;  %7156 = vrot.lane.b32.xlu0 %v8663_v54, %s7929_s11 }
 0x582   :  { %v6108_v60 = vpop.f32.mrb[20].mxu1  ;;  %v8673_v24 = vpack.i.bf16 %v8665_v56, %v8667_v10 }
 0x583   :  { %v8675_v39 = vadd.f32 %v6108_v60, %v5313_v22  ;;  %v1328_v23 = vpop.f32.mrb[21].mxu1 }
 0x584   :  { %v8677_v35 = vadd.f32 %v5313_v22, %v1328_v23  ;;  %7161 = vrot.lane.b32.xlu1 %v8673_v24, %s7929_s11 }
 0x586   :  { %v6111_v14 = vpop.f32.mrb[22].mxu1  ;;  %v8683_v44 = vpack.i.bf16 %v8675_v39, %v8677_v35 }
 0x587   :  { %v8685_v47 = vadd.f32 %v6111_v14, %v5313_v22  ;;  %v1338_v62 = vpop.f32.mrb[23].mxu1 }
 0x588   :  { %v8687_v32 = vadd.f32 %v5313_v22, %v1338_v62  ;;  %7166 = vrot.lane.b32.xlu0 %v8683_v44, %s7929_s11 }
 0x58a   :  { %v6114_v48 = vpop.f32.mrb[24].mxu1  ;;  %v8693_v53 = vpack.i.bf16 %v8685_v47, %v8687_v32 }
 0x58b   :  { %v8695_v43 = vadd.f32 %v6114_v48, %v5313_v22  ;;  %v1348_v52 = vpop.f32.mrb[25].mxu1 }
 0x58c   :  { %v8697_v2 = vadd.f32 %v5313_v22, %v1348_v52  ;;  %7171 = vrot.lane.b32.xlu1 %v8693_v53, %s7929_s11 }
 0x58e   :  { %v6117_v45 = vpop.f32.mrb[26].mxu1  ;;  %v8703_v57 = vpack.i.bf16 %v8695_v43, %v8697_v2 }
 0x58f   :  { %v8705_v61 = vadd.f32 %v6117_v45, %v5313_v22  ;;  %v1358_v34 = vpop.f32.mrb[27].mxu1 }
 0x590   :  { %v8707_v36 = vadd.f32 %v5313_v22, %v1358_v34  ;;  %7176 = vrot.lane.b32.xlu0 %v8703_v57, %s7929_s11 }
 0x592   :  { %v6120_v63 = vpop.f32.mrb[28].mxu1  ;;  %v8713_v8 = vpack.i.bf16 %v8705_v61, %v8707_v36 }
 0x593   :  { %v8715_v55 = vadd.f32 %v6120_v63, %v5313_v22  ;;  %v1368_v26 = vpop.f32.mrb[29].mxu1 }
 0x594   :  { %10580 = vst [vmem:[#allocation24_spill] sm:$0xff] %v8713_v8  ;;  %v8717_v9 = vadd.f32 %v5313_v22, %v1368_v26  ;;  %7181 = vrot.lane.b32.xlu1 %v8713_v8, %s7929_s11 }
 0x596   :  { %v6123_v59 = vpop.f32.mrb[30].mxu1  ;;  %v8723_v0 = vpack.i.bf16 %v8715_v55, %v8717_v9 }
 0x597   :  { %v8725_v7 = vadd.f32 %v6123_v59, %v5313_v22  ;;  %v1378_v38 = vpop.f32.mrb[31].mxu1 }
 0x598   :  { %10581 = vst [vmem:[#allocation25_spill] sm:$0xff] %v8723_v0  ;;  %v8727_v29 = vadd.f32 %v5313_v22, %v1378_v38  ;;  %7186 = vrot.lane.b32.xlu0 %v8723_v0, %s7929_s11 }
 0x59a   :  { %v8733_v5 = vpack.i.bf16 %v8725_v7, %v8727_v29 }
 0x59c   :  { %7201 = vrot.lane.b32.xlu0 %v8673_v24, %s7928_s1  ;;  %7191 = vrot.lane.b32.xlu1 %v8733_v5, %s7929_s11 }
 0x5a0   :  { %7211 = vrot.lane.b32.xlu0 %v8693_v53, %s7928_s1  ;;  %7196 = vrot.lane.b32.xlu1 %v8663_v54, %s7928_s1 }
 0x5a4   :  { %7221 = vrot.lane.b32.xlu0 %v8713_v8, %s7928_s1  ;;  %7206 = vrot.lane.b32.xlu1 %v8683_v44, %s7928_s1 }
 0x5a8   :  { %7216 = vrot.lane.b32.xlu1 %v8703_v57, %s7928_s1 }
 0x5ac   :  { %7226 = vrot.lane.b32.xlu1 %v8723_v0, %s7928_s1 }
 0x5b0   :  { %7231 = vrot.lane.b32.xlu1 %v8733_v5, %s7928_s1 }
 0x5f2   :  { %v7157_v15 = vpop.permute.xlu0 %7156 }
 0x5f3   :  { %v7159_v37 = vunpack.i.h.bf16 %v7157_v15  ;;  %v7158_v40 = vunpack.i.l.bf16 %v7157_v15 }
 0x5f5   :  { %v6772_v3 = vpack.c.bf16 %v7159_v37, %v7158_v40 }
 0x5f6   :  { %v7162_v27 = vpop.permute.xlu1 %7161 }
 0x5f7   :  { %v7164_v16 = vunpack.i.h.bf16 %v7162_v27  ;;  %v7163_v22 = vunpack.i.l.bf16 %v7162_v27  ;;  %6774 = vmatprep.subr.msk.bf16.mxu0 %vm8755_vm4, %v6772_v3 }
 0x5f8   :  { %6777 = vmatpush3.bf16.xpose.msk.msra.mxu0 %vm8755_vm4, %v6772_v3 }
 0x5f9   :  { %v6778_v30 = vpack.c.bf16 %v7164_v16, %v7163_v22 }
 0x5fa   :  { %v7167_v6 = vpop.permute.xlu0 %7166 }
 0x5fb   :  { %v7169_v33 = vunpack.i.h.bf16 %v7167_v6  ;;  %v7168_v58 = vunpack.i.l.bf16 %v7167_v6  ;;  %6780 = vmatprep.subr.msk.bf16.mxu0 %vm8755_vm4, %v6778_v30 }
 0x5fd   :  { %v6784_v60 = vpack.c.bf16 %v7169_v33, %v7168_v58 }
 0x5fe   :  { %v7172_v23 = vpop.permute.xlu1 %7171 }
 0x5ff   :  { %v7174_v14 = vunpack.i.h.bf16 %v7172_v23  ;;  %v7173_v62 = vunpack.i.l.bf16 %v7172_v23 }
 0x600   :  { %6783 = vmatpush3.bf16.xpose.msk.msra.mxu0 %vm8755_vm4, %v6778_v30 }
 0x601   :  { %6786 = vmatprep.subr.msk.bf16.mxu0 %vm8755_vm4, %v6784_v60  ;;  %v6790_v52 = vpack.c.bf16 %v7174_v14, %v7173_v62 }
 0x602   :  { %v7177_v48 = vpop.permute.xlu0 %7176 }
 0x603   :  { %v7179_v63 = vunpack.i.h.bf16 %v7177_v48  ;;  %v7178_v26 = vunpack.i.l.bf16 %v7177_v48 }
 0x605   :  { %v6796_v38 = vpack.c.bf16 %v7179_v63, %v7178_v26 }
 0x606   :  { %v7182_v45 = vpop.permute.xlu1 %7181 }
 0x607   :  { %v7184_v37 = vunpack.i.h.bf16 %v7182_v45  ;;  %v7183_v40 = vunpack.i.l.bf16 %v7182_v45 }
 0x608   :  { %6789 = vmatpush3.bf16.xpose.msk.msra.mxu0 %vm8755_vm4, %v6784_v60 }
 0x609   :  { %6792 = vmatprep.subr.msk.bf16.mxu0 %vm8755_vm4, %v6790_v52  ;;  %v6802_v58 = vpack.c.bf16 %v7184_v37, %v7183_v40 }
 0x60a   :  { %v7187_v34 = vpop.permute.xlu0 %7186 }
 0x60b   :  { %v7189_v48 = vunpack.i.h.bf16 %v7187_v34 }
 0x60e   :  { %v7192_v59 = vpop.permute.xlu1 %7191  ;;  %v7202_v15 = vpop.permute.xlu0 %7201 }
 0x60f   :  { %v7204_v27 = vunpack.i.h.bf16 %v7202_v15  ;;  %v7203_v16 = vunpack.i.l.bf16 %v7202_v15 }
 0x610   :  { %6795 = vmatpush3.bf16.xpose.msk.msra.mxu0 %vm8755_vm4, %v6790_v52  ;;  %v7188_v52 = vunpack.i.l.bf16 %v7187_v34  ;;  %v7194_v34 = vunpack.i.h.bf16 %v7192_v59 }
 0x611   :  { %6798 = vmatprep.subr.msk.bf16.mxu0 %vm8755_vm4, %v6796_v38  ;;  %v6824_v14 = vpack.c.bf16 %v7204_v27, %v7203_v16 }
 0x612   :  { %v7197_v3 = vpop.permute.xlu1 %7196  ;;  %v7212_v62 = vpop.permute.xlu0 %7211  ;;  %v6808_v37 = vpack.c.bf16 %v7189_v48, %v7188_v52 }
 0x613   :  { %v7199_v22 = vunpack.i.h.bf16 %v7197_v3  ;;  %v7198_v30 = vunpack.i.l.bf16 %v7197_v3  ;;  %v7214_v45 = vunpack.i.h.bf16 %v7212_v62  ;;  %v7213_v63 = vunpack.i.l.bf16 %v7212_v62 }
 0x615   :  { %v6820_v6 = vpack.c.bf16 %v7199_v22, %v7198_v30  ;;  %v6832_v27 = vpack.c.bf16 %v7214_v45, %v7213_v63  ;;  %v7193_v22 = vunpack.i.l.bf16 %v7192_v59  ;;  %v8824_v63 = vld [vmem:[%s10525_s2 + $0x8] sm:$0xff] }
 0x616   :  { %v7207_v33 = vpop.permute.xlu1 %7206  ;;  %v7222_v16 = vpop.permute.xlu0 %7221 }
 0x617   :  { %v7209_v60 = vunpack.i.h.bf16 %v7207_v33  ;;  %v7208_v23 = vunpack.i.l.bf16 %v7207_v33  ;;  %6821 = vmatprep.subr.bf16.mxu1 %v6820_v6  ;;  %v7224_v30 = vunpack.i.h.bf16 %v7222_v16 }
 0x618   :  { %6801 = vmatpush3.bf16.xpose.msk.msra.mxu0 %vm8755_vm4, %v6796_v38  ;;  %6823 = vmatpush3.bf16.msra.mxu1 %v6820_v6  ;;  %v7223_v6 = vunpack.i.l.bf16 %v7222_v16 }
 0x619   :  { %6804 = vmatprep.subr.msk.bf16.mxu0 %vm8755_vm4, %v6802_v58  ;;  %6825 = vmatprep.subr.bf16.mxu1 %v6824_v14  ;;  %v6828_v26 = vpack.c.bf16 %v7209_v60, %v7208_v23  ;;  %v6814_v60 = vpack.c.bf16 %v7194_v34, %v7193_v22 }
 0x61a   :  { %v7217_v15 = vpop.permute.xlu1 %7216  ;;  %v6840_v62 = vpack.c.bf16 %v7224_v30, %v7223_v6 }
 0x61b   :  { %v7219_v40 = vunpack.i.h.bf16 %v7217_v15  ;;  %v7218_v3 = vunpack.i.l.bf16 %v7217_v15 }
 0x61c   :  { %6827 = vmatpush3.bf16.msra.mxu1 %v6824_v14 }
 0x61d   :  { %6829 = vmatprep.subr.bf16.mxu1 %v6828_v26  ;;  %v6836_v33 = vpack.c.bf16 %v7219_v40, %v7218_v3 }
 0x61e   :  { %v7227_v38 = vpop.permute.xlu1 %7226 }
 0x61f   :  { %v7229_v23 = vunpack.i.h.bf16 %v7227_v38  ;;  %v7228_v14 = vunpack.i.l.bf16 %v7227_v38 }
 0x620   :  { %6807 = vmatpush3.bf16.xpose.msk.msra.mxu0 %vm8755_vm4, %v6802_v58  ;;  %6831 = vmatpush3.bf16.msra.mxu1 %v6828_v26  ;;  %v8829_v26 = vld [vmem:[%s10525_s2] sm:$0xff] }
 0x621   :  { %6810 = vmatprep.subr.msk.bf16.mxu0 %vm8755_vm4, %v6808_v37  ;;  %6833 = vmatprep.subr.bf16.mxu1 %v6832_v27  ;;  %v6844_v52 = vpack.c.bf16 %v7229_v23, %v7228_v14 }
 0x622   :  { %v7232_v48 = vpop.permute.xlu1 %7231 }
 0x623   :  { %v7234_v58 = vunpack.i.h.bf16 %v7232_v48  ;;  %v7233_v59 = vunpack.i.l.bf16 %v7232_v48 }
 0x624   :  { %6835 = vmatpush3.bf16.msra.mxu1 %v6832_v27 }
 0x625   :  { %6837 = vmatprep.subr.bf16.mxu1 %v6836_v33  ;;  %v6848_v45 = vpack.c.bf16 %v7234_v58, %v7233_v59  ;;  %v8850_v59 = vld [vmem:[%s10525_s2 + $0x18] sm:$0xff] }
 0x628   :  { %6813 = vmatpush3.bf16.xpose.msk.msra.mxu0 %vm8755_vm4, %v6808_v37  ;;  %6839 = vmatpush3.bf16.msra.mxu1 %v6836_v33 }
 0x629   :  { %6816 = vmatprep.subr.msk.bf16.mxu0 %vm8755_vm4, %v6814_v60  ;;  %6841 = vmatprep.subr.bf16.mxu1 %v6840_v62 }
 0x62c   :  { %6843 = vmatpush3.bf16.msra.mxu1 %v6840_v62 }
 0x62d   :  { %6845 = vmatprep.subr.bf16.mxu1 %v6844_v52 }
 0x630   :  { %6819 = vmatpush3.bf16.xpose.msk.msra.mxu0 %vm8755_vm4, %v6814_v60  ;;  %6847 = vmatpush3.bf16.msra.mxu1 %v6844_v52 }
 0x631   :  { %6849 = vmatprep.subr.bf16.mxu1 %v6848_v45 }
 0x634   :  { %6851 = vmatpush3.bf16.msra.mxu1 %v6848_v45  ;;  %v8858_v45 = vld [vmem:[%s10525_s2 + $0x10] sm:$0xff] }
 0x637   :  { %6157 = vmatmul.mubr.msk.f32.vlgmr.msra.gmra.mrb[32].mxu0 %vm1451_vm3, %v8655_v50 }
 0x638   :  { %6159 = vmatprep.mubr.msk.f32.mxu0 %vm1451_vm3, %v8667_v10 }
 0x63b   :  { %6160 = vmatmul.mubr.msk.f32.gmra.mrb[34].mxu0 %vm1451_vm3, %v8665_v56 }
 0x63c   :  { %6162 = vmatprep.mubr.msk.f32.mxu0 %vm1451_vm3, %v8677_v35 }
 0x63f   :  { %6163 = vmatmul.mubr.msk.f32.gmra.mrb[36].mxu0 %vm1451_vm3, %v8675_v39 }
 0x640   :  { %6165 = vmatprep.mubr.msk.f32.mxu0 %vm1451_vm3, %v8687_v32 }
 0x643   :  { %6166 = vmatmul.mubr.msk.f32.gmra.mrb[38].mxu0 %vm1451_vm3, %v8685_v47 }
 0x644   :  { %6168 = vmatprep.mubr.msk.f32.mxu0 %vm1451_vm3, %v8697_v2 }
 0x647   :  { %6169 = vmatmul.mubr.msk.f32.gmra.mrb[40].mxu0 %vm1451_vm3, %v8695_v43 }
 0x648   :  { %6171 = vmatprep.mubr.msk.f32.mxu0 %vm1451_vm3, %v8707_v36 }
 0x64b   :  { %6172 = vmatmul.mubr.msk.f32.gmra.mrb[42].mxu0 %vm1451_vm3, %v8705_v61 }
 0x64c   :  { %6174 = vmatprep.mubr.msk.f32.mxu0 %vm1451_vm3, %v8717_v9 }
 0x64f   :  { %6175 = vmatmul.mubr.msk.f32.gmra.mrb[44].mxu0 %vm1451_vm3, %v8715_v55 }
 0x650   :  { %6177 = vmatprep.mubr.msk.f32.mxu0 %vm1451_vm3, %v8727_v29 }
 0x653   :  { %6178 = vmatmul.mubr.msk.f32.gmra.mrb[46].mxu0 %vm1451_vm3, %v8725_v7 }
 0x70a   :  { %v6158_v15 = vpop.f32.mrb[32].mxu0 }
 0x70b   :  { %v8832_v37 = vadd.f32 %v6158_v15, %v8824_v63  ;;  %v1582_v40 = vpop.f32.mrb[33].mxu0 }
 0x70c   :  { %v8835_v3 = vadd.f32 %v1582_v40, %v8829_v26  ;;  %v8867_v40 = vld [vmem:[%s10525_s2 + $0x20] sm:$0xff] }
 0x70d   :  { %1663 = vmax.xlane.f32.xlu1 %v8832_v37 }
 0x70e   :  { %v6161_v27 = vpop.f32.mrb[34].mxu0  ;;  %1661 = vmax.xlane.f32.xlu0 %v8835_v3 }
 0x70f   :  { %v1592_v16 = vpop.f32.mrb[35].mxu0  ;;  %v8853_v52 = vadd.f32 %v6161_v27, %v8850_v59  ;;  %v8872_v27 = vld [vmem:[%s10525_s2 + $0x28] sm:$0xff] }
 0x710   :  { %v8862_v15 = vadd.f32 %v1592_v16, %v8858_v45  ;;  %v8884_v16 = vld [vmem:[%s10525_s2 + $0x30] sm:$0xff] }
 0x711   :  { %10584 = vst [vmem:[#allocation26_spill] sm:$0xff] %v8884_v16 }
 0x712   :  { %v6164_v34 = vpop.f32.mrb[36].mxu0 }
 0x713   :  { %v1602_v38 = vpop.f32.mrb[37].mxu0  ;;  %v8879_v21 = vadd.f32 %v6164_v34, %v8872_v27 }
 0x714   :  { %v8876_v17 = vadd.f32 %v1602_v38, %v8867_v40 }
 0x716   :  { %v6167_v22 = vpop.f32.mrb[38].mxu0 }
 0x717   :  { %v1612_v30 = vpop.f32.mrb[39].mxu0  ;;  %v8897_v34 = vadd.f32 %v6167_v22, %v8889_v4 }
 0x718   :  { %v8894_v38 = vadd.f32 %v1612_v30, %v8884_v16 }
 0x71a   :  { %v6170_v6 = vpop.f32.mrb[40].mxu0 }
 0x71b   :  { %v1622_v33 = vpop.f32.mrb[41].mxu0  ;;  %v8915_v22 = vadd.f32 %v6170_v6, %v8907_v46 }
 0x71c   :  { %v8912_v30 = vadd.f32 %v1622_v33, %v8902_v1 }
 0x71e   :  { %7241 = vrot.lane.b32.xlu1 %v8673_v24, %s7930_s16  ;;  %v6173_v60 = vpop.f32.mrb[42].mxu0 }
 0x71f   :  { %v1632_v23 = vpop.f32.mrb[43].mxu0  ;;  %v8933_v6 = vadd.f32 %v6173_v60, %v8925_v51 }
 0x720   :  { %v8930_v33 = vadd.f32 %v1632_v23, %v8920_v25 }
 0x722   :  { %7246 = vrot.lane.b32.xlu1 %v8683_v44, %s7930_s16  ;;  %v6176_v14 = vpop.f32.mrb[44].mxu0 }
 0x723   :  { %v1642_v62 = vpop.f32.mrb[45].mxu0  ;;  %v8951_v60 = vadd.f32 %v6176_v14, %v8943_v28 }
 0x724   :  { %7236 = vrot.lane.b32.xlu0 %v8663_v54, %s7930_s16  ;;  %v8948_v23 = vadd.f32 %v1642_v62, %v8938_v20 }
 0x726   :  { %7251 = vrot.lane.b32.xlu1 %v8693_v53, %s7930_s16  ;;  %v6179_v48 = vpop.f32.mrb[46].mxu0 }
 0x727   :  { %v1652_v58 = vpop.f32.mrb[47].mxu0  ;;  %v8969_v14 = vadd.f32 %v6179_v48, %v8961_v19 }
 0x728   :  { %v8966_v62 = vadd.f32 %v1652_v58, %v8956_v49 }
 0x743   :  { %1667 = vmax.xlane.f32.xlu0 %v8853_v52 }
 0x747   :  { %1665 = vmax.xlane.f32.xlu0 %v8862_v15 }
 0x74a   :  { %1669 = vmax.xlane.f32.xlu1 %v8876_v17 }
 0x74b   :  { %1671 = vmax.xlane.f32.xlu0 %v8879_v21 }
 0x74e   :  { %1673 = vmax.xlane.f32.xlu1 %v8894_v38 }
 0x74f   :  { %1675 = vmax.xlane.f32.xlu0 %v8897_v34 }
 0x752   :  { %1677 = vmax.xlane.f32.xlu1 %v8912_v30 }
 0x753   :  { %1679 = vmax.xlane.f32.xlu0 %v8915_v22 }
 0x756   :  { %1681 = vmax.xlane.f32.xlu1 %v8930_v33 }
 0x757   :  { %1683 = vmax.xlane.f32.xlu0 %v8933_v6 }
 0x75a   :  { %1685 = vmax.xlane.f32.xlu1 %v8948_v23 }
 0x75b   :  { %1687 = vmax.xlane.f32.xlu0 %v8951_v60 }
 0x75e   :  { %1689 = vmax.xlane.f32.xlu1 %v8966_v62 }
 0x75f   :  { %1691 = vmax.xlane.f32.xlu0 %v8969_v14 }
 0x76f   :  { %7261 = vrot.lane.b32.xlu1 %v8713_v8, %s7930_s16 }
 0x773   :  { %7266 = vrot.lane.b32.xlu1 %v8723_v0, %s7930_s16 }
 0x79a   :  { %v1664_v13 = vpop.xlane.xlu1 %1663 }
 0x79b   :  { %v1694_v42 = vsub.f32 %v8832_v37, %v1664_v13  ;;  %v1662_v41 = vpop.xlane.xlu0 %1661 }
 0x79c   :  { %v1693_v58 = vsub.f32 %v8835_v3, %v1662_v41 }
 0x79d   :  { %v1711_v12 = vmul.f32 1.442695, %v1694_v42 }
 0x79e   :  { %v1709_v11 = vmul.f32 1.442695, %v1693_v58 }
 0x79f   :  { %7571 = vpow2.f32 %v1711_v12  ;;  %v7237_v48 = vpop.permute.xlu0 %7236 }
 0x7a0   :  { %7573 = vpow2.f32 %v1709_v11  ;;  %v7239_v19 = vunpack.i.h.bf16 %v7237_v48  ;;  %v7238_v49 = vunpack.i.l.bf16 %v7237_v48  ;;  %v8992_v11 = vpop.permute.xlu1 %7241 }
 0x7a2   :  { %v8979_v28 = vpack.c.bf16 %v7239_v19, %v7238_v49 }
 0x7a4   :  { %6854 = vmatprep.subr.msk.bf16.mxu1 %vm8755_vm4, %v8979_v28  ;;  %v8994_v12 = vpop.permute.xlu1 %7246 }
 0x7a8   :  { %v8997_v13 = vpop.permute.xlu1 %7251 }
 0x7a9   :  { %v8984_v20 = vpop.eup %7571 }
 0x7aa   :  { %v8986_v51 = vpop.eup %7573  ;;  %1743 = vadd.xlane.f32.xlu0 %v8984_v20 }
 0x7ab   :  { %1741 = vadd.xlane.f32.xlu1 %v8986_v51 }
 0x7c0   :  { %7256 = vrot.lane.b32.xlu0 %v8703_v57, %s7930_s16 }
 0x7d0   :  { %v1668_v41 = vpop.xlane.xlu0 %1667 }
 0x7d1   :  { %v1696_v42 = vsub.f32 %v8853_v52, %v1668_v41 }
 0x7d3   :  { %v1715_v19 = vmul.f32 1.442695, %v1696_v42 }
 0x7d4   :  { %v1666_v49 = vpop.xlane.xlu0 %1665 }
 0x7d5   :  { %7575 = vpow2.f32 %v1715_v19  ;;  %v1695_v37 = vsub.f32 %v8862_v15, %v1666_v49 }
 0x7d7   :  { %v1713_v3 = vmul.f32 1.442695, %v1695_v37  ;;  %v1670_v58 = vpop.xlane.xlu1 %1669 }
 0x7d8   :  { %v1672_v48 = vpop.xlane.xlu0 %1671  ;;  %v1697_v25 = vsub.f32 %v8876_v17, %v1670_v58 }
 0x7d9   :  { %7577 = vpow2.f32 %v1713_v3  ;;  %v1698_v46 = vsub.f32 %v8879_v21, %v1672_v48 }
 0x7da   :  { %v1717_v16 = vmul.f32 1.442695, %v1697_v25 }
 0x7db   :  { %v1719_v1 = vmul.f32 1.442695, %v1698_v46  ;;  %v1674_v41 = vpop.xlane.xlu1 %1673 }
 0x7dc   :  { %v1676_v4 = vpop.xlane.xlu0 %1675  ;;  %v1699_v15 = vsub.f32 %v8894_v38, %v1674_v41 }
 0x7dd   :  { %7579 = vpow2.f32 %v1719_v1  ;;  %v1700_v52 = vsub.f32 %v8897_v34, %v1676_v4 }
 0x7de   :  { %7581 = vpow2.f32 %v1717_v16  ;;  %v1721_v46 = vmul.f32 1.442695, %v1699_v15 }
 0x7df   :  { %v9003_v42 = vpop.eup %7575  ;;  %v1723_v19 = vmul.f32 1.442695, %v1700_v52  ;;  %v1678_v17 = vpop.xlane.xlu1 %1677 }
 0x7e0   :  { %1747 = vadd.xlane.f32.xlu1 %v9003_v42  ;;  %v1680_v49 = vpop.xlane.xlu0 %1679  ;;  %v1701_v21 = vsub.f32 %v8912_v30, %v1678_v17 }
 0x7e1   :  { %7583 = vpow2.f32 %v1723_v19  ;;  %v1702_v25 = vsub.f32 %v8915_v22, %v1680_v49 }
 0x7e2   :  { %7585 = vpow2.f32 %v1721_v46  ;;  %v1725_v3 = vmul.f32 1.442695, %v1701_v21 }
 0x7e3   :  { %v9007_v37 = vpop.eup %7577  ;;  %v1727_v16 = vmul.f32 1.442695, %v1702_v25  ;;  %v1682_v38 = vpop.xlane.xlu1 %1681 }
 0x7e4   :  { %1745 = vadd.xlane.f32.xlu0 %v9007_v37  ;;  %v1684_v4 = vpop.xlane.xlu0 %1683  ;;  %v1703_v58 = vsub.f32 %v8930_v33, %v1682_v38 }
 0x7e5   :  { %7587 = vpow2.f32 %v1727_v16 }
 0x7e6   :  { %7589 = vpow2.f32 %v1725_v3  ;;  %v1729_v41 = vmul.f32 1.442695, %v1703_v58 }
 0x7e7   :  { %v9011_v1 = vpop.eup %7579  ;;  %v1686_v52 = vpop.xlane.xlu1 %1685 }
 0x7e8   :  { %1751 = vadd.xlane.f32.xlu0 %v9011_v1  ;;  %v9015_v34 = vpop.eup %7581  ;;  %v1688_v48 = vpop.xlane.xlu0 %1687  ;;  %7591 = vpow2.f32 %v1729_v41  ;;  %v1705_v33 = vsub.f32 %v8948_v23, %v1686_v52  ;;  %v1704_v23 = vsub.f32 %v8933_v6, %v1684_v4 }
 0x7e9   :  { %v1706_v30 = vsub.f32 %v8951_v60, %v1688_v48 }
 0x7ea   :  { %v1733_v46 = vmul.f32 1.442695, %v1705_v33  ;;  %v1731_v58 = vmul.f32 1.442695, %v1704_v23 }
 0x7eb   :  { %v9019_v22 = vpop.eup %7583  ;;  %v1735_v19 = vmul.f32 1.442695, %v1706_v30  ;;  %v1690_v49 = vpop.xlane.xlu1 %1689 }
 0x7ec   :  { %1749 = vadd.xlane.f32.xlu0 %v9015_v34  ;;  %v9025_v15 = vpop.eup %7585  ;;  %v1707_v60 = vsub.f32 %v8966_v62, %v1690_v49  ;;  %v1692_v3 = vpop.xlane.xlu0 %1691 }
 0x7ed   :  { %7593 = vpow2.f32 %v1735_v19  ;;  %v1708_v62 = vsub.f32 %v8969_v14, %v1692_v3 }
 0x7ee   :  { %7595 = vpow2.f32 %v1733_v46  ;;  %v1737_v21 = vmul.f32 1.442695, %v1707_v60  ;;  %v7244_v60 = vunpack.i.h.bf16 %v8992_v11 }
 0x7ef   :  { %v9029_v17 = vpop.eup %7587  ;;  %v1739_v52 = vmul.f32 1.442695, %v1708_v62  ;;  %v7262_v14 = vpop.permute.xlu1 %7261  ;;  %v7253_v62 = vunpack.i.l.bf16 %v8997_v13 }
 0x7f0   :  { %1755 = vadd.xlane.f32.xlu0 %v9019_v22  ;;  %v9033_v25 = vpop.eup %7589  ;;  %7597 = vpow2.f32 %v1737_v21  ;;  %v7243_v21 = vunpack.i.l.bf16 %v8992_v11 }
 0x7f1   :  { %7271 = vrot.lane.b32.xlu1 %v8733_v5, %s7930_s16  ;;  %7599 = vpow2.f32 %v1731_v58  ;;  %s7931_s16 = smov 120  }
 0x7f2   :  { %v9036_v16 = vpop.eup %7591  ;;  %7601 = vpow2.f32 %v1739_v52  ;;  %v6858_v58 = vpack.c.bf16 %v7244_v60, %v7243_v21 }
 0x7f3   :  { %v7267_v30 = vpop.permute.xlu1 %7266 }
 0x7f4   :  { %1753 = vadd.xlane.f32.xlu0 %v9025_v15  ;;  %v7269_v21 = vunpack.i.h.bf16 %v7267_v30 }
 0x7f7   :  { %v9040_v38 = vpop.eup %7593 }
 0x7f8   :  { %1759 = vadd.xlane.f32.xlu0 %v9029_v17  ;;  %v9044_v48 = vpop.eup %7595 }
 0x7fa   :  { %v9047_v41 = vpop.eup %7597 }
 0x7fb   :  { %v9050_v6 = vpop.eup %7599 }
 0x7fc   :  { %1757 = vadd.xlane.f32.xlu0 %v9033_v25  ;;  %v9053_v4 = vpop.eup %7601 }
 0x800   :  { %1761 = vadd.xlane.f32.xlu0 %v9036_v16 }
 0x804   :  { %1767 = vadd.xlane.f32.xlu0 %v9040_v38 }
 0x808   :  { %1765 = vadd.xlane.f32.xlu0 %v9044_v48 }
 0x80c   :  { %1769 = vadd.xlane.f32.xlu0 %v9047_v41 }
 0x815   :  { %1763 = vadd.xlane.f32.xlu1 %v9050_v6 }
 0x819   :  { %1771 = vadd.xlane.f32.xlu1 %v9053_v4 }
 0x822   :  { %1998 = vrot.lane.b32.xlu0 %v8657_v31, %s7931_s16 }
 0x826   :  { %2010 = vrot.lane.b32.xlu0 %v8687_v32, %s7931_s16 }
 0x82a   :  { %2014 = vrot.lane.b32.xlu0 %v8697_v2, %s7931_s16  ;;  %2000 = vrot.lane.b32.xlu1 %v8655_v50, %s7931_s16 }
 0x82e   :  { %2018 = vrot.lane.b32.xlu0 %v8707_v36, %s7931_s16  ;;  %2002 = vrot.lane.b32.xlu1 %v8667_v10, %s7931_s16 }
 0x832   :  { %2022 = vrot.lane.b32.xlu0 %v8717_v9, %s7931_s16  ;;  %2004 = vrot.lane.b32.xlu1 %v8665_v56, %s7931_s16 }
 0x836   :  { %2026 = vrot.lane.b32.xlu0 %v8727_v29, %s7931_s16  ;;  %2006 = vrot.lane.b32.xlu1 %v8677_v35, %s7931_s16 }
 0x837   :  { %v1744_v33 = vpop.xlane.xlu0 %1743 }
 0x838   :  { %7603 = vrcp.f32 %v1744_v33  ;;  %v1742_v19 = vpop.xlane.xlu1 %1741 }
 0x839   :  { %7605 = vrcp.f32 %v1742_v19 }
 0x83a   :  { %7281 = vrot.lane.b32.xlu0 %v8673_v24, %s7932_s19  ;;  %2008 = vrot.lane.b32.xlu1 %v8675_v39, %s7931_s16 }
 0x83b   :  { %v7257_v52 = vpop.permute.xlu0 %7256 }
 0x83c   :  { %v7259_v33 = vunpack.i.h.bf16 %v7257_v52  ;;  %v7258_v19 = vunpack.i.l.bf16 %v7257_v52 }
 0x83e   :  { %7291 = vrot.lane.b32.xlu0 %v8693_v53, %s7932_s19  ;;  %2012 = vrot.lane.b32.xlu1 %v8685_v47, %s7931_s16 }
 0x842   :  { %v7604_v49 = vpop.eup %7603  ;;  %7301 = vrot.lane.b32.xlu0 %v8713_v8, %s7932_s19  ;;  %2016 = vrot.lane.b32.xlu1 %v8695_v43, %s7931_s16 }
 0x843   :  { %v7606_v46 = vpop.eup %7605  ;;  %v1790_v3 = vmul.f32 %v7604_v49, %v8984_v20  ;;  %v7248_v20 = vunpack.i.l.bf16 %v8994_v12  ;;  %v7264_v49 = vunpack.i.h.bf16 %v7262_v14 }
 0x844   :  { %v1789_v23 = vmul.f32 %v7606_v46, %v8986_v51  ;;  %v7249_v51 = vunpack.i.h.bf16 %v8994_v12  ;;  %v7263_v46 = vunpack.i.l.bf16 %v7262_v14 }
 0x846   :  { %6212 = vmatprep.mubr.f32.mxu1 %v1789_v23  ;;  %2020 = vrot.lane.b32.xlu1 %v8705_v61, %s7931_s16  ;;  %v6864_v11 = vpack.c.bf16 %v7249_v51, %v7248_v20  ;;  %v6882_v60 = vpack.c.bf16 %v7264_v49, %v7263_v46  ;;  %v7268_v23 = vunpack.i.l.bf16 %v7267_v30 }
 0x847   :  { %6213 = vmatmul.mubr.f32.vlgmr.msra.gmra.mrb[32].mxu1 %v1790_v3 }
 0x848   :  { %6857 = vmatpush3.bf16.xpose.msk.msra.mxu1 %vm8755_vm4, %v8979_v28  ;;  %v7254_v28 = vunpack.i.h.bf16 %v8997_v13  ;;  %v6876_v13 = vpack.c.bf16 %v7259_v33, %v7258_v19 }
 0x849   :  { %6860 = vmatprep.subr.msk.bf16.mxu1 %vm8755_vm4, %v6858_v58 }
 0x84a   :  { %2024 = vrot.lane.b32.xlu1 %v8715_v55, %s7931_s16  ;;  %v6870_v12 = vpack.c.bf16 %v7254_v28, %v7253_v62 }
 0x84e   :  { %2028 = vrot.lane.b32.xlu1 %v8725_v7, %s7931_s16 }
 0x850   :  { %6863 = vmatpush3.bf16.xpose.msk.msra.mxu1 %vm8755_vm4, %v6858_v58  ;;  %v6888_v58 = vpack.c.bf16 %v7269_v21, %v7268_v23 }
 0x851   :  { %6866 = vmatprep.subr.msk.bf16.mxu1 %vm8755_vm4, %v6864_v11 }
 0x852   :  { %7276 = vrot.lane.b32.xlu1 %v8663_v54, %s7932_s19 }
 0x856   :  { %7286 = vrot.lane.b32.xlu1 %v8683_v44, %s7932_s19 }
 0x858   :  { %6869 = vmatpush3.bf16.xpose.msk.msra.mxu1 %vm8755_vm4, %v6864_v11 }
 0x859   :  { %6872 = vmatprep.subr.msk.bf16.mxu1 %vm8755_vm4, %v6870_v12 }
 0x85a   :  { %7296 = vrot.lane.b32.xlu1 %v8703_v57, %s7932_s19 }
 0x85e   :  { %7306 = vrot.lane.b32.xlu1 %v8723_v0, %s7932_s19 }
 0x860   :  { %6875 = vmatpush3.bf16.xpose.msk.msra.mxu1 %vm8755_vm4, %v6870_v12 }
 0x861   :  { %6878 = vmatprep.subr.msk.bf16.mxu1 %vm8755_vm4, %v6876_v13 }
 0x862   :  { %7311 = vrot.lane.b32.xlu1 %v8733_v5, %s7932_s19 }
 0x868   :  { %6881 = vmatpush3.bf16.xpose.msk.msra.mxu1 %vm8755_vm4, %v6876_v13 }
 0x869   :  { %6884 = vmatprep.subr.msk.bf16.mxu1 %vm8755_vm4, %v6882_v60 }
 0x86d   :  { %v1748_v3 = vpop.xlane.xlu1 %1747 }
 0x86e   :  { %7607 = vrcp.f32 %v1748_v3 }
 0x870   :  { %6887 = vmatpush3.bf16.xpose.msk.msra.mxu1 %vm8755_vm4, %v6882_v60 }
 0x871   :  { %6890 = vmatprep.subr.msk.bf16.mxu1 %vm8755_vm4, %v6888_v58  ;;  %v7272_v51 = vpop.permute.xlu1 %7271  ;;  %v1746_v14 = vpop.xlane.xlu0 %1745 }
 0x872   :  { %7609 = vrcp.f32 %v1746_v14  ;;  %v7274_v20 = vunpack.i.h.bf16 %v7272_v51  ;;  %v7273_v11 = vunpack.i.l.bf16 %v7272_v51 }
 0x874   :  { %v6894_v62 = vpack.c.bf16 %v7274_v20, %v7273_v11 }
 0x875   :  { %v1752_v28 = vpop.xlane.xlu0 %1751 }
 0x876   :  { %7611 = vrcp.f32 %v1752_v28 }
 0x878   :  { %6893 = vmatpush3.bf16.xpose.msk.msra.mxu1 %vm8755_vm4, %v6888_v58  ;;  %v7608_v12 = vpop.eup %7607 }
 0x879   :  { %6896 = vmatprep.subr.msk.bf16.mxu1 %vm8755_vm4, %v6894_v62  ;;  %v1750_v30 = vpop.xlane.xlu0 %1749  ;;  %v1792_v13 = vmul.f32 %v7608_v12, %v9003_v42 }
 0x87a   :  { %7613 = vrcp.f32 %v1750_v30 }
 0x87c   :  { %v7610_v52 = vpop.eup %7609 }
 0x87d   :  { %v1756_v33 = vpop.xlane.xlu0 %1755  ;;  %v1791_v19 = vmul.f32 %v7610_v52, %v9007_v37 }
 0x87e   :  { %7615 = vrcp.f32 %v1756_v33 }
 0x87f   :  { %6215 = vmatprep.mubr.f32.mxu1 %v1791_v19 }
 0x880   :  { %6899 = vmatpush3.bf16.xpose.msk.msra.mxu1 %vm8755_vm4, %v6894_v62  ;;  %v7612_v46 = vpop.eup %7611 }
 0x881   :  { %6216 = vmatmul.mubr.f32.gmra.mrb[34].mxu1 %v1792_v13  ;;  %v1754_v49 = vpop.xlane.xlu0 %1753  ;;  %v1794_v3 = vmul.f32 %v7612_v46, %v9011_v1 }
 0x882   :  { %7617 = vrcp.f32 %v1754_v49 }
 0x884   :  { %v7614_v60 = vpop.eup %7613 }
 0x885   :  { %v1760_v21 = vpop.xlane.xlu0 %1759  ;;  %v1793_v23 = vmul.f32 %v7614_v60, %v9015_v34 }
 0x886   :  { %7619 = vrcp.f32 %v1760_v21 }
 0x887   :  { %6218 = vmatprep.mubr.f32.mxu1 %v1793_v23 }
 0x888   :  { %6219 = vmatmul.mubr.f32.gmra.mrb[36].mxu1 %v1794_v3  ;;  %v7616_v42 = vpop.eup %7615 }
 0x889   :  { %v1758_v37 = vpop.xlane.xlu0 %1757  ;;  %v1796_v20 = vmul.f32 %v7616_v42, %v9019_v22 }
 0x88a   :  { %7621 = vrcp.f32 %v1758_v37 }
 0x88c   :  { %v7618_v58 = vpop.eup %7617 }
 0x88d   :  { %v1762_v51 = vpop.xlane.xlu0 %1761  ;;  %v1795_v14 = vmul.f32 %v7618_v58, %v9025_v15 }
 0x88e   :  { %7623 = vrcp.f32 %v1762_v51 }
 0x88f   :  { %6221 = vmatprep.mubr.f32.mxu1 %v1795_v14 }
 0x890   :  { %6222 = vmatmul.mubr.f32.gmra.mrb[38].mxu1 %v1796_v20  ;;  %v7620_v11 = vpop.eup %7619 }
 0x891   :  { %v1798_v1 = vmul.f32 %v7620_v11, %v9029_v17  ;;  %v1768_v62 = vpop.xlane.xlu0 %1767 }
 0x894   :  { %v7622_v28 = vpop.eup %7621 }
 0x895   :  { %v1797_v34 = vmul.f32 %v7622_v28, %v9033_v25  ;;  %v1766_v52 = vpop.xlane.xlu0 %1765 }
 0x896   :  { %7625 = vrcp.f32 %v1766_v52 }
 0x897   :  { %6224 = vmatprep.mubr.f32.mxu1 %v1797_v34 }
 0x898   :  { %v7624_v30 = vpop.eup %7623  ;;  %6225 = vmatmul.mubr.f32.gmra.mrb[40].mxu1 %v1798_v1 }
 0x899   :  { %v1799_v12 = vmul.f32 %v7624_v30, %v9036_v16  ;;  %v1770_v33 = vpop.xlane.xlu0 %1769 }
 0x89b   :  { %6227 = vmatprep.mubr.f32.mxu1 %v1799_v12 }
 0x89d   :  { %v1999_v13 = vpop.permute.xlu0 %1998 }
 0x8a0   :  { %v7626_v25 = vpop.eup %7625 }
 0x8a1   :  { %v1801_v16 = vmul.f32 %v7626_v25, %v9044_v48  ;;  %v2011_v23 = vpop.permute.xlu0 %2010 }
 0x8a2   :  { %v1764_v15 = vpop.xlane.xlu1 %1763 }
 0x8a3   :  { %7627 = vrcp.f32 %v1764_v15 }
 0x8a4   :  { %7629 = vrcp.f32 %v1768_v62 }
 0x8a5   :  { %7631 = vrcp.f32 %v1770_v33  ;;  %v2015_v20 = vpop.permute.xlu0 %2014 }
 0x8a6   :  { %v1772_v22 = vpop.xlane.xlu1 %1771 }
 0x8a7   :  { %7633 = vrcp.f32 %v1772_v22 }
 0x8aa   :  { %v2001_v19 = vpop.permute.xlu1 %2000 }
 0x8ad   :  { %v7628_v17 = vpop.eup %7627 }
 0x8ae   :  { %v2003_v49 = vpop.permute.xlu1 %2002  ;;  %v1800_v46 = vmul.f32 %v7628_v17, %v9050_v6  ;;  %v7630_v60 = vpop.eup %7629 }
 0x8af   :  { %v7632_v21 = vpop.eup %7631  ;;  %v1802_v37 = vmul.f32 %v7630_v60, %v9040_v38  ;;  %v2019_v6 = vpop.permute.xlu0 %2018 }
 0x8b0   :  { %6228 = vmatmul.mubr.f32.gmra.mrb[42].mxu1 %v1800_v46  ;;  %v1803_v58 = vmul.f32 %v7632_v21, %v9047_v41 }
 0x8b1   :  { %6230 = vmatprep.mubr.f32.mxu1 %v1801_v16  ;;  %v7634_v42 = vpop.eup %7633 }
 0x8b2   :  { %v2005_v3 = vpop.permute.xlu1 %2004  ;;  %v1804_v14 = vmul.f32 %v7634_v42, %v9053_v4 }
 0x8b3   :  { %v2023_v41 = vpop.permute.xlu0 %2022 }
 0x8b4   :  { %6231 = vmatmul.mubr.f32.gmra.mrb[44].mxu1 %v1802_v37 }
 0x8b5   :  { %6233 = vmatprep.mubr.f32.mxu1 %v1803_v58 }
 0x8b6   :  { %v2007_v51 = vpop.permute.xlu1 %2006 }
 0x8b7   :  { %v2027_v28 = vpop.permute.xlu0 %2026 }
 0x8b8   :  { %6234 = vmatmul.mubr.f32.gmra.mrb[46].mxu1 %v1804_v14 }
 0x8b9   :  { %6268 = vmatprep.mubr.msk.f32.mxu1 %vm1451_vm3, %v1999_v13 }
 0x8ba   :  { %v2009_v48 = vpop.permute.xlu1 %2008 }
 0x8bb   :  { %v7282_v62 = vpop.permute.xlu0 %7281 }
 0x8bc   :  { %6269 = vmatmul.mubr.msk.f32.vlgmr.msra.gmra.mrb[48].mxu1 %vm1451_vm3, %v2001_v19  ;;  %v7284_v12 = vunpack.i.h.bf16 %v7282_v62  ;;  %v7283_v52 = vunpack.i.l.bf16 %v7282_v62 }
 0x8bd   :  { %6271 = vmatprep.mubr.msk.f32.mxu1 %vm1451_vm3, %v2003_v49 }
 0x8be   :  { %v2013_v11 = vpop.permute.xlu1 %2012  ;;  %v6904_v17 = vpack.c.bf16 %v7284_v12, %v7283_v52 }
 0x8bf   :  { %v7292_v49 = vpop.permute.xlu0 %7291 }
 0x8c0   :  { %6272 = vmatmul.mubr.msk.f32.gmra.mrb[50].mxu1 %vm1451_vm3, %v2005_v3  ;;  %v7294_v46 = vunpack.i.h.bf16 %v7292_v49  ;;  %v7293_v60 = vunpack.i.l.bf16 %v7292_v49 }
 0x8c1   :  { %6274 = vmatprep.mubr.msk.f32.mxu1 %vm1451_vm3, %v2007_v51 }
 0x8c2   :  { %v2017_v38 = vpop.permute.xlu1 %2016  ;;  %v6912_v37 = vpack.c.bf16 %v7294_v46, %v7293_v60 }
 0x8c3   :  { %v7302_v42 = vpop.permute.xlu0 %7301 }
 0x8c4   :  { %6275 = vmatmul.mubr.msk.f32.gmra.mrb[52].mxu1 %vm1451_vm3, %v2009_v48  ;;  %v7304_v51 = vunpack.i.h.bf16 %v7302_v42  ;;  %v7303_v14 = vunpack.i.l.bf16 %v7302_v42 }
 0x8c5   :  { %6277 = vmatprep.mubr.msk.f32.mxu1 %vm1451_vm3, %v2011_v23 }
 0x8c6   :  { %v2021_v4 = vpop.permute.xlu1 %2020 }
 0x8c8   :  { %6278 = vmatmul.mubr.msk.f32.gmra.mrb[54].mxu1 %vm1451_vm3, %v2013_v11  ;;  %v6920_v11 = vpack.c.bf16 %v7304_v51, %v7303_v14 }
 0x8c9   :  { %6280 = vmatprep.mubr.msk.f32.mxu1 %vm1451_vm3, %v2015_v20 }
 0x8ca   :  { %v2025_v34 = vpop.permute.xlu1 %2024 }
 0x8cc   :  { %6281 = vmatmul.mubr.msk.f32.gmra.mrb[56].mxu1 %vm1451_vm3, %v2017_v38 }
 0x8cd   :  { %6283 = vmatprep.mubr.msk.f32.mxu1 %vm1451_vm3, %v2019_v6 }
 0x8ce   :  { %v2029_v1 = vpop.permute.xlu1 %2028 }
 0x8d0   :  { %6284 = vmatmul.mubr.msk.f32.gmra.mrb[58].mxu1 %vm1451_vm3, %v2021_v4 }
 0x8d1   :  { %6286 = vmatprep.mubr.msk.f32.mxu1 %vm1451_vm3, %v2023_v41 }
 0x8d2   :  { %v7277_v30 = vpop.permute.xlu1 %7276 }
 0x8d3   :  { %v7279_v15 = vunpack.i.h.bf16 %v7277_v30  ;;  %v7278_v33 = vunpack.i.l.bf16 %v7277_v30 }
 0x8d4   :  { %6287 = vmatmul.mubr.msk.f32.gmra.mrb[60].mxu1 %vm1451_vm3, %v2025_v34 }
 0x8d5   :  { %6289 = vmatprep.mubr.msk.f32.mxu1 %vm1451_vm3, %v2027_v28  ;;  %v6900_v22 = vpack.c.bf16 %v7279_v15, %v7278_v33 }
 0x8d6   :  { %v7287_v19 = vpop.permute.xlu1 %7286 }
 0x8d7   :  { %v7289_v25 = vunpack.i.h.bf16 %v7287_v19  ;;  %v7288_v13 = vunpack.i.l.bf16 %v7287_v19  ;;  %6901 = vmatprep.subr.bf16.mxu0 %v6900_v22 }
 0x8d8   :  { %6290 = vmatmul.mubr.msk.f32.gmra.mrb[62].mxu1 %vm1451_vm3, %v2029_v1  ;;  %6903 = vmatpush3.bf16.msra.mxu0 %v6900_v22 }
 0x8d9   :  { %6905 = vmatprep.subr.bf16.mxu0 %v6904_v17  ;;  %v6908_v16 = vpack.c.bf16 %v7289_v25, %v7288_v13 }
 0x8da   :  { %v7297_v21 = vpop.permute.xlu1 %7296 }
 0x8db   :  { %v7299_v23 = vunpack.i.h.bf16 %v7297_v21  ;;  %v7298_v3 = vunpack.i.l.bf16 %v7297_v21 }
 0x8dc   :  { %6907 = vmatpush3.bf16.msra.mxu0 %v6904_v17 }
 0x8dd   :  { %6909 = vmatprep.subr.bf16.mxu0 %v6908_v16  ;;  %v6916_v20 = vpack.c.bf16 %v7299_v23, %v7298_v3 }
 0x8de   :  { %v7307_v58 = vpop.permute.xlu1 %7306 }
 0x8df   :  { %v7309_v48 = vunpack.i.h.bf16 %v7307_v58  ;;  %v7308_v6 = vunpack.i.l.bf16 %v7307_v58 }
 0x8e0   :  { %6911 = vmatpush3.bf16.msra.mxu0 %v6908_v16 }
 0x8e1   :  { %6913 = vmatprep.subr.bf16.mxu0 %v6912_v37  ;;  %v6924_v28 = vpack.c.bf16 %v7309_v48, %v7308_v6 }
 0x8e2   :  { %v7312_v38 = vpop.permute.xlu1 %7311 }
 0x8e3   :  { %v7314_v41 = vunpack.i.h.bf16 %v7312_v38  ;;  %v7313_v4 = vunpack.i.l.bf16 %v7312_v38 }
 0x8e4   :  { %6915 = vmatpush3.bf16.msra.mxu0 %v6912_v37 }
 0x8e5   :  { %6917 = vmatprep.subr.bf16.mxu0 %v6916_v20  ;;  %v6928_v34 = vpack.c.bf16 %v7314_v41, %v7313_v4 }
 0x8e8   :  { %6919 = vmatpush3.bf16.msra.mxu0 %v6916_v20 }
 0x8e9   :  { %6921 = vmatprep.subr.bf16.mxu0 %v6920_v11 }
 0x8ec   :  { %6923 = vmatpush3.bf16.msra.mxu0 %v6920_v11 }
 0x8ed   :  { %6925 = vmatprep.subr.bf16.mxu0 %v6924_v28 }
 0x8f0   :  { %6927 = vmatpush3.bf16.msra.mxu0 %v6924_v28 }
 0x8f1   :  { %6929 = vmatprep.subr.bf16.mxu0 %v6928_v34 }
 0x8f4   :  { %6931 = vmatpush3.bf16.msra.mxu0 %v6928_v34 }
 0x91a   :  { %v9173_v1 = vpop.f32.mrb[32].mxu1 }
 0x91b   :  { %10594 = vst [vmem:[#allocation36_spill] sm:$0xff] %v9173_v1  ;;  %v9175_v62 = vpop.f32.mrb[33].mxu1 }
 0x91c   :  { %10595 = vst [vmem:[#allocation37_spill] sm:$0xff] %v9175_v62  ;;  %v9532_v62 = vld [vmem:[%s10525_s2 + $0x20] sm:$0xff] }
 0x954   :  { %v9177_v30 = vpop.f32.mrb[34].mxu1 }
 0x955   :  { %10596 = vst [vmem:[#allocation38_spill] sm:$0xff] %v9177_v30  ;;  %v9179_v12 = vpop.f32.mrb[35].mxu1 }
 0x956   :  { %10597 = vst [vmem:[#allocation39_spill] sm:$0xff] %v9179_v12 }
 0x95b   :  { %v9181_v52 = vpop.f32.mrb[36].mxu1 }
 0x95c   :  { %10598 = vst [vmem:[#allocation40_spill] sm:$0xff] %v9181_v52  ;;  %v9183_v15 = vpop.f32.mrb[37].mxu1 }
 0x95d   :  { %10599 = vst [vmem:[#allocation41_spill] sm:$0xff] %v9183_v15  ;;  %v10611_v15 = vld [vmem:[#allocation27_spill] sm:$0xff] }
 0x963   :  { %v9185_v33 = vpop.f32.mrb[38].mxu1 }
 0x964   :  { %10600 = vst [vmem:[#allocation42_spill] sm:$0xff] %v9185_v33  ;;  %v9187_v22 = vpop.f32.mrb[39].mxu1 }
 0x965   :  { %10601 = vst [vmem:[#allocation43_spill] sm:$0xff] %v9187_v22  ;;  %v10610_v22 = vld [vmem:[#allocation26_spill] sm:$0xff] }
 0x96b   :  { %v9189_v19 = vpop.f32.mrb[40].mxu1 }
 0x96c   :  { %10602 = vst [vmem:[#allocation44_spill] sm:$0xff] %v9189_v19  ;;  %v9191_v25 = vpop.f32.mrb[41].mxu1  ;;  %v9523_v19 = vld [vmem:[%s10525_s2 + $0x10] sm:$0xff] }
 0x96d   :  { %10603 = vst [vmem:[#allocation45_spill] sm:$0xff] %v9191_v25 }
 0x983   :  { %v9193_v13 = vpop.f32.mrb[42].mxu1 }
 0x984   :  { %10604 = vst [vmem:[#allocation46_spill] sm:$0xff] %v9193_v13  ;;  %v9195_v17 = vpop.f32.mrb[43].mxu1 }
 0x985   :  { %10605 = vst [vmem:[#allocation47_spill] sm:$0xff] %v9195_v17 }
 0x987   :  { %v9197_v49 = vpop.f32.mrb[44].mxu1 }
 0x988   :  { %10606 = vst [vmem:[#allocation48_spill] sm:$0xff] %v9197_v49  ;;  %v9199_v46 = vpop.f32.mrb[45].mxu1 }
 0x989   :  { %10607 = vst [vmem:[#allocation49_spill] sm:$0xff] %v9199_v46 }
 0x98b   :  { %v9201_v60 = vpop.f32.mrb[46].mxu1 }
 0x98c   :  { %10608 = vst [vmem:[#allocation50_spill] sm:$0xff] %v9201_v60  ;;  %v9203_v16 = vpop.f32.mrb[47].mxu1 }
 0x98d   :  { %10609 = vst [vmem:[#allocation51_spill] sm:$0xff] %v9203_v16 }
 0x98f   :  { %v6270_v21 = vpop.f32.mrb[48].mxu1 }
 0x990   :  { %v2198_v23 = vadd.f32 %v6270_v21, %v8824_v63  ;;  %v2192_v3 = vpop.f32.mrb[49].mxu1 }
 0x991   :  { %v2193_v37 = vadd.f32 %v2192_v3, %v8829_v26 }
 0x992   :  { %2273 = vmax.xlane.f32.xlu1 %v2198_v23 }
 0x993   :  { %v6273_v42 = vpop.f32.mrb[50].mxu1  ;;  %2271 = vmax.xlane.f32.xlu0 %v2193_v37 }
 0x994   :  { %v2202_v58 = vpop.f32.mrb[51].mxu1  ;;  %v2208_v34 = vadd.f32 %v6273_v42, %v8850_v59  ;;  %v10612_v59 = vld [vmem:[#allocation28_spill] sm:$0xff] }
 0x995   :  { %v2203_v21 = vadd.f32 %v2202_v58, %v8858_v45  ;;  %v10613_v45 = vld [vmem:[#allocation29_spill] sm:$0xff] }
 0x997   :  { %v6276_v51 = vpop.f32.mrb[52].mxu1 }
 0x998   :  { %v2212_v14 = vpop.f32.mrb[53].mxu1  ;;  %v2218_v33 = vadd.f32 %v6276_v51, %v8872_v27  ;;  %v10616_v51 = vld [vmem:[#allocation32_spill] sm:$0xff] }
 0x999   :  { %v2213_v3 = vadd.f32 %v2212_v14, %v8867_v40  ;;  %v10614_v40 = vld [vmem:[#allocation30_spill] sm:$0xff] }
 0x99b   :  { %v6279_v20 = vpop.f32.mrb[54].mxu1 }
 0x99c   :  { %v2222_v48 = vpop.f32.mrb[55].mxu1  ;;  %v9223_v30 = vadd.f32 %v6279_v20, %v10611_v15  ;;  %v10617_v20 = vld [vmem:[#allocation33_spill] sm:$0xff] }
 0x99d   :  { %v9220_v52 = vadd.f32 %v2222_v48, %v10610_v22  ;;  %v10615_v22 = vld [vmem:[#allocation31_spill] sm:$0xff] }
 0x99f   :  { %v6282_v6 = vpop.f32.mrb[56].mxu1 }
 0x9a0   :  { %v2232_v11 = vpop.f32.mrb[57].mxu1  ;;  %v9231_v58 = vadd.f32 %v6282_v6, %v10613_v45  ;;  %v10618_v6 = vld [vmem:[#allocation34_spill] sm:$0xff] }
 0x9a1   :  { %v9228_v42 = vadd.f32 %v2232_v11, %v10612_v59 }
 0x9a3   :  { %7321 = vrot.lane.b32.xlu1 %v8673_v24, %s7933_s20  ;;  %v6285_v38 = vpop.f32.mrb[58].mxu1 }
 0x9a4   :  { %v2242_v41 = vpop.f32.mrb[59].mxu1  ;;  %v9239_v15 = vadd.f32 %v6285_v38, %v10615_v22 }
 0x9a5   :  { %v9236_v27 = vadd.f32 %v2242_v41, %v10614_v40  ;;  %v10619_v41 = vld [vmem:[#allocation35_spill] sm:$0xff] }
 0x9a7   :  { %7326 = vrot.lane.b32.xlu1 %v8683_v44, %s7933_s20  ;;  %v6288_v63 = vpop.f32.mrb[60].mxu1 }
 0x9a8   :  { %v2252_v26 = vpop.f32.mrb[61].mxu1  ;;  %v9247_v48 = vadd.f32 %v6288_v63, %v10617_v20 }
 0x9a9   :  { %7316 = vrot.lane.b32.xlu0 %v8663_v54, %s7933_s20  ;;  %v9244_v14 = vadd.f32 %v2252_v26, %v10616_v51 }
 0x9ab   :  { %7331 = vrot.lane.b32.xlu1 %v8693_v53, %s7933_s20  ;;  %v6291_v4 = vpop.f32.mrb[62].mxu1 }
 0x9ac   :  { %v2262_v28 = vpop.f32.mrb[63].mxu1  ;;  %v9255_v38 = vadd.f32 %v6291_v4, %v10619_v41 }
 0x9ad   :  { %v9252_v11 = vadd.f32 %v2262_v28, %v10618_v6 }
 0x9c8   :  { %2277 = vmax.xlane.f32.xlu0 %v2208_v34 }
 0x9cc   :  { %2275 = vmax.xlane.f32.xlu0 %v2203_v21 }
 0x9cf   :  { %2279 = vmax.xlane.f32.xlu1 %v2213_v3 }
 0x9d0   :  { %2281 = vmax.xlane.f32.xlu0 %v2218_v33 }
 0x9d3   :  { %2283 = vmax.xlane.f32.xlu1 %v9220_v52 }
 0x9d4   :  { %2285 = vmax.xlane.f32.xlu0 %v9223_v30 }
 0x9d7   :  { %2287 = vmax.xlane.f32.xlu1 %v9228_v42 }
 0x9d8   :  { %2289 = vmax.xlane.f32.xlu0 %v9231_v58 }
 0x9db   :  { %2291 = vmax.xlane.f32.xlu1 %v9236_v27 }
 0x9dc   :  { %2293 = vmax.xlane.f32.xlu0 %v9239_v15 }
 0x9df   :  { %2295 = vmax.xlane.f32.xlu1 %v9244_v14 }
 0x9e0   :  { %2297 = vmax.xlane.f32.xlu0 %v9247_v48 }
 0x9e3   :  { %2299 = vmax.xlane.f32.xlu1 %v9252_v11 }
 0x9e4   :  { %2301 = vmax.xlane.f32.xlu0 %v9255_v38 }
 0x9f4   :  { %7341 = vrot.lane.b32.xlu1 %v8713_v8, %s7933_s20 }
 0x9f8   :  { %7346 = vrot.lane.b32.xlu1 %v8723_v0, %s7933_s20 }
 0xa1f   :  { %v2274_v63 = vpop.xlane.xlu1 %2273 }
 0xa20   :  { %v2304_v26 = vsub.f32 %v2198_v23, %v2274_v63  ;;  %v2272_v59 = vpop.xlane.xlu0 %2271 }
 0xa21   :  { %v2303_v45 = vsub.f32 %v2193_v37, %v2272_v59 }
 0xa22   :  { %v2321_v40 = vmul.f32 1.442695, %v2304_v26 }
 0xa23   :  { %v2319_v28 = vmul.f32 1.442695, %v2303_v45  ;;  %v9276_v23 = vpop.permute.xlu1 %7321 }
 0xa24   :  { %7635 = vpow2.f32 %v2321_v40  ;;  %v7317_v22 = vpop.permute.xlu0 %7316 }
 0xa25   :  { %7637 = vpow2.f32 %v2319_v28  ;;  %v7319_v4 = vunpack.i.h.bf16 %v7317_v22  ;;  %v7318_v51 = vunpack.i.l.bf16 %v7317_v22 }
 0xa27   :  { %v9263_v20 = vpack.c.bf16 %v7319_v4, %v7318_v51  ;;  %v9278_v37 = vpop.permute.xlu1 %7326 }
 0xa29   :  { %6934 = vmatprep.subr.msk.bf16.mxu0 %vm8755_vm4, %v9263_v20 }
 0xa2b   :  { %v9280_v59 = vpop.permute.xlu1 %7331 }
 0xa2e   :  { %v9268_v6 = vpop.eup %7635 }
 0xa2f   :  { %v9270_v41 = vpop.eup %7637  ;;  %2353 = vadd.xlane.f32.xlu0 %v9268_v6 }
 0xa30   :  { %2351 = vadd.xlane.f32.xlu1 %v9270_v41 }
 0xa45   :  { %7336 = vrot.lane.b32.xlu0 %v8703_v57, %s7933_s20 }
 0xa55   :  { %v2278_v63 = vpop.xlane.xlu0 %2277 }
 0xa56   :  { %v2306_v26 = vsub.f32 %v2208_v34, %v2278_v63 }
 0xa58   :  { %v2325_v45 = vmul.f32 1.442695, %v2306_v26 }
 0xa59   :  { %v2276_v40 = vpop.xlane.xlu0 %2275 }
 0xa5a   :  { %7639 = vpow2.f32 %v2325_v45  ;;  %v2305_v28 = vsub.f32 %v2203_v21, %v2276_v40 }
 0xa5c   :  { %v2323_v22 = vmul.f32 1.442695, %v2305_v28  ;;  %v2280_v4 = vpop.xlane.xlu1 %2279 }
 0xa5d   :  { %v2282_v51 = vpop.xlane.xlu0 %2281  ;;  %v2307_v60 = vsub.f32 %v2213_v3, %v2280_v4 }
 0xa5e   :  { %7641 = vpow2.f32 %v2323_v22  ;;  %v2308_v12 = vsub.f32 %v2218_v33, %v2282_v51 }
 0xa5f   :  { %v2327_v17 = vmul.f32 1.442695, %v2307_v60 }
 0xa60   :  { %v2329_v16 = vmul.f32 1.442695, %v2308_v12  ;;  %v2284_v25 = vpop.xlane.xlu1 %2283 }
 0xa61   :  { %v2286_v46 = vpop.xlane.xlu0 %2285  ;;  %v2309_v21 = vsub.f32 %v9220_v52, %v2284_v25 }
 0xa62   :  { %7643 = vpow2.f32 %v2329_v16  ;;  %v2310_v49 = vsub.f32 %v9223_v30, %v2286_v46 }
 0xa63   :  { %7645 = vpow2.f32 %v2327_v17  ;;  %v2331_v12 = vmul.f32 1.442695, %v2309_v21 }
 0xa64   :  { %v9283_v34 = vpop.eup %7639  ;;  %v2333_v63 = vmul.f32 1.442695, %v2310_v49  ;;  %v2288_v3 = vpop.xlane.xlu1 %2287 }
 0xa65   :  { %2357 = vadd.xlane.f32.xlu1 %v9283_v34  ;;  %v2290_v26 = vpop.xlane.xlu0 %2289  ;;  %v2311_v17 = vsub.f32 %v9228_v42, %v2288_v3 }
 0xa66   :  { %7647 = vpow2.f32 %v2333_v63  ;;  %v2312_v33 = vsub.f32 %v9231_v58, %v2290_v26 }
 0xa67   :  { %7649 = vpow2.f32 %v2331_v12  ;;  %v2335_v60 = vmul.f32 1.442695, %v2311_v17 }
 0xa68   :  { %v9287_v45 = vpop.eup %7641  ;;  %v2337_v52 = vmul.f32 1.442695, %v2312_v33  ;;  %v2292_v25 = vpop.xlane.xlu1 %2291 }
 0xa69   :  { %2355 = vadd.xlane.f32.xlu0 %v9287_v45  ;;  %v2294_v46 = vpop.xlane.xlu0 %2293  ;;  %v2313_v16 = vsub.f32 %v9236_v27, %v2292_v25 }
 0xa6a   :  { %7651 = vpow2.f32 %v2337_v52 }
 0xa6b   :  { %7653 = vpow2.f32 %v2335_v60  ;;  %v2339_v22 = vmul.f32 1.442695, %v2313_v16 }
 0xa6c   :  { %v9291_v30 = vpop.eup %7643  ;;  %v2296_v28 = vpop.xlane.xlu1 %2295 }
 0xa6d   :  { %2361 = vadd.xlane.f32.xlu0 %v9291_v30  ;;  %v9295_v49 = vpop.eup %7645  ;;  %v2298_v40 = vpop.xlane.xlu0 %2297  ;;  %7655 = vpow2.f32 %v2339_v22  ;;  %v2315_v27 = vsub.f32 %v9244_v14, %v2296_v28  ;;  %v2314_v14 = vsub.f32 %v9239_v15, %v2294_v46 }
 0xa6e   :  { %v2316_v42 = vsub.f32 %v9247_v48, %v2298_v40 }
 0xa6f   :  { %v2343_v26 = vmul.f32 1.442695, %v2315_v27  ;;  %v2341_v25 = vmul.f32 1.442695, %v2314_v14 }
 0xa70   :  { %v9299_v58 = vpop.eup %7647  ;;  %v2345_v51 = vmul.f32 1.442695, %v2316_v42  ;;  %v2300_v21 = vpop.xlane.xlu1 %2299 }
 0xa71   :  { %2359 = vadd.xlane.f32.xlu0 %v9295_v49  ;;  %v9305_v4 = vpop.eup %7649  ;;  %v2317_v48 = vsub.f32 %v9252_v11, %v2300_v21  ;;  %v2302_v52 = vpop.xlane.xlu0 %2301  ;;  %v7324_v21 = vunpack.i.h.bf16 %v9276_v23 }
 0xa72   :  { %7657 = vpow2.f32 %v2345_v51  ;;  %v2318_v11 = vsub.f32 %v9255_v38, %v2302_v52  ;;  %v7333_v52 = vunpack.i.l.bf16 %v9280_v59 }
 0xa73   :  { %7659 = vpow2.f32 %v2343_v26  ;;  %v2347_v12 = vmul.f32 1.442695, %v2317_v48  ;;  %v7323_v26 = vunpack.i.l.bf16 %v9276_v23 }
 0xa74   :  { %v9309_v63 = vpop.eup %7651  ;;  %v2349_v16 = vmul.f32 1.442695, %v2318_v11  ;;  %v7342_v38 = vpop.permute.xlu1 %7341 }
 0xa75   :  { %2365 = vadd.xlane.f32.xlu0 %v9299_v58  ;;  %v9313_v3 = vpop.eup %7653  ;;  %7661 = vpow2.f32 %v2347_v12  ;;  %v6938_v14 = vpack.c.bf16 %v7324_v21, %v7323_v26 }
 0xa76   :  { %7351 = vrot.lane.b32.xlu1 %v8733_v5, %s7933_s20  ;;  %7663 = vpow2.f32 %v2341_v25 }
 0xa77   :  { %v9316_v33 = vpop.eup %7655  ;;  %7665 = vpow2.f32 %v2349_v16 }
 0xa78   :  { %v7347_v28 = vpop.permute.xlu1 %7346 }
 0xa79   :  { %2363 = vadd.xlane.f32.xlu0 %v9305_v4  ;;  %v7348_v21 = vunpack.i.l.bf16 %v7347_v28 }
 0xa7c   :  { %v9320_v17 = vpop.eup %7657 }
 0xa7d   :  { %2369 = vadd.xlane.f32.xlu0 %v9309_v63  ;;  %v9324_v60 = vpop.eup %7659 }
 0xa7f   :  { %v9327_v40 = vpop.eup %7661 }
 0xa80   :  { %v9330_v15 = vpop.eup %7663 }
 0xa81   :  { %2367 = vadd.xlane.f32.xlu0 %v9313_v3  ;;  %v9333_v46 = vpop.eup %7665 }
 0xa85   :  { %2371 = vadd.xlane.f32.xlu0 %v9316_v33 }
 0xa89   :  { %2377 = vadd.xlane.f32.xlu0 %v9320_v17 }
 0xa8d   :  { %2375 = vadd.xlane.f32.xlu0 %v9324_v60 }
 0xa91   :  { %2379 = vadd.xlane.f32.xlu0 %v9327_v40 }
 0xa9a   :  { %2373 = vadd.xlane.f32.xlu1 %v9330_v15 }
 0xa9e   :  { %2381 = vadd.xlane.f32.xlu1 %v9333_v46 }
 0xaa7   :  { %2608 = vrot.lane.b32.xlu0 %v8657_v31, %s7934_s21 }
 0xaab   :  { %2620 = vrot.lane.b32.xlu0 %v8687_v32, %s7934_s21 }
 0xaaf   :  { %2624 = vrot.lane.b32.xlu0 %v8697_v2, %s7934_s21  ;;  %2610 = vrot.lane.b32.xlu1 %v8655_v50, %s7934_s21 }
 0xab3   :  { %2628 = vrot.lane.b32.xlu0 %v8707_v36, %s7934_s21  ;;  %2612 = vrot.lane.b32.xlu1 %v8667_v10, %s7934_s21 }
 0xab7   :  { %2632 = vrot.lane.b32.xlu0 %v8717_v9, %s7934_s21  ;;  %2614 = vrot.lane.b32.xlu1 %v8665_v56, %s7934_s21 }
 0xabb   :  { %2636 = vrot.lane.b32.xlu0 %v8727_v29, %s7934_s21  ;;  %2616 = vrot.lane.b32.xlu1 %v8677_v35, %s7934_s21 }
 0xabc   :  { %v2354_v22 = vpop.xlane.xlu0 %2353 }
 0xabd   :  { %7667 = vrcp.f32 %v2354_v22  ;;  %v2352_v42 = vpop.xlane.xlu1 %2351  ;;  %v7344_v22 = vunpack.i.h.bf16 %v7342_v38 }
 0xabe   :  { %7669 = vrcp.f32 %v2352_v42  ;;  %v7343_v42 = vunpack.i.l.bf16 %v7342_v38 }
 0xabf   :  { %7361 = vrot.lane.b32.xlu0 %v8673_v24, %s7935_s22  ;;  %2618 = vrot.lane.b32.xlu1 %v8675_v39, %s7934_s21 }
 0xac0   :  { %v7337_v25 = vpop.permute.xlu0 %7336 }
 0xac1   :  { %v7339_v11 = vunpack.i.h.bf16 %v7337_v25  ;;  %v7338_v16 = vunpack.i.l.bf16 %v7337_v25 }
 0xac3   :  { %7371 = vrot.lane.b32.xlu0 %v8693_v53, %s7935_s22  ;;  %2622 = vrot.lane.b32.xlu1 %v8685_v47, %s7934_s21 }
 0xac7   :  { %v7668_v27 = vpop.eup %7667  ;;  %7381 = vrot.lane.b32.xlu0 %v8713_v8, %s7935_s22  ;;  %2626 = vrot.lane.b32.xlu1 %v8695_v43, %s7934_s21 }
 0xac8   :  { %v7670_v51 = vpop.eup %7669  ;;  %v2400_v12 = vmul.f32 %v7668_v27, %v9268_v6  ;;  %v7328_v6 = vunpack.i.l.bf16 %v9278_v37  ;;  %v6962_v27 = vpack.c.bf16 %v7344_v22, %v7343_v42 }
 0xac9   :  { %v2399_v48 = vmul.f32 %v7670_v51, %v9270_v41  ;;  %v7329_v41 = vunpack.i.h.bf16 %v9278_v37  ;;  %v7349_v51 = vunpack.i.h.bf16 %v7347_v28 }
 0xacb   :  { %6324 = vmatprep.mubr.f32.mxu0 %v2399_v48  ;;  %2630 = vrot.lane.b32.xlu1 %v8705_v61, %s7934_s21  ;;  %v6944_v23 = vpack.c.bf16 %v7329_v41, %v7328_v6  ;;  %v6968_v48 = vpack.c.bf16 %v7349_v51, %v7348_v21 }
 0xacc   :  { %6325 = vmatmul.mubr.f32.vlgmr.msra.gmra.mrb[48].mxu0 %v2400_v12 }
 0xacd   :  { %6937 = vmatpush3.bf16.xpose.msk.msra.mxu0 %vm8755_vm4, %v9263_v20  ;;  %v7334_v20 = vunpack.i.h.bf16 %v9280_v59  ;;  %v6956_v59 = vpack.c.bf16 %v7339_v11, %v7338_v16 }
 0xace   :  { %6940 = vmatprep.subr.msk.bf16.mxu0 %vm8755_vm4, %v6938_v14 }
 0xacf   :  { %2634 = vrot.lane.b32.xlu1 %v8715_v55, %s7934_s21  ;;  %v6950_v37 = vpack.c.bf16 %v7334_v20, %v7333_v52 }
 0xad3   :  { %2638 = vrot.lane.b32.xlu1 %v8725_v7, %s7934_s21 }
 0xad5   :  { %6943 = vmatpush3.bf16.xpose.msk.msra.mxu0 %vm8755_vm4, %v6938_v14 }
 0xad6   :  { %6946 = vmatprep.subr.msk.bf16.mxu0 %vm8755_vm4, %v6944_v23 }
 0xad7   :  { %7356 = vrot.lane.b32.xlu1 %v8663_v54, %s7935_s22 }
 0xadb   :  { %7366 = vrot.lane.b32.xlu1 %v8683_v44, %s7935_s22 }
 0xadd   :  { %6949 = vmatpush3.bf16.xpose.msk.msra.mxu0 %vm8755_vm4, %v6944_v23 }
 0xade   :  { %6952 = vmatprep.subr.msk.bf16.mxu0 %vm8755_vm4, %v6950_v37 }
 0xadf   :  { %7376 = vrot.lane.b32.xlu1 %v8703_v57, %s7935_s22 }
 0xae3   :  { %7386 = vrot.lane.b32.xlu1 %v8723_v0, %s7935_s22 }
 0xae5   :  { %6955 = vmatpush3.bf16.xpose.msk.msra.mxu0 %vm8755_vm4, %v6950_v37 }
 0xae6   :  { %6958 = vmatprep.subr.msk.bf16.mxu0 %vm8755_vm4, %v6956_v59 }
 0xae7   :  { %7391 = vrot.lane.b32.xlu1 %v8733_v5, %s7935_s22 }
 0xaed   :  { %6961 = vmatpush3.bf16.xpose.msk.msra.mxu0 %vm8755_vm4, %v6956_v59 }
 0xaee   :  { %6964 = vmatprep.subr.msk.bf16.mxu0 %vm8755_vm4, %v6962_v27 }
 0xaf2   :  { %v2358_v26 = vpop.xlane.xlu1 %2357 }
 0xaf3   :  { %7671 = vrcp.f32 %v2358_v26 }
 0xaf5   :  { %6967 = vmatpush3.bf16.xpose.msk.msra.mxu0 %vm8755_vm4, %v6962_v27 }
 0xaf6   :  { %6970 = vmatprep.subr.msk.bf16.mxu0 %vm8755_vm4, %v6968_v48  ;;  %v7352_v12 = vpop.permute.xlu1 %7351  ;;  %v2356_v38 = vpop.xlane.xlu0 %2355 }
 0xaf7   :  { %7673 = vrcp.f32 %v2356_v38  ;;  %v7354_v14 = vunpack.i.h.bf16 %v7352_v12  ;;  %v7353_v41 = vunpack.i.l.bf16 %v7352_v12 }
 0xaf9   :  { %v6974_v23 = vpack.c.bf16 %v7354_v14, %v7353_v41 }
 0xafa   :  { %v2362_v6 = vpop.xlane.xlu0 %2361 }
 0xafb   :  { %7675 = vrcp.f32 %v2362_v6 }
 0xafd   :  { %6973 = vmatpush3.bf16.xpose.msk.msra.mxu0 %vm8755_vm4, %v6968_v48  ;;  %v7672_v20 = vpop.eup %7671 }
 0xafe   :  { %6976 = vmatprep.subr.msk.bf16.mxu0 %vm8755_vm4, %v6974_v23  ;;  %v2360_v28 = vpop.xlane.xlu0 %2359  ;;  %v2402_v11 = vmul.f32 %v7672_v20, %v9283_v34 }
 0xaff   :  { %7677 = vrcp.f32 %v2360_v28 }
 0xb01   :  { %v7674_v52 = vpop.eup %7673 }
 0xb02   :  { %v2366_v37 = vpop.xlane.xlu0 %2365  ;;  %v2401_v25 = vmul.f32 %v7674_v52, %v9287_v45 }
 0xb03   :  { %7679 = vrcp.f32 %v2366_v37 }
 0xb04   :  { %6327 = vmatprep.mubr.f32.mxu0 %v2401_v25 }
 0xb05   :  { %6979 = vmatpush3.bf16.xpose.msk.msra.mxu0 %vm8755_vm4, %v6974_v23  ;;  %v7676_v59 = vpop.eup %7675 }
 0xb06   :  { %6328 = vmatmul.mubr.f32.gmra.mrb[50].mxu0 %v2402_v11  ;;  %v2364_v16 = vpop.xlane.xlu0 %2363  ;;  %v2404_v51 = vmul.f32 %v7676_v59, %v9291_v30 }
 0xb07   :  { %7681 = vrcp.f32 %v2364_v16 }
 0xb09   :  { %v7678_v22 = vpop.eup %7677 }
 0xb0a   :  { %v2370_v42 = vpop.xlane.xlu0 %2369  ;;  %v2403_v27 = vmul.f32 %v7678_v22, %v9295_v49 }
 0xb0b   :  { %7683 = vrcp.f32 %v2370_v42 }
 0xb0c   :  { %6330 = vmatprep.mubr.f32.mxu0 %v2403_v27 }
 0xb0d   :  { %6331 = vmatmul.mubr.f32.gmra.mrb[52].mxu0 %v2404_v51  ;;  %v7680_v34 = vpop.eup %7679 }
 0xb0e   :  { %v2368_v45 = vpop.xlane.xlu0 %2367  ;;  %v2406_v12 = vmul.f32 %v7680_v34, %v9299_v58 }
 0xb0f   :  { %7685 = vrcp.f32 %v2368_v45 }
 0xb11   :  { %v7682_v21 = vpop.eup %7681 }
 0xb12   :  { %v2372_v26 = vpop.xlane.xlu0 %2371  ;;  %v2405_v48 = vmul.f32 %v7682_v21, %v9305_v4 }
 0xb13   :  { %7687 = vrcp.f32 %v2372_v26 }
 0xb14   :  { %6333 = vmatprep.mubr.f32.mxu0 %v2405_v48 }
 0xb15   :  { %6334 = vmatmul.mubr.f32.gmra.mrb[54].mxu0 %v2406_v12  ;;  %v7684_v38 = vpop.eup %7683 }
 0xb16   :  { %v2408_v30 = vmul.f32 %v7684_v38, %v9309_v63  ;;  %v2378_v41 = vpop.xlane.xlu0 %2377 }
 0xb19   :  { %v7686_v14 = vpop.eup %7685 }
 0xb1a   :  { %v2407_v49 = vmul.f32 %v7686_v14, %v9313_v3  ;;  %v2376_v28 = vpop.xlane.xlu0 %2375 }
 0xb1b   :  { %7689 = vrcp.f32 %v2376_v28 }
 0xb1c   :  { %6336 = vmatprep.mubr.f32.mxu0 %v2407_v49 }
 0xb1d   :  { %v7688_v6 = vpop.eup %7687  ;;  %6337 = vmatmul.mubr.f32.gmra.mrb[56].mxu0 %v2408_v30 }
 0xb1e   :  { %v2409_v23 = vmul.f32 %v7688_v6, %v9316_v33  ;;  %v2380_v20 = vpop.xlane.xlu0 %2379 }
 0xb20   :  { %6339 = vmatprep.mubr.f32.mxu0 %v2409_v23 }
 0xb22   :  { %v2609_v37 = vpop.permute.xlu0 %2608 }
 0xb25   :  { %v7690_v3 = vpop.eup %7689 }
 0xb26   :  { %v2411_v33 = vmul.f32 %v7690_v3, %v9324_v60  ;;  %v2621_v22 = vpop.permute.xlu0 %2620 }
 0xb27   :  { %v2374_v4 = vpop.xlane.xlu1 %2373 }
 0xb28   :  { %7691 = vrcp.f32 %v2374_v4 }
 0xb29   :  { %7693 = vrcp.f32 %v2378_v41 }
 0xb2a   :  { %7695 = vrcp.f32 %v2380_v20  ;;  %v2625_v26 = vpop.permute.xlu0 %2624 }
 0xb2b   :  { %v2382_v58 = vpop.xlane.xlu1 %2381 }
 0xb2c   :  { %7697 = vrcp.f32 %v2382_v58 }
 0xb2f   :  { %v2611_v52 = vpop.permute.xlu1 %2610 }
 0xb32   :  { %v7692_v63 = vpop.eup %7691 }
 0xb33   :  { %v2613_v25 = vpop.permute.xlu1 %2612  ;;  %v2410_v11 = vmul.f32 %v7692_v63, %v9330_v15  ;;  %v7694_v16 = vpop.eup %7693 }
 0xb34   :  { %v7696_v59 = vpop.eup %7695  ;;  %v2412_v27 = vmul.f32 %v7694_v16, %v9320_v17  ;;  %v2629_v15 = vpop.permute.xlu0 %2628 }
 0xb35   :  { %6340 = vmatmul.mubr.f32.gmra.mrb[58].mxu0 %v2410_v11  ;;  %v2413_v45 = vmul.f32 %v7696_v59, %v9327_v40 }
 0xb36   :  { %6342 = vmatprep.mubr.f32.mxu0 %v2411_v33  ;;  %v7698_v51 = vpop.eup %7697 }
 0xb37   :  { %v2615_v42 = vpop.permute.xlu1 %2614  ;;  %v2414_v21 = vmul.f32 %v7698_v51, %v9333_v46 }
 0xb38   :  { %v2633_v40 = vpop.permute.xlu0 %2632 }
 0xb39   :  { %6343 = vmatmul.mubr.f32.gmra.mrb[60].mxu0 %v2412_v27 }
 0xb3a   :  { %6345 = vmatprep.mubr.f32.mxu0 %v2413_v45 }
 0xb3b   :  { %v2617_v34 = vpop.permute.xlu1 %2616 }
 0xb3c   :  { %v2637_v12 = vpop.permute.xlu0 %2636 }
 0xb3d   :  { %6346 = vmatmul.mubr.f32.gmra.mrb[62].mxu0 %v2414_v21 }
 0xb3e   :  { %6380 = vmatprep.mubr.msk.f32.mxu0 %vm1451_vm3, %v2609_v37 }
 0xb3f   :  { %v2619_v60 = vpop.permute.xlu1 %2618 }
 0xb40   :  { %v7362_v49 = vpop.permute.xlu0 %7361 }
 0xb41   :  { %6381 = vmatmul.mubr.msk.f32.vlgmr.msra.gmra.mrb[64].mxu0 %vm1451_vm3, %v2611_v52  ;;  %v7364_v41 = vunpack.i.h.bf16 %v7362_v49  ;;  %v7363_v6 = vunpack.i.l.bf16 %v7362_v49 }
 0xb42   :  { %6383 = vmatprep.mubr.msk.f32.mxu0 %vm1451_vm3, %v2613_v25 }
 0xb43   :  { %v2623_v48 = vpop.permute.xlu1 %2622  ;;  %v6984_v3 = vpack.c.bf16 %v7364_v41, %v7363_v6 }
 0xb44   :  { %v7372_v37 = vpop.permute.xlu0 %7371 }
 0xb45   :  { %6384 = vmatmul.mubr.msk.f32.gmra.mrb[66].mxu0 %vm1451_vm3, %v2615_v42  ;;  %v7374_v63 = vunpack.i.h.bf16 %v7372_v37  ;;  %v7373_v25 = vunpack.i.l.bf16 %v7372_v37 }
 0xb46   :  { %6386 = vmatprep.mubr.msk.f32.mxu0 %vm1451_vm3, %v2617_v34 }
 0xb47   :  { %v2627_v17 = vpop.permute.xlu1 %2626 }
 0xb48   :  { %v7382_v42 = vpop.permute.xlu0 %7381 }
 0xb49   :  { %6387 = vmatmul.mubr.msk.f32.gmra.mrb[68].mxu0 %vm1451_vm3, %v2619_v60  ;;  %v7384_v51 = vunpack.i.h.bf16 %v7382_v42  ;;  %v7383_v45 = vunpack.i.l.bf16 %v7382_v42 }
 0xb4a   :  { %6389 = vmatprep.mubr.msk.f32.mxu0 %vm1451_vm3, %v2621_v22  ;;  %v6992_v22 = vpack.c.bf16 %v7374_v63, %v7373_v25 }
 0xb4b   :  { %v2631_v46 = vpop.permute.xlu1 %2630  ;;  %v7000_v60 = vpack.c.bf16 %v7384_v51, %v7383_v45 }
 0xb4d   :  { %6390 = vmatmul.mubr.msk.f32.gmra.mrb[70].mxu0 %vm1451_vm3, %v2623_v48 }
 0xb4e   :  { %6392 = vmatprep.mubr.msk.f32.mxu0 %vm1451_vm3, %v2625_v26 }
 0xb4f   :  { %v2635_v38 = vpop.permute.xlu1 %2634 }
 0xb51   :  { %6393 = vmatmul.mubr.msk.f32.gmra.mrb[72].mxu0 %vm1451_vm3, %v2627_v17 }
 0xb52   :  { %6395 = vmatprep.mubr.msk.f32.mxu0 %vm1451_vm3, %v2629_v15 }
 0xb53   :  { %v2639_v14 = vpop.permute.xlu1 %2638 }
 0xb55   :  { %6396 = vmatmul.mubr.msk.f32.gmra.mrb[74].mxu0 %vm1451_vm3, %v2631_v46 }
 0xb56   :  { %6398 = vmatprep.mubr.msk.f32.mxu0 %vm1451_vm3, %v2633_v40 }
 0xb57   :  { %v7357_v30 = vpop.permute.xlu1 %7356 }
 0xb58   :  { %v7359_v23 = vunpack.i.h.bf16 %v7357_v30  ;;  %v7358_v28 = vunpack.i.l.bf16 %v7357_v30 }
 0xb59   :  { %6399 = vmatmul.mubr.msk.f32.gmra.mrb[76].mxu0 %vm1451_vm3, %v2635_v38 }
 0xb5a   :  { %6401 = vmatprep.mubr.msk.f32.mxu0 %vm1451_vm3, %v2637_v12  ;;  %v6980_v4 = vpack.c.bf16 %v7359_v23, %v7358_v28 }
 0xb5b   :  { %v7367_v20 = vpop.permute.xlu1 %7366 }
 0xb5c   :  { %v7369_v58 = vunpack.i.h.bf16 %v7367_v20  ;;  %v7368_v52 = vunpack.i.l.bf16 %v7367_v20  ;;  %6981 = vmatprep.subr.bf16.mxu1 %v6980_v4 }
 0xb5d   :  { %6402 = vmatmul.mubr.msk.f32.gmra.mrb[78].mxu0 %vm1451_vm3, %v2639_v14  ;;  %6983 = vmatpush3.bf16.msra.mxu1 %v6980_v4 }
 0xb5e   :  { %6985 = vmatprep.subr.bf16.mxu1 %v6984_v3  ;;  %v6988_v11 = vpack.c.bf16 %v7369_v58, %v7368_v52 }
 0xb5f   :  { %v7377_v16 = vpop.permute.xlu1 %7376 }
 0xb60   :  { %v7379_v33 = vunpack.i.h.bf16 %v7377_v16  ;;  %v7378_v59 = vunpack.i.l.bf16 %v7377_v16 }
 0xb61   :  { %6987 = vmatpush3.bf16.msra.mxu1 %v6984_v3 }
 0xb62   :  { %6989 = vmatprep.subr.bf16.mxu1 %v6988_v11  ;;  %v6996_v34 = vpack.c.bf16 %v7379_v33, %v7378_v59  ;;  %v9496_v59 = vld [vmem:[%s10525_s2] sm:$0xff] }
 0xb63   :  { %v7387_v27 = vpop.permute.xlu1 %7386 }
 0xb64   :  { %v7389_v21 = vunpack.i.h.bf16 %v7387_v27  ;;  %v7388_v26 = vunpack.i.l.bf16 %v7387_v27 }
 0xb65   :  { %6991 = vmatpush3.bf16.msra.mxu1 %v6988_v11  ;;  %v9488_v11 = vld [vmem:[%s10525_s2 + $0x8] sm:$0xff] }
 0xb66   :  { %6993 = vmatprep.subr.bf16.mxu1 %v6992_v22  ;;  %v7004_v40 = vpack.c.bf16 %v7389_v21, %v7388_v26 }
 0xb67   :  { %v7392_v15 = vpop.permute.xlu1 %7391 }
 0xb68   :  { %v7394_v48 = vunpack.i.h.bf16 %v7392_v15  ;;  %v7393_v17 = vunpack.i.l.bf16 %v7392_v15 }
 0xb69   :  { %6995 = vmatpush3.bf16.msra.mxu1 %v6992_v22 }
 0xb6a   :  { %6997 = vmatprep.subr.bf16.mxu1 %v6996_v34  ;;  %v7008_v46 = vpack.c.bf16 %v7394_v48, %v7393_v17 }
 0xb6d   :  { %6999 = vmatpush3.bf16.msra.mxu1 %v6996_v34 }
 0xb6e   :  { %7001 = vmatprep.subr.bf16.mxu1 %v7000_v60 }
 0xb71   :  { %7003 = vmatpush3.bf16.msra.mxu1 %v7000_v60 }
 0xb72   :  { %7005 = vmatprep.subr.bf16.mxu1 %v7004_v40 }
 0xb75   :  { %7007 = vmatpush3.bf16.msra.mxu1 %v7004_v40 }
 0xb76   :  { %7009 = vmatprep.subr.bf16.mxu1 %v7008_v46 }
 0xb79   :  { %7011 = vmatpush3.bf16.msra.mxu1 %v7008_v46 }
 0xb9f   :  { %v9453_v12 = vpop.f32.mrb[48].mxu0 }
 0xba0   :  { %10620 = vst [vmem:[#allocation26_spill] sm:$0xff] %v9453_v12  ;;  %v9455_v38 = vpop.f32.mrb[49].mxu0 }
 0xba1   :  { %10621 = vst [vmem:[#allocation27_spill] sm:$0xff] %v9455_v38 }
 0xbd9   :  { %v9457_v14 = vpop.f32.mrb[50].mxu0 }
 0xbda   :  { %10622 = vst [vmem:[#allocation28_spill] sm:$0xff] %v9457_v14  ;;  %v9459_v49 = vpop.f32.mrb[51].mxu0 }
 0xbdb   :  { %10623 = vst [vmem:[#allocation29_spill] sm:$0xff] %v9459_v49 }
 0xbe0   :  { %v9461_v30 = vpop.f32.mrb[52].mxu0 }
 0xbe1   :  { %10624 = vst [vmem:[#allocation30_spill] sm:$0xff] %v9461_v30  ;;  %v9463_v41 = vpop.f32.mrb[53].mxu0 }
 0xbe2   :  { %10625 = vst [vmem:[#allocation31_spill] sm:$0xff] %v9463_v41  ;;  %v9630_v41 = vld [vmem:[%s10525_s2 + $0x78] sm:$0xff] }
 0xbe3   :  { %10643 = vst [vmem:[#allocation65_spill] sm:$0xff] %v9630_v41 }
 0xbe8   :  { %v9465_v6 = vpop.f32.mrb[54].mxu0 }
 0xbe9   :  { %10626 = vst [vmem:[#allocation32_spill] sm:$0xff] %v9465_v6  ;;  %v9467_v23 = vpop.f32.mrb[55].mxu0  ;;  %v9622_v6 = vld [vmem:[%s10525_s2 + $0x70] sm:$0xff] }
 0xbea   :  { %10627 = vst [vmem:[#allocation33_spill] sm:$0xff] %v9467_v23  ;;  %v9612_v23 = vld [vmem:[%s10525_s2 + $0x68] sm:$0xff]  ;;  %10642 = vst [vmem:[#allocation64_spill] sm:$0xff] %v9622_v6 }
 0xbeb   :  { %10641 = vst [vmem:[#allocation63_spill] sm:$0xff] %v9612_v23 }
 0xbf0   :  { %v9469_v28 = vpop.f32.mrb[56].mxu0 }
 0xbf1   :  { %10628 = vst [vmem:[#allocation34_spill] sm:$0xff] %v9469_v28  ;;  %v9471_v4 = vpop.f32.mrb[57].mxu0  ;;  %v9604_v28 = vld [vmem:[%s10525_s2 + $0x60] sm:$0xff] }
 0xbf2   :  { %10629 = vst [vmem:[#allocation35_spill] sm:$0xff] %v9471_v4  ;;  %v9594_v4 = vld [vmem:[%s10525_s2 + $0x58] sm:$0xff]  ;;  %10640 = vst [vmem:[#allocation62_spill] sm:$0xff] %v9604_v28 }
 0xbf3   :  { %10639 = vst [vmem:[#allocation61_spill] sm:$0xff] %v9594_v4 }
 0xc08   :  { %v9473_v20 = vpop.f32.mrb[58].mxu0 }
 0xc09   :  { %10630 = vst [vmem:[#allocation52_spill] sm:$0xff] %v9473_v20  ;;  %v9475_v58 = vpop.f32.mrb[59].mxu0  ;;  %v9586_v20 = vld [vmem:[%s10525_s2 + $0x50] sm:$0xff] }
 0xc0a   :  { %10631 = vst [vmem:[#allocation53_spill] sm:$0xff] %v9475_v58  ;;  %v9576_v58 = vld [vmem:[%s10525_s2 + $0x48] sm:$0xff]  ;;  %10638 = vst [vmem:[#allocation60_spill] sm:$0xff] %v9586_v20 }
 0xc0b   :  { %10637 = vst [vmem:[#allocation59_spill] sm:$0xff] %v9576_v58 }
 0xc0c   :  { %v9477_v52 = vpop.f32.mrb[60].mxu0 }
 0xc0d   :  { %10632 = vst [vmem:[#allocation54_spill] sm:$0xff] %v9477_v52  ;;  %v9479_v3 = vpop.f32.mrb[61].mxu0  ;;  %v9568_v52 = vld [vmem:[%s10525_s2 + $0x40] sm:$0xff] }
 0xc0e   :  { %10633 = vst [vmem:[#allocation55_spill] sm:$0xff] %v9479_v3  ;;  %v9558_v3 = vld [vmem:[%s10525_s2 + $0x38] sm:$0xff]  ;;  %10636 = vst [vmem:[#allocation58_spill] sm:$0xff] %v9568_v52 }
 0xc10   :  { %v9481_v37 = vpop.f32.mrb[62].mxu0 }
 0xc11   :  { %10634 = vst [vmem:[#allocation56_spill] sm:$0xff] %v9481_v37  ;;  %v9483_v63 = vpop.f32.mrb[63].mxu0 }
 0xc12   :  { %10635 = vst [vmem:[#allocation57_spill] sm:$0xff] %v9483_v63  ;;  %v9540_v63 = vld [vmem:[%s10525_s2 + $0x28] sm:$0xff] }
 0xc14   :  { %v6382_v25 = vpop.f32.mrb[64].mxu0 }
 0xc15   :  { %v9491_v16 = vadd.f32 %v9488_v11, %v6382_v25  ;;  %v2802_v33 = vpop.f32.mrb[65].mxu0 }
 0xc16   :  { %v9499_v22 = vadd.f32 %v9496_v59, %v2802_v33  ;;  %v9514_v33 = vld [vmem:[%s10525_s2 + $0x18] sm:$0xff] }
 0xc17   :  { %2883 = vmax.xlane.f32.xlu1 %v9491_v16 }
 0xc18   :  { %v6385_v42 = vpop.f32.mrb[66].mxu0  ;;  %2881 = vmax.xlane.f32.xlu0 %v9499_v22 }
 0xc19   :  { %v2812_v27 = vpop.f32.mrb[67].mxu0  ;;  %v9517_v13 = vadd.f32 %v9514_v33, %v6385_v42 }
 0xc1a   :  { %v9526_v1 = vadd.f32 %v9523_v19, %v2812_v27  ;;  %v9550_v27 = vld [vmem:[%s10525_s2 + $0x30] sm:$0xff]  ;;  %s7937_s2 = smov 104  }
 0xc1c   :  { %v6388_v51 = vpop.f32.mrb[68].mxu0 }
 0xc1d   :  { %v2822_v45 = vpop.f32.mrb[69].mxu0  ;;  %v9543_v37 = vadd.f32 %v9540_v63, %v6388_v51 }
 0xc1e   :  { %v9535_v42 = vadd.f32 %v9532_v62, %v2822_v45 }
 0xc20   :  { %v6391_v34 = vpop.f32.mrb[70].mxu0 }
 0xc21   :  { %v2832_v21 = vpop.f32.mrb[71].mxu0  ;;  %v9561_v51 = vadd.f32 %v9558_v3, %v6391_v34 }
 0xc22   :  { %v9553_v45 = vadd.f32 %v9550_v27, %v2832_v21 }
 0xc24   :  { %v6394_v26 = vpop.f32.mrb[72].mxu0 }
 0xc25   :  { %v2842_v60 = vpop.f32.mrb[73].mxu0  ;;  %v9579_v34 = vadd.f32 %v9576_v58, %v6394_v26 }
 0xc26   :  { %v9571_v21 = vadd.f32 %v9568_v52, %v2842_v60 }
 0xc28   :  { %7401 = vrot.lane.b32.xlu1 %v8673_v24, %s7936_s29  ;;  %v6397_v15 = vpop.f32.mrb[74].mxu0 }
 0xc29   :  { %v2852_v48 = vpop.f32.mrb[75].mxu0  ;;  %v9597_v26 = vadd.f32 %v9594_v4, %v6397_v15 }
 0xc2a   :  { %v9589_v60 = vadd.f32 %v9586_v20, %v2852_v48 }
 0xc2c   :  { %7406 = vrot.lane.b32.xlu1 %v8683_v44, %s7936_s29  ;;  %v6400_v17 = vpop.f32.mrb[76].mxu0 }
 0xc2d   :  { %v2862_v40 = vpop.f32.mrb[77].mxu0  ;;  %v9615_v15 = vadd.f32 %v9612_v23, %v6400_v17 }
 0xc2e   :  { %7396 = vrot.lane.b32.xlu0 %v8663_v54, %s7936_s29  ;;  %v9607_v48 = vadd.f32 %v9604_v28, %v2862_v40 }
 0xc30   :  { %7411 = vrot.lane.b32.xlu1 %v8693_v53, %s7936_s29  ;;  %v6403_v46 = vpop.f32.mrb[78].mxu0 }
 0xc31   :  { %v2872_v25 = vpop.f32.mrb[79].mxu0  ;;  %v9633_v17 = vadd.f32 %v9630_v41, %v6403_v46 }
 0xc32   :  { %v9625_v40 = vadd.f32 %v9622_v6, %v2872_v25 }
 0xc4d   :  { %2887 = vmax.xlane.f32.xlu0 %v9517_v13 }
 0xc51   :  { %2885 = vmax.xlane.f32.xlu0 %v9526_v1 }
 0xc54   :  { %2889 = vmax.xlane.f32.xlu1 %v9535_v42 }
 0xc55   :  { %2891 = vmax.xlane.f32.xlu0 %v9543_v37 }
 0xc58   :  { %2893 = vmax.xlane.f32.xlu1 %v9553_v45 }
 0xc59   :  { %2895 = vmax.xlane.f32.xlu0 %v9561_v51 }
 0xc5c   :  { %2897 = vmax.xlane.f32.xlu1 %v9571_v21 }
 0xc5d   :  { %2899 = vmax.xlane.f32.xlu0 %v9579_v34 }
 0xc60   :  { %2901 = vmax.xlane.f32.xlu1 %v9589_v60 }
 0xc61   :  { %2903 = vmax.xlane.f32.xlu0 %v9597_v26 }
 0xc64   :  { %2905 = vmax.xlane.f32.xlu1 %v9607_v48 }
 0xc65   :  { %2907 = vmax.xlane.f32.xlu0 %v9615_v15 }
 0xc68   :  { %2909 = vmax.xlane.f32.xlu1 %v9625_v40 }
 0xc69   :  { %2911 = vmax.xlane.f32.xlu0 %v9633_v17 }
 0xc79   :  { %7421 = vrot.lane.b32.xlu1 %v8713_v8, %s7936_s29 }
 0xc7d   :  { %7426 = vrot.lane.b32.xlu1 %v8723_v0, %s7936_s29 }
 0xca4   :  { %v2884_v25 = vpop.xlane.xlu1 %2883 }
 0xca5   :  { %v2914_v30 = vsub.f32 %v9491_v16, %v2884_v25  ;;  %v2882_v14 = vpop.xlane.xlu0 %2881 }
 0xca6   :  { %v2913_v49 = vsub.f32 %v9499_v22, %v2882_v14 }
 0xca7   :  { %v2931_v12 = vmul.f32 1.442695, %v2914_v30 }
 0xca8   :  { %v2929_v38 = vmul.f32 1.442695, %v2913_v49 }
 0xca9   :  { %7699 = vpow2.f32 %v2931_v12  ;;  %v7397_v46 = vpop.permute.xlu0 %7396  ;;  %v9656_v12 = vpop.permute.xlu1 %7401 }
 0xcaa   :  { %7701 = vpow2.f32 %v2929_v38  ;;  %v7399_v41 = vunpack.i.h.bf16 %v7397_v46  ;;  %v7398_v6 = vunpack.i.l.bf16 %v7397_v46 }
 0xcac   :  { %v9643_v23 = vpack.c.bf16 %v7399_v41, %v7398_v6 }
 0xcad   :  { %v9658_v38 = vpop.permute.xlu1 %7406 }
 0xcae   :  { %7014 = vmatprep.subr.msk.bf16.mxu1 %vm8755_vm4, %v9643_v23 }
 0xcb1   :  { %v9661_v30 = vpop.permute.xlu1 %7411 }
 0xcb3   :  { %v9648_v0 = vpop.eup %7699 }
 0xcb4   :  { %v9650_v8 = vpop.eup %7701  ;;  %2963 = vadd.xlane.f32.xlu0 %v9648_v0 }
 0xcb5   :  { %2961 = vadd.xlane.f32.xlu1 %v9650_v8 }
 0xcca   :  { %7416 = vrot.lane.b32.xlu0 %v8703_v57, %s7936_s29 }
 0xcda   :  { %v2888_v14 = vpop.xlane.xlu0 %2887 }
 0xcdb   :  { %v2916_v49 = vsub.f32 %v9517_v13, %v2888_v14 }
 0xcdd   :  { %v2935_v41 = vmul.f32 1.442695, %v2916_v49 }
 0xcde   :  { %v2886_v6 = vpop.xlane.xlu0 %2885 }
 0xcdf   :  { %7703 = vpow2.f32 %v2935_v41  ;;  %v2915_v16 = vsub.f32 %v9526_v1, %v2886_v6 }
 0xce1   :  { %v2933_v22 = vmul.f32 1.442695, %v2915_v16  ;;  %v2890_v25 = vpop.xlane.xlu1 %2889 }
 0xce2   :  { %v2892_v46 = vpop.xlane.xlu0 %2891  ;;  %v2917_v28 = vsub.f32 %v9535_v42, %v2890_v25 }
 0xce3   :  { %7705 = vpow2.f32 %v2933_v22  ;;  %v2918_v4 = vsub.f32 %v9543_v37, %v2892_v46 }
 0xce4   :  { %v2937_v52 = vmul.f32 1.442695, %v2917_v28 }
 0xce5   :  { %v2939_v20 = vmul.f32 1.442695, %v2918_v4  ;;  %v2894_v14 = vpop.xlane.xlu1 %2893 }
 0xce6   :  { %v2896_v58 = vpop.xlane.xlu0 %2895  ;;  %v2919_v1 = vsub.f32 %v9553_v45, %v2894_v14 }
 0xce7   :  { %7707 = vpow2.f32 %v2939_v20  ;;  %v2920_v13 = vsub.f32 %v9561_v51, %v2896_v58 }
 0xce8   :  { %7709 = vpow2.f32 %v2937_v52  ;;  %v2941_v4 = vmul.f32 1.442695, %v2919_v1 }
 0xce9   :  { %v9667_v49 = vpop.eup %7703  ;;  %v2943_v41 = vmul.f32 1.442695, %v2920_v13  ;;  %v2898_v42 = vpop.xlane.xlu1 %2897 }
 0xcea   :  { %2967 = vadd.xlane.f32.xlu1 %v9667_v49  ;;  %v2900_v6 = vpop.xlane.xlu0 %2899  ;;  %v2921_v52 = vsub.f32 %v9571_v21, %v2898_v42 }
 0xceb   :  { %7711 = vpow2.f32 %v2943_v41  ;;  %v2922_v28 = vsub.f32 %v9579_v34, %v2900_v6 }
 0xcec   :  { %7713 = vpow2.f32 %v2941_v4  ;;  %v2945_v22 = vmul.f32 1.442695, %v2921_v52 }
 0xced   :  { %v9671_v16 = vpop.eup %7705  ;;  %v2947_v37 = vmul.f32 1.442695, %v2922_v28  ;;  %v2902_v45 = vpop.xlane.xlu1 %2901 }
 0xcee   :  { %2965 = vadd.xlane.f32.xlu0 %v9671_v16  ;;  %v2904_v58 = vpop.xlane.xlu0 %2903  ;;  %v2923_v25 = vsub.f32 %v9589_v60, %v2902_v45 }
 0xcef   :  { %7715 = vpow2.f32 %v2947_v37 }
 0xcf0   :  { %7717 = vpow2.f32 %v2945_v22  ;;  %v2949_v14 = vmul.f32 1.442695, %v2923_v25 }
 0xcf1   :  { %v9675_v20 = vpop.eup %7707  ;;  %v2906_v13 = vpop.xlane.xlu1 %2905 }
 0xcf2   :  { %2971 = vadd.xlane.f32.xlu0 %v9675_v20  ;;  %v9679_v51 = vpop.eup %7709  ;;  %v2908_v46 = vpop.xlane.xlu0 %2907  ;;  %7719 = vpow2.f32 %v2949_v14  ;;  %v2925_v60 = vsub.f32 %v9607_v48, %v2906_v13  ;;  %v2924_v48 = vsub.f32 %v9597_v26, %v2904_v58 }
 0xcf3   :  { %v2926_v21 = vsub.f32 %v9615_v15, %v2908_v46 }
 0xcf4   :  { %v2953_v4 = vmul.f32 1.442695, %v2925_v60  ;;  %v2951_v25 = vmul.f32 1.442695, %v2924_v48 }
 0xcf5   :  { %v9683_v34 = vpop.eup %7711  ;;  %v2955_v41 = vmul.f32 1.442695, %v2926_v21  ;;  %v2910_v6 = vpop.xlane.xlu1 %2909 }
 0xcf6   :  { %2969 = vadd.xlane.f32.xlu0 %v9679_v51  ;;  %v9689_v1 = vpop.eup %7713  ;;  %v2927_v15 = vsub.f32 %v9625_v40, %v2910_v6  ;;  %v2912_v22 = vpop.xlane.xlu0 %2911 }
 0xcf7   :  { %7721 = vpow2.f32 %v2955_v41  ;;  %v2928_v40 = vsub.f32 %v9633_v17, %v2912_v22 }
 0xcf8   :  { %7723 = vpow2.f32 %v2953_v4  ;;  %v2957_v52 = vmul.f32 1.442695, %v2927_v15 }
 0xcf9   :  { %v9693_v42 = vpop.eup %7715  ;;  %v2959_v13 = vmul.f32 1.442695, %v2928_v40  ;;  %v7422_v17 = vpop.permute.xlu1 %7421 }
 0xcfa   :  { %2975 = vadd.xlane.f32.xlu0 %v9683_v34  ;;  %v9697_v28 = vpop.eup %7717  ;;  %7725 = vpow2.f32 %v2957_v52 }
 0xcfb   :  { %7431 = vrot.lane.b32.xlu1 %v8733_v5, %s7936_s29  ;;  %7727 = vpow2.f32 %v2951_v25  ;;  %s7938_s29 = smov 40  }
 0xcfc   :  { %v9700_v37 = vpop.eup %7719  ;;  %7729 = vpow2.f32 %v2959_v13 }
 0xcfe   :  { %2973 = vadd.xlane.f32.xlu0 %v9689_v1 }
 0xd01   :  { %v9704_v45 = vpop.eup %7721 }
 0xd02   :  { %2979 = vadd.xlane.f32.xlu0 %v9693_v42  ;;  %v9708_v46 = vpop.eup %7723 }
 0xd04   :  { %v9711_v14 = vpop.eup %7725 }
 0xd05   :  { %v9714_v26 = vpop.eup %7727 }
 0xd06   :  { %2977 = vadd.xlane.f32.xlu0 %v9697_v28  ;;  %v9717_v58 = vpop.eup %7729 }
 0xd0a   :  { %2981 = vadd.xlane.f32.xlu0 %v9700_v37 }
 0xd0e   :  { %2987 = vadd.xlane.f32.xlu0 %v9704_v45 }
 0xd12   :  { %2985 = vadd.xlane.f32.xlu0 %v9708_v46 }
 0xd16   :  { %2989 = vadd.xlane.f32.xlu0 %v9711_v14 }
 0xd1f   :  { %2983 = vadd.xlane.f32.xlu1 %v9714_v26 }
 0xd23   :  { %2991 = vadd.xlane.f32.xlu1 %v9717_v58 }
 0xd2c   :  { %3218 = vrot.lane.b32.xlu0 %v8657_v31, %s7937_s2  ;;  %v7427_v31 = vpop.permute.xlu1 %7426 }
 0xd30   :  { %3230 = vrot.lane.b32.xlu0 %v8687_v32, %s7937_s2 }
 0xd34   :  { %3234 = vrot.lane.b32.xlu0 %v8697_v2, %s7937_s2  ;;  %3220 = vrot.lane.b32.xlu1 %v8655_v50, %s7937_s2  ;;  %v7403_v2 = vunpack.i.l.bf16 %v9656_v12 }
 0xd38   :  { %3238 = vrot.lane.b32.xlu0 %v8707_v36, %s7937_s2  ;;  %3222 = vrot.lane.b32.xlu1 %v8667_v10, %s7937_s2 }
 0xd3c   :  { %3242 = vrot.lane.b32.xlu0 %v8717_v9, %s7937_s2  ;;  %3224 = vrot.lane.b32.xlu1 %v8665_v56, %s7937_s2 }
 0xd40   :  { %3246 = vrot.lane.b32.xlu0 %v8727_v29, %s7937_s2  ;;  %3226 = vrot.lane.b32.xlu1 %v8677_v35, %s7937_s2  ;;  %v7404_v35 = vunpack.i.h.bf16 %v9656_v12  ;;  %v7423_v29 = vunpack.i.l.bf16 %v7422_v17  ;;  %v7429_v12 = vunpack.i.h.bf16 %v7427_v31 }
 0xd41   :  { %v2964_v50 = vpop.xlane.xlu0 %2963 }
 0xd42   :  { %7731 = vrcp.f32 %v2964_v50  ;;  %v2962_v32 = vpop.xlane.xlu1 %2961 }
 0xd43   :  { %7733 = vrcp.f32 %v2962_v32 }
 0xd44   :  { %7441 = vrot.lane.b32.xlu0 %v8673_v24, %s7938_s29  ;;  %3228 = vrot.lane.b32.xlu1 %v8675_v39, %s7937_s2  ;;  %v7018_v39 = vpack.c.bf16 %v7404_v35, %v7403_v2 }
 0xd45   :  { %v7417_v9 = vpop.permute.xlu0 %7416 }
 0xd48   :  { %7451 = vrot.lane.b32.xlu0 %v8693_v53, %s7938_s29  ;;  %3232 = vrot.lane.b32.xlu1 %v8685_v47, %s7937_s2  ;;  %v7409_v47 = vunpack.i.h.bf16 %v9658_v38  ;;  %v7408_v53 = vunpack.i.l.bf16 %v9658_v38 }
 0xd4c   :  { %v7732_v56 = vpop.eup %7731  ;;  %3236 = vrot.lane.b32.xlu1 %v8695_v43, %s7937_s2  ;;  %v7024_v43 = vpack.c.bf16 %v7409_v47, %v7408_v53 }
 0xd4d   :  { %v7734_v10 = vpop.eup %7733  ;;  %v3010_v36 = vmul.f32 %v7732_v56, %v9648_v0  ;;  %v7419_v0 = vunpack.i.h.bf16 %v7417_v9 }
 0xd4e   :  { %v3009_v24 = vmul.f32 %v7734_v10, %v9650_v8  ;;  %v7413_v8 = vunpack.i.l.bf16 %v9661_v30 }
 0xd50   :  { %6436 = vmatprep.mubr.f32.mxu1 %v3009_v24  ;;  %3240 = vrot.lane.b32.xlu1 %v8705_v61, %s7937_s2  ;;  %v7414_v61 = vunpack.i.h.bf16 %v9661_v30 }
 0xd51   :  { %6437 = vmatmul.mubr.f32.vlgmr.msra.gmra.mrb[64].mxu1 %v3010_v36 }
 0xd52   :  { %7017 = vmatpush3.bf16.xpose.msk.msra.mxu1 %vm8755_vm4, %v9643_v23 }
 0xd53   :  { %7020 = vmatprep.subr.msk.bf16.mxu1 %vm8755_vm4, %v7018_v39 }
 0xd54   :  { %3244 = vrot.lane.b32.xlu1 %v8715_v55, %s7937_s2  ;;  %v7030_v55 = vpack.c.bf16 %v7414_v61, %v7413_v8 }
 0xd58   :  { %3248 = vrot.lane.b32.xlu1 %v8725_v7, %s7937_s2 }
 0xd5a   :  { %7023 = vmatpush3.bf16.xpose.msk.msra.mxu1 %vm8755_vm4, %v7018_v39 }
 0xd5b   :  { %7026 = vmatprep.subr.msk.bf16.mxu1 %vm8755_vm4, %v7024_v43 }
 0xd5c   :  { %7436 = vrot.lane.b32.xlu1 %v8663_v54, %s7938_s29  ;;  %v7418_v54 = vunpack.i.l.bf16 %v7417_v9 }
 0xd5e   :  { %v7036_v7 = vpack.c.bf16 %v7419_v0, %v7418_v54 }
 0xd60   :  { %7446 = vrot.lane.b32.xlu1 %v8683_v44, %s7938_s29  ;;  %v7424_v44 = vunpack.i.h.bf16 %v7422_v17 }
 0xd62   :  { %7029 = vmatpush3.bf16.xpose.msk.msra.mxu1 %vm8755_vm4, %v7024_v43  ;;  %v7042_v23 = vpack.c.bf16 %v7424_v44, %v7423_v29 }
 0xd63   :  { %7032 = vmatprep.subr.msk.bf16.mxu1 %vm8755_vm4, %v7030_v55 }
 0xd64   :  { %7456 = vrot.lane.b32.xlu1 %v8703_v57, %s7938_s29  ;;  %v7428_v57 = vunpack.i.l.bf16 %v7427_v31 }
 0xd66   :  { %v7048_v30 = vpack.c.bf16 %v7429_v12, %v7428_v57 }
 0xd6a   :  { %7035 = vmatpush3.bf16.xpose.msk.msra.mxu1 %vm8755_vm4, %v7030_v55 }
 0xd6b   :  { %7038 = vmatprep.subr.msk.bf16.mxu1 %vm8755_vm4, %v7036_v7 }
 0xd72   :  { %7041 = vmatpush3.bf16.xpose.msk.msra.mxu1 %vm8755_vm4, %v7036_v7 }
 0xd73   :  { %7044 = vmatprep.subr.msk.bf16.mxu1 %vm8755_vm4, %v7042_v23 }
 0xd77   :  { %v2968_v38 = vpop.xlane.xlu1 %2967 }
 0xd78   :  { %7735 = vrcp.f32 %v2968_v38 }
 0xd7a   :  { %7047 = vmatpush3.bf16.xpose.msk.msra.mxu1 %vm8755_vm4, %v7042_v23 }
 0xd7b   :  { %7050 = vmatprep.subr.msk.bf16.mxu1 %vm8755_vm4, %v7048_v30  ;;  %v7432_v21 = vpop.permute.xlu1 %7431  ;;  %v2966_v60 = vpop.xlane.xlu0 %2965 }
 0xd7c   :  { %7737 = vrcp.f32 %v2966_v60  ;;  %v7434_v41 = vunpack.i.h.bf16 %v7432_v21  ;;  %v7433_v6 = vunpack.i.l.bf16 %v7432_v21 }
 0xd7e   :  { %v7054_v15 = vpack.c.bf16 %v7434_v41, %v7433_v6 }
 0xd7f   :  { %v2972_v4 = vpop.xlane.xlu0 %2971 }
 0xd80   :  { %7739 = vrcp.f32 %v2972_v4 }
 0xd82   :  { %7053 = vmatpush3.bf16.xpose.msk.msra.mxu1 %vm8755_vm4, %v7048_v30  ;;  %v7736_v48 = vpop.eup %7735 }
 0xd83   :  { %7056 = vmatprep.subr.msk.bf16.mxu1 %vm8755_vm4, %v7054_v15  ;;  %v2970_v52 = vpop.xlane.xlu0 %2969  ;;  %v3012_v13 = vmul.f32 %v7736_v48, %v9667_v49 }
 0xd84   :  { %7741 = vrcp.f32 %v2970_v52 }
 0xd86   :  { %v7738_v22 = vpop.eup %7737 }
 0xd87   :  { %v2976_v25 = vpop.xlane.xlu0 %2975  ;;  %v3011_v40 = vmul.f32 %v7738_v22, %v9671_v16 }
 0xd88   :  { %7743 = vrcp.f32 %v2976_v25 }
 0xd89   :  { %6439 = vmatprep.mubr.f32.mxu1 %v3011_v40 }
 0xd8a   :  { %7059 = vmatpush3.bf16.xpose.msk.msra.mxu1 %vm8755_vm4, %v7054_v15  ;;  %v7740_v31 = vpop.eup %7739 }
 0xd8b   :  { %6440 = vmatmul.mubr.f32.gmra.mrb[66].mxu1 %v3012_v13  ;;  %v2974_v17 = vpop.xlane.xlu0 %2973  ;;  %v3014_v10 = vmul.f32 %v7740_v31, %v9675_v20 }
 0xd8c   :  { %7745 = vrcp.f32 %v2974_v17 }
 0xd8e   :  { %v7742_v50 = vpop.eup %7741 }
 0xd8f   :  { %v2980_v32 = vpop.xlane.xlu0 %2979  ;;  %v3013_v56 = vmul.f32 %v7742_v50, %v9679_v51 }
 0xd90   :  { %7747 = vrcp.f32 %v2980_v32 }
 0xd91   :  { %6442 = vmatprep.mubr.f32.mxu1 %v3013_v56 }
 0xd92   :  { %6443 = vmatmul.mubr.f32.gmra.mrb[68].mxu1 %v3014_v10  ;;  %v7744_v49 = vpop.eup %7743 }
 0xd93   :  { %v2978_v16 = vpop.xlane.xlu0 %2977  ;;  %v3016_v24 = vmul.f32 %v7744_v49, %v9683_v34 }
 0xd94   :  { %7749 = vrcp.f32 %v2978_v16 }
 0xd96   :  { %v7746_v35 = vpop.eup %7745 }
 0xd97   :  { %v2982_v18 = vpop.xlane.xlu0 %2981  ;;  %v3015_v2 = vmul.f32 %v7746_v35, %v9689_v1 }
 0xd98   :  { %7751 = vrcp.f32 %v2982_v18 }
 0xd99   :  { %6445 = vmatprep.mubr.f32.mxu1 %v3015_v2 }
 0xd9a   :  { %6446 = vmatmul.mubr.f32.gmra.mrb[70].mxu1 %v3016_v24  ;;  %v7748_v36 = vpop.eup %7747 }
 0xd9b   :  { %v3018_v20 = vmul.f32 %v7748_v36, %v9693_v42  ;;  %v2988_v47 = vpop.xlane.xlu0 %2987 }
 0xd9e   :  { %v7750_v39 = vpop.eup %7749 }
 0xd9f   :  { %v3017_v51 = vmul.f32 %v7750_v39, %v9697_v28  ;;  %v2986_v61 = vpop.xlane.xlu0 %2985 }
 0xda0   :  { %7753 = vrcp.f32 %v2986_v61 }
 0xda1   :  { %6448 = vmatprep.mubr.f32.mxu1 %v3017_v51 }
 0xda2   :  { %v7752_v53 = vpop.eup %7751  ;;  %6449 = vmatmul.mubr.f32.gmra.mrb[72].mxu1 %v3018_v20 }
 0xda3   :  { %v3019_v43 = vmul.f32 %v7752_v53, %v9700_v37  ;;  %v2990_v8 = vpop.xlane.xlu0 %2989 }
 0xda5   :  { %6451 = vmatprep.mubr.f32.mxu1 %v3019_v43 }
 0xda7   :  { %v3219_v9 = vpop.permute.xlu0 %3218 }
 0xdaa   :  { %v7754_v28 = vpop.eup %7753 }
 0xdab   :  { %v3021_v37 = vmul.f32 %v7754_v28, %v9708_v46  ;;  %v3231_v29 = vpop.permute.xlu0 %3230 }
 0xdac   :  { %v2984_v1 = vpop.xlane.xlu1 %2983 }
 0xdad   :  { %7755 = vrcp.f32 %v2984_v1 }
 0xdae   :  { %7757 = vrcp.f32 %v2988_v47 }
 0xdaf   :  { %7759 = vrcp.f32 %v2990_v8  ;;  %v3235_v60 = vpop.permute.xlu0 %3234 }
 0xdb0   :  { %v2992_v34 = vpop.xlane.xlu1 %2991 }
 0xdb1   :  { %7761 = vrcp.f32 %v2992_v34 }
 0xdb4   :  { %v3221_v55 = vpop.permute.xlu1 %3220 }
 0xdb7   :  { %v7756_v42 = vpop.eup %7755 }
 0xdb8   :  { %v3223_v0 = vpop.permute.xlu1 %3222  ;;  %v3020_v54 = vmul.f32 %v7756_v42, %v9714_v26  ;;  %v7758_v7 = vpop.eup %7757 }
 0xdb9   :  { %v7760_v44 = vpop.eup %7759  ;;  %v3022_v12 = vmul.f32 %v7758_v7, %v9704_v45  ;;  %v3239_v26 = vpop.permute.xlu0 %3238 }
 0xdba   :  { %6452 = vmatmul.mubr.f32.gmra.mrb[74].mxu1 %v3020_v54  ;;  %v3023_v38 = vmul.f32 %v7760_v44, %v9711_v14 }
 0xdbb   :  { %6454 = vmatprep.mubr.f32.mxu1 %v3021_v37  ;;  %v7762_v57 = vpop.eup %7761 }
 0xdbc   :  { %v3225_v23 = vpop.permute.xlu1 %3224  ;;  %v3024_v21 = vmul.f32 %v7762_v57, %v9717_v58 }
 0xdbd   :  { %v3243_v14 = vpop.permute.xlu0 %3242 }
 0xdbe   :  { %6455 = vmatmul.mubr.f32.gmra.mrb[76].mxu1 %v3022_v12 }
 0xdbf   :  { %6457 = vmatprep.mubr.f32.mxu1 %v3023_v38 }
 0xdc0   :  { %v3227_v30 = vpop.permute.xlu1 %3226 }
 0xdc1   :  { %v3247_v6 = vpop.permute.xlu0 %3246 }
 0xdc2   :  { %6458 = vmatmul.mubr.f32.gmra.mrb[78].mxu1 %v3024_v21 }
 0xdc3   :  { %6492 = vmatprep.mubr.msk.f32.mxu1 %vm1451_vm3, %v3219_v9 }
 0xdc4   :  { %v3229_v46 = vpop.permute.xlu1 %3228 }
 0xdc5   :  { %v7442_v52 = vpop.permute.xlu0 %7441 }
 0xdc6   :  { %6493 = vmatmul.mubr.msk.f32.vlgmr.msra.gmra.mrb[80].mxu1 %vm1451_vm3, %v3221_v55  ;;  %v7444_v22 = vunpack.i.h.bf16 %v7442_v52  ;;  %v7443_v25 = vunpack.i.l.bf16 %v7442_v52 }
 0xdc7   :  { %6495 = vmatprep.mubr.msk.f32.mxu1 %vm1451_vm3, %v3223_v0 }
 0xdc8   :  { %v3233_v41 = vpop.permute.xlu1 %3232  ;;  %v7064_v56 = vpack.c.bf16 %v7444_v22, %v7443_v25  ;;  %v10648_v25 = vld [vmem:[#allocation62_spill] sm:$0xff] }
 0xdc9   :  { %v7452_v10 = vpop.permute.xlu0 %7451 }
 0xdca   :  { %6496 = vmatmul.mubr.msk.f32.gmra.mrb[82].mxu1 %vm1451_vm3, %v3225_v23  ;;  %v7454_v16 = vunpack.i.h.bf16 %v7452_v10  ;;  %v7453_v49 = vunpack.i.l.bf16 %v7452_v10  ;;  %v10651_v10 = vld [vmem:[#allocation65_spill] sm:$0xff] }
 0xdcb   :  { %6498 = vmatprep.mubr.msk.f32.mxu1 %vm1451_vm3, %v3227_v30 }
 0xdcc   :  { %v3237_v45 = vpop.permute.xlu1 %3236  ;;  %v7072_v36 = vpack.c.bf16 %v7454_v16, %v7453_v49  ;;  %v10652_v49 = vld [vmem:[#allocation24_spill] sm:$0xff] }
 0xdce   :  { %6499 = vmatmul.mubr.msk.f32.gmra.mrb[84].mxu1 %vm1451_vm3, %v3229_v46 }
 0xdcf   :  { %6501 = vmatprep.mubr.msk.f32.mxu1 %vm1451_vm3, %v3231_v29 }
 0xdd0   :  { %v3241_v58 = vpop.permute.xlu1 %3240 }
 0xdd2   :  { %6502 = vmatmul.mubr.msk.f32.gmra.mrb[86].mxu1 %vm1451_vm3, %v3233_v41 }
 0xdd3   :  { %6504 = vmatprep.mubr.msk.f32.mxu1 %vm1451_vm3, %v3235_v60 }
 0xdd4   :  { %v3245_v4 = vpop.permute.xlu1 %3244 }
 0xdd6   :  { %6505 = vmatmul.mubr.msk.f32.gmra.mrb[88].mxu1 %vm1451_vm3, %v3237_v45 }
 0xdd7   :  { %6507 = vmatprep.mubr.msk.f32.mxu1 %vm1451_vm3, %v3239_v26 }
 0xdd8   :  { %v3249_v15 = vpop.permute.xlu1 %3248 }
 0xdda   :  { %6508 = vmatmul.mubr.msk.f32.gmra.mrb[90].mxu1 %vm1451_vm3, %v3241_v58  ;;  %v10644_v58 = vld [vmem:[#allocation58_spill] sm:$0xff] }
 0xddb   :  { %6510 = vmatprep.mubr.msk.f32.mxu1 %vm1451_vm3, %v3243_v14 }
 0xddc   :  { %v7437_v48 = vpop.permute.xlu1 %7436 }
 0xddd   :  { %v7439_v40 = vunpack.i.h.bf16 %v7437_v48  ;;  %v7438_v13 = vunpack.i.l.bf16 %v7437_v48  ;;  %v10647_v48 = vld [vmem:[#allocation61_spill] sm:$0xff] }
 0xdde   :  { %6511 = vmatmul.mubr.msk.f32.gmra.mrb[92].mxu1 %vm1451_vm3, %v3245_v4  ;;  %v10645_v4 = vld [vmem:[#allocation59_spill] sm:$0xff] }
 0xddf   :  { %6513 = vmatprep.mubr.msk.f32.mxu1 %vm1451_vm3, %v3247_v6  ;;  %v7060_v17 = vpack.c.bf16 %v7439_v40, %v7438_v13 }
 0xde0   :  { %v7447_v31 = vpop.permute.xlu1 %7446 }
 0xde1   :  { %v7449_v50 = vunpack.i.h.bf16 %v7447_v31  ;;  %v7448_v32 = vunpack.i.l.bf16 %v7447_v31  ;;  %7061 = vmatprep.subr.bf16.mxu0 %v7060_v17  ;;  %v10649_v31 = vld [vmem:[#allocation63_spill] sm:$0xff] }
 0xde2   :  { %6514 = vmatmul.mubr.msk.f32.gmra.mrb[94].mxu1 %vm1451_vm3, %v3249_v15  ;;  %7063 = vmatpush3.bf16.msra.mxu0 %v7060_v17 }
 0xde3   :  { %7065 = vmatprep.subr.bf16.mxu0 %v7064_v56  ;;  %v7068_v35 = vpack.c.bf16 %v7449_v50, %v7448_v32  ;;  %v10650_v32 = vld [vmem:[#allocation64_spill] sm:$0xff] }
 0xde4   :  { %v7457_v18 = vpop.permute.xlu1 %7456 }
 0xde5   :  { %v7459_v2 = vunpack.i.h.bf16 %v7457_v18  ;;  %v7458_v24 = vunpack.i.l.bf16 %v7457_v18 }
 0xde6   :  { %7067 = vmatpush3.bf16.msra.mxu0 %v7064_v56 }
 0xde7   :  { %7069 = vmatprep.subr.bf16.mxu0 %v7068_v35  ;;  %v7076_v39 = vpack.c.bf16 %v7459_v2, %v7458_v24 }
 0xdea   :  { %7071 = vmatpush3.bf16.msra.mxu0 %v7068_v35  ;;  %v10653_v35 = vld [vmem:[#allocation25_spill] sm:$0xff] }
 0xdeb   :  { %7073 = vmatprep.subr.bf16.mxu0 %v7072_v36 }
 0xdee   :  { %7075 = vmatpush3.bf16.msra.mxu0 %v7072_v36 }
 0xdef   :  { %7077 = vmatprep.subr.bf16.mxu0 %v7076_v39 }
 0xdf2   :  { %7079 = vmatpush3.bf16.msra.mxu0 %v7076_v39 }
 0xe24   :  { %v9831_v51 = vpop.f32.mrb[64].mxu1 }
 0xe25   :  { %v9833_v20 = vpop.f32.mrb[65].mxu1 }
 0xe5e   :  { %v9835_v47 = vpop.f32.mrb[66].mxu1 }
 0xe5f   :  { %v9837_v53 = vpop.f32.mrb[67].mxu1 }
 0xe65   :  { %v9839_v43 = vpop.f32.mrb[68].mxu1 }
 0xe66   :  { %v9841_v61 = vpop.f32.mrb[69].mxu1 }
 0xe6d   :  { %v9843_v1 = vpop.f32.mrb[70].mxu1 }
 0xe6e   :  { %v9845_v8 = vpop.f32.mrb[71].mxu1 }
 0xe75   :  { %v9847_v34 = vpop.f32.mrb[72].mxu1 }
 0xe76   :  { %v9849_v55 = vpop.f32.mrb[73].mxu1 }
 0xe8d   :  { %v9851_v28 = vpop.f32.mrb[74].mxu1 }
 0xe8e   :  { %v9853_v9 = vpop.f32.mrb[75].mxu1 }
 0xe91   :  { %v9855_v42 = vpop.f32.mrb[76].mxu1 }
 0xe92   :  { %v9857_v0 = vpop.f32.mrb[77].mxu1 }
 0xe95   :  { %v9859_v54 = vpop.f32.mrb[78].mxu1 }
 0xe96   :  { %v9861_v7 = vpop.f32.mrb[79].mxu1 }
 0xe99   :  { %v6494_v37 = vpop.f32.mrb[80].mxu1 }
 0xe9a   :  { %v3418_v44 = vadd.f32 %v9488_v11, %v6494_v37  ;;  %v3412_v29 = vpop.f32.mrb[81].mxu1 }
 0xe9b   :  { %v3413_v23 = vadd.f32 %v9496_v59, %v3412_v29 }
 0xe9c   :  { %3493 = vmax.xlane.f32.xlu1 %v3418_v44 }
 0xe9d   :  { %v6497_v12 = vpop.f32.mrb[82].mxu1  ;;  %3491 = vmax.xlane.f32.xlu0 %v3413_v23 }
 0xe9e   :  { %v3428_v57 = vadd.f32 %v9514_v33, %v6497_v12  ;;  %v3422_v38 = vpop.f32.mrb[83].mxu1 }
 0xe9f   :  { %v3423_v60 = vadd.f32 %v9523_v19, %v3422_v38 }
 0xea1   :  { %v6500_v30 = vpop.f32.mrb[84].mxu1  ;;  %3497 = vmax.xlane.f32.xlu0 %v3428_v57 }
 0xea2   :  { %v3432_v21 = vpop.f32.mrb[85].mxu1  ;;  %v3438_v41 = vadd.f32 %v9540_v63, %v6500_v30 }
 0xea3   :  { %v3433_v46 = vadd.f32 %v9532_v62, %v3432_v21 }
 0xea5   :  { %v6503_v26 = vpop.f32.mrb[86].mxu1  ;;  %3499 = vmax.xlane.f32.xlu1 %v3433_v46  ;;  %3495 = vmax.xlane.f32.xlu0 %v3423_v60 }
 0xea6   :  { %v3442_v11 = vpop.f32.mrb[87].mxu1  ;;  %v3448_v14 = vadd.f32 %v9558_v3, %v6503_v26 }
 0xea7   :  { %v9870_v59 = vadd.f32 %v9550_v27, %v3442_v11  ;;  %v10646_v27 = vld [vmem:[#allocation60_spill] sm:$0xff] }
 0xea9   :  { %v6506_v45 = vpop.f32.mrb[88].mxu1  ;;  %3503 = vmax.xlane.f32.xlu1 %v9870_v59  ;;  %3501 = vmax.xlane.f32.xlu0 %v3438_v41 }
 0xeaa   :  { %v3452_v33 = vpop.f32.mrb[89].mxu1  ;;  %v9879_v63 = vadd.f32 %v10645_v4, %v6506_v45 }
 0xeab   :  { %v9875_v19 = vadd.f32 %v10644_v58, %v3452_v33 }
 0xead   :  { %v6509_v62 = vpop.f32.mrb[90].mxu1  ;;  %3507 = vmax.xlane.f32.xlu1 %v9875_v19  ;;  %3505 = vmax.xlane.f32.xlu0 %v3448_v14 }
 0xeae   :  { %v3462_v6 = vpop.f32.mrb[91].mxu1  ;;  %v9887_v22 = vadd.f32 %v10647_v48, %v6509_v62 }
 0xeaf   :  { %v9882_v15 = vadd.f32 %v10646_v27, %v3462_v6 }
 0xeb1   :  { %v6512_v52 = vpop.f32.mrb[92].mxu1  ;;  %3511 = vmax.xlane.f32.xlu1 %v9882_v15  ;;  %3509 = vmax.xlane.f32.xlu0 %v9879_v63 }
 0xeb2   :  { %v3472_v3 = vpop.f32.mrb[93].mxu1  ;;  %v9895_v50 = vadd.f32 %v10649_v31, %v6512_v52 }
 0xeb3   :  { %v9890_v40 = vadd.f32 %v10648_v25, %v3472_v3 }
 0xeb5   :  { %v6515_v13 = vpop.f32.mrb[94].mxu1  ;;  %3515 = vmax.xlane.f32.xlu1 %v9890_v40  ;;  %3513 = vmax.xlane.f32.xlu0 %v9887_v22 }
 0xeb6   :  { %v3482_v17 = vpop.f32.mrb[95].mxu1  ;;  %v9903_v16 = vadd.f32 %v10651_v10, %v6515_v13 }
 0xeb7   :  { %v9898_v56 = vadd.f32 %v10650_v32, %v3482_v17 }
 0xeb9   :  { %3519 = vmax.xlane.f32.xlu1 %v9898_v56  ;;  %3517 = vmax.xlane.f32.xlu0 %v9895_v50 }
 0xebd   :  { %3521 = vmax.xlane.f32.xlu0 %v9903_v16 }
 0xeca   :  { %7461 = vrot.lane.b32.xlu1 %v10652_v49, %s7938_s29 }
 0xed3   :  { %7466 = vrot.lane.b32.xlu0 %v10653_v35, %s7938_s29 }
 0xf29   :  { %v3494_v18 = vpop.xlane.xlu1 %3493 }
 0xf2a   :  { %v3524_v2 = vsub.f32 %v3418_v44, %v3494_v18  ;;  %v3492_v24 = vpop.xlane.xlu0 %3491 }
 0xf2b   :  { %v3523_v36 = vsub.f32 %v3413_v23, %v3492_v24 }
 0xf2c   :  { %v3541_v39 = vmul.f32 1.442695, %v3524_v2 }
 0xf2d   :  { %v3539_v37 = vmul.f32 1.442695, %v3523_v36 }
 0xf2e   :  { %7763 = vpow2.f32 %v3541_v39  ;;  %v3498_v29 = vpop.xlane.xlu0 %3497 }
 0xf2f   :  { %7765 = vpow2.f32 %v3539_v37  ;;  %v3526_v12 = vsub.f32 %v3428_v57, %v3498_v29 }
 0xf31   :  { %v3545_v38 = vmul.f32 1.442695, %v3526_v12 }
 0xf32   :  { %v3500_v30 = vpop.xlane.xlu1 %3499  ;;  %v3496_v21 = vpop.xlane.xlu0 %3495 }
 0xf33   :  { %7767 = vpow2.f32 %v3545_v38  ;;  %v3527_v26 = vsub.f32 %v3433_v46, %v3500_v30  ;;  %v3525_v11 = vsub.f32 %v3423_v60, %v3496_v21 }
 0xf35   :  { %v3547_v45 = vmul.f32 1.442695, %v3527_v26  ;;  %v3543_v33 = vmul.f32 1.442695, %v3525_v11 }
 0xf36   :  { %v3504_v58 = vpop.xlane.xlu1 %3503  ;;  %v3502_v62 = vpop.xlane.xlu0 %3501 }
 0xf37   :  { %7769 = vpow2.f32 %v3547_v45  ;;  %v3528_v44 = vsub.f32 %v3438_v41, %v3502_v62  ;;  %v3529_v60 = vsub.f32 %v9870_v59, %v3504_v58 }
 0xf38   :  { %v9910_v6 = vpop.eup %7763  ;;  %7771 = vpow2.f32 %v3543_v33 }
 0xf39   :  { %v9912_v23 = vpop.eup %7765  ;;  %v3549_v4 = vmul.f32 1.442695, %v3528_v44  ;;  %3573 = vadd.xlane.f32.xlu0 %v9910_v6  ;;  %v3551_v25 = vmul.f32 1.442695, %v3529_v60 }
 0xf3a   :  { %v3508_v57 = vpop.xlane.xlu1 %3507  ;;  %3571 = vadd.xlane.f32.xlu1 %v9912_v23  ;;  %v3506_v27 = vpop.xlane.xlu0 %3505 }
 0xf3b   :  { %v3530_v46 = vsub.f32 %v3448_v14, %v3506_v27  ;;  %7773 = vpow2.f32 %v3549_v4  ;;  %v3531_v13 = vsub.f32 %v9875_v19, %v3508_v57 }
 0xf3d   :  { %v9917_v52 = vpop.eup %7767  ;;  %v3553_v3 = vmul.f32 1.442695, %v3530_v46  ;;  %v3555_v14 = vmul.f32 1.442695, %v3531_v13 }
 0xf3e   :  { %v3512_v41 = vpop.xlane.xlu1 %3511  ;;  %3577 = vadd.xlane.f32.xlu0 %v9917_v52  ;;  %v3510_v48 = vpop.xlane.xlu0 %3509 }
 0xf3f   :  { %7775 = vpow2.f32 %v3553_v3  ;;  %v3533_v10 = vsub.f32 %v9882_v15, %v3512_v41 }
 0xf40   :  { %7777 = vpow2.f32 %v3551_v25  ;;  %v10654_v25 = vld [vmem:[#allocation27_spill] sm:$0xff] }
 0xf41   :  { %v9921_v17 = vpop.eup %7769  ;;  %7779 = vpow2.f32 %v3555_v14  ;;  %v3559_v19 = vmul.f32 1.442695, %v3533_v10 }
 0xf42   :  { %v9923_v31 = vpop.eup %7771  ;;  %v3516_v32 = vpop.xlane.xlu1 %3515  ;;  %3579 = vadd.xlane.f32.xlu1 %v9921_v17 }
 0xf43   :  { %v3514_v59 = vpop.xlane.xlu0 %3513  ;;  %3575 = vadd.xlane.f32.xlu0 %v9923_v31  ;;  %v3535_v2 = vsub.f32 %v9890_v40, %v3516_v32  ;;  %7781 = vpow2.f32 %v3559_v19  ;;  %v10658_v32 = vld [vmem:[#allocation30_spill] sm:$0xff] }
 0xf44   :  { %v3534_v27 = vsub.f32 %v9887_v22, %v3514_v59  ;;  %v10660_v59 = vld [vmem:[#allocation32_spill] sm:$0xff] }
 0xf45   :  { %v9928_v49 = vpop.eup %7773  ;;  %v3563_v15 = vmul.f32 1.442695, %v3535_v2 }
 0xf46   :  { %v3520_v35 = vpop.xlane.xlu1 %3519  ;;  %v3561_v46 = vmul.f32 1.442695, %v3534_v27 }
 0xf47   :  { %v3518_v18 = vpop.xlane.xlu0 %3517  ;;  %3581 = vadd.xlane.f32.xlu0 %v9928_v49  ;;  %v3537_v12 = vsub.f32 %v9898_v56, %v3520_v35  ;;  %7783 = vpow2.f32 %v3563_v15 }
 0xf48   :  { %v3536_v60 = vsub.f32 %v9895_v50, %v3518_v18  ;;  %v10656_v50 = vld [vmem:[#allocation29_spill] sm:$0xff] }
 0xf49   :  { %v9932_v24 = vpop.eup %7775  ;;  %v3567_v11 = vmul.f32 1.442695, %v3537_v12 }
 0xf4a   :  { %v7462_v36 = vpop.permute.xlu1 %7461  ;;  %v9936_v30 = vpop.eup %7777  ;;  %v3565_v3 = vmul.f32 1.442695, %v3536_v60 }
 0xf4b   :  { %v3522_v39 = vpop.xlane.xlu0 %3521  ;;  %v7464_v37 = vunpack.i.h.bf16 %v7462_v36  ;;  %v7463_v29 = vunpack.i.l.bf16 %v7462_v36  ;;  %3585 = vadd.xlane.f32.xlu0 %v9932_v24  ;;  %v9940_v58 = vpop.eup %7779  ;;  %7785 = vpow2.f32 %v3567_v11 }
 0xf4c   :  { %v3538_v45 = vsub.f32 %v9903_v16, %v3522_v39 }
 0xf4d   :  { %v7080_v38 = vpack.c.bf16 %v7464_v37, %v7463_v29  ;;  %v9945_v62 = vpop.eup %7781 }
 0xf4e   :  { %v3569_v56 = vmul.f32 1.442695, %v3538_v45 }
 0xf4f   :  { %v7467_v21 = vpop.permute.xlu0 %7466  ;;  %3583 = vadd.xlane.f32.xlu0 %v9936_v30  ;;  %7081 = vmatprep.subr.bf16.mxu0 %v7080_v38 }
 0xf50   :  { %v7469_v26 = vunpack.i.h.bf16 %v7467_v21  ;;  %v7468_v40 = vunpack.i.l.bf16 %v7467_v21  ;;  %7083 = vmatpush3.bf16.msra.mxu0 %v7080_v38  ;;  %7787 = vpow2.f32 %v3569_v56 }
 0xf51   :  { %v9948_v44 = vpop.eup %7783 }
 0xf52   :  { %v7084_v33 = vpack.c.bf16 %v7469_v26, %v7468_v40 }
 0xf53   :  { %3587 = vadd.xlane.f32.xlu0 %v9940_v58  ;;  %7471 = vrot.lane.b32.xlu1 %v8733_v5, %s7938_s29  ;;  %v3532_v5 = vsub.f32 %v9879_v63, %v3510_v48  ;;  %v10655_v63 = vld [vmem:[#allocation26_spill] sm:$0xff]  ;;  %v10657_v48 = vld [vmem:[#allocation28_spill] sm:$0xff] }
 0xf54   :  { %7085 = vmatprep.subr.bf16.mxu0 %v7084_v33 }
 0xf55   :  { %7087 = vmatpush3.bf16.msra.mxu0 %v7084_v33  ;;  %v9951_v16 = vpop.eup %7785  ;;  %v3557_v57 = vmul.f32 1.442695, %v3532_v5 }
 0xf57   :  { %3591 = vadd.xlane.f32.xlu0 %v9945_v62  ;;  %7789 = vpow2.f32 %v3557_v57 }
 0xf58   :  { %7791 = vpow2.f32 %v3561_v46 }
 0xf59   :  { %7793 = vpow2.f32 %v3565_v3 }
 0xf5a   :  { %v9954_v4 = vpop.eup %7787 }
 0xf5b   :  { %3595 = vadd.xlane.f32.xlu0 %v9948_v44 }
 0xf5f   :  { %3599 = vadd.xlane.f32.xlu0 %v9951_v16 }
 0xf61   :  { %v9960_v41 = vpop.eup %7789 }
 0xf62   :  { %v9965_v13 = vpop.eup %7791 }
 0xf63   :  { %3601 = vadd.xlane.f32.xlu0 %v9954_v4  ;;  %v9970_v22 = vpop.eup %7793 }
 0xf77   :  { %3589 = vadd.xlane.f32.xlu1 %v9960_v41 }
 0xf79   :  { %3844 = vrot.lane.b32.xlu0 %v10654_v25, %s7925_s26  ;;  %v10670_v25 = vld [vmem:[#allocation37_spill] sm:$0xff] }
 0xf7b   :  { %3593 = vadd.xlane.f32.xlu1 %v9965_v13 }
 0xf7d   :  { %3846 = vrot.lane.b32.xlu0 %v10655_v63, %s7925_s26 }
 0xf7f   :  { %3597 = vadd.xlane.f32.xlu1 %v9970_v22 }
 0xf81   :  { %3908 = vrot.lane.b32.xlu0 %v9833_v20, %s7939_s5  ;;  %v10659_v20 = vld [vmem:[#allocation31_spill] sm:$0xff] }
 0xf85   :  { %3848 = vrot.lane.b32.xlu0 %v10656_v50, %s7925_s26  ;;  %v10671_v50 = vld [vmem:[#allocation36_spill] sm:$0xff] }
 0xf89   :  { %3850 = vrot.lane.b32.xlu0 %v10657_v48, %s7925_s26 }
 0xf8d   :  { %3914 = vrot.lane.b32.xlu0 %v9835_v47, %s7939_s5  ;;  %v10662_v47 = vld [vmem:[#allocation34_spill] sm:$0xff] }
 0xf90   :  { %3910 = vrot.lane.b32.xlu1 %v9831_v51, %s7939_s5  ;;  %v10661_v51 = vld [vmem:[#allocation33_spill] sm:$0xff] }
 0xf91   :  { %3854 = vrot.lane.b32.xlu0 %v10658_v32, %s7925_s26 }
 0xf94   :  { %3912 = vrot.lane.b32.xlu1 %v9837_v53, %s7939_s5  ;;  %v10663_v53 = vld [vmem:[#allocation35_spill] sm:$0xff] }
 0xf95   :  { %3918 = vrot.lane.b32.xlu0 %v9839_v43, %s7939_s5  ;;  %v10664_v43 = vld [vmem:[#allocation52_spill] sm:$0xff] }
 0xf98   :  { %3852 = vrot.lane.b32.xlu1 %v10659_v20, %s7925_s26 }
 0xf99   :  { %3858 = vrot.lane.b32.xlu0 %v10660_v59, %s7925_s26 }
 0xf9c   :  { %3916 = vrot.lane.b32.xlu1 %v9841_v61, %s7939_s5  ;;  %v10665_v61 = vld [vmem:[#allocation53_spill] sm:$0xff] }
 0xf9d   :  { %3922 = vrot.lane.b32.xlu0 %v9843_v1, %s7939_s5  ;;  %v10666_v1 = vld [vmem:[#allocation54_spill] sm:$0xff] }
 0xfa0   :  { %3856 = vrot.lane.b32.xlu1 %v10661_v51, %s7925_s26 }
 0xfa1   :  { %3862 = vrot.lane.b32.xlu0 %v10662_v47, %s7925_s26 }
 0xfa4   :  { %3920 = vrot.lane.b32.xlu1 %v9845_v8, %s7939_s5  ;;  %v10667_v8 = vld [vmem:[#allocation55_spill] sm:$0xff] }
 0xfa5   :  { %3926 = vrot.lane.b32.xlu0 %v9847_v34, %s7939_s5  ;;  %v10668_v34 = vld [vmem:[#allocation56_spill] sm:$0xff] }
 0xfa8   :  { %3860 = vrot.lane.b32.xlu1 %v10663_v53, %s7925_s26 }
 0xfa9   :  { %3866 = vrot.lane.b32.xlu0 %v10664_v43, %s7925_s26 }
 0xfac   :  { %3924 = vrot.lane.b32.xlu1 %v9849_v55, %s7939_s5  ;;  %v10669_v55 = vld [vmem:[#allocation57_spill] sm:$0xff] }
 0xfad   :  { %3930 = vrot.lane.b32.xlu0 %v9851_v28, %s7939_s5 }
 0xfb0   :  { %3864 = vrot.lane.b32.xlu1 %v10665_v61, %s7925_s26 }
 0xfb1   :  { %3870 = vrot.lane.b32.xlu0 %v10666_v1, %s7925_s26 }
 0xfb4   :  { %3928 = vrot.lane.b32.xlu1 %v9853_v9, %s7939_s5 }
 0xfb5   :  { %3934 = vrot.lane.b32.xlu0 %v9855_v42, %s7939_s5 }
 0xfb8   :  { %3868 = vrot.lane.b32.xlu1 %v10667_v8, %s7925_s26 }
 0xfb9   :  { %3874 = vrot.lane.b32.xlu0 %v10668_v34, %s7925_s26 }
 0xfbc   :  { %3932 = vrot.lane.b32.xlu1 %v9857_v0, %s7939_s5 }
 0xfc0   :  { %3872 = vrot.lane.b32.xlu1 %v10669_v55, %s7925_s26 }
 0xfc4   :  { %3936 = vrot.lane.b32.xlu1 %v9861_v7, %s7939_s5 }
 0xfc6   :  { %v3574_v28 = vpop.xlane.xlu0 %3573 }
 0xfc7   :  { %v3572_v9 = vpop.xlane.xlu1 %3571 }
 0xfc8   :  { %7795 = vrcp.f32 %v3572_v9 }
 0xfc9   :  { %7797 = vrcp.f32 %v3574_v28 }
 0xfcb   :  { %v3578_v14 = vpop.xlane.xlu0 %3577 }
 0xfcc   :  { %7799 = vrcp.f32 %v3578_v14 }
 0xfcf   :  { %v3580_v42 = vpop.xlane.xlu1 %3579 }
 0xfd0   :  { %v3576_v10 = vpop.xlane.xlu0 %3575 }
 0xfd1   :  { %7801 = vrcp.f32 %v3576_v10 }
 0xfd2   :  { %v7796_v35 = vpop.eup %7795  ;;  %7803 = vrcp.f32 %v3580_v42 }
 0xfd3   :  { %v7472_v18 = vpop.permute.xlu1 %7471  ;;  %v3619_v0 = vmul.f32 %v7796_v35, %v9912_v23  ;;  %v7798_v39 = vpop.eup %7797 }
 0xfd4   :  { %v7474_v19 = vunpack.i.h.bf16 %v7472_v18  ;;  %v7473_v2 = vunpack.i.l.bf16 %v7472_v18  ;;  %v3582_v36 = vpop.xlane.xlu0 %3581  ;;  %v3620_v15 = vmul.f32 %v7798_v39, %v9910_v6 }
 0xfd5   :  { %7805 = vrcp.f32 %v3582_v36  ;;  %6548 = vmatprep.mubr.f32.mxu0 %v3619_v0 }
 0xfd6   :  { %v7088_v7 = vpack.c.bf16 %v7474_v19, %v7473_v2  ;;  %v7800_v29 = vpop.eup %7799 }
 0xfd7   :  { %v3622_v26 = vmul.f32 %v7800_v29, %v9917_v52 }
 0xfd8   :  { %v3586_v37 = vpop.xlane.xlu0 %3585  ;;  %7089 = vmatprep.subr.bf16.mxu0 %v7088_v7 }
 0xfd9   :  { %7091 = vmatpush3.bf16.msra.mxu0 %v7088_v7  ;;  %7807 = vrcp.f32 %v3586_v37 }
 0xfdb   :  { %v7802_v12 = vpop.eup %7801 }
 0xfdc   :  { %v7804_v38 = vpop.eup %7803  ;;  %v3584_v21 = vpop.xlane.xlu0 %3583  ;;  %6549 = vmatmul.mubr.f32.vlgmr.msra.gmra.mrb[80].mxu0 %v3620_v15  ;;  %v3621_v23 = vmul.f32 %v7802_v12, %v9923_v31  ;;  %v10673_v12 = vld [vmem:[#allocation46_spill] sm:$0xff] }
 0xfdd   :  { %7809 = vrcp.f32 %v3584_v21  ;;  %v3623_v11 = vmul.f32 %v7804_v38, %v9921_v17 }
 0xfde   :  { %6551 = vmatprep.mubr.f32.mxu0 %v3621_v23 }
 0xfdf   :  { %v7806_v40 = vpop.eup %7805 }
 0xfe0   :  { %v3588_v45 = vpop.xlane.xlu0 %3587  ;;  %6552 = vmatmul.mubr.f32.gmra.mrb[82].mxu0 %v3622_v26  ;;  %v3624_v6 = vmul.f32 %v7806_v40, %v9928_v49  ;;  %v10674_v26 = vld [vmem:[#allocation45_spill] sm:$0xff] }
 0xfe1   :  { %7811 = vrcp.f32 %v3588_v45  ;;  %6554 = vmatprep.mubr.f32.mxu0 %v3623_v11 }
 0xfe3   :  { %v7808_v56 = vpop.eup %7807 }
 0xfe4   :  { %v3592_v33 = vpop.xlane.xlu0 %3591  ;;  %6555 = vmatmul.mubr.f32.gmra.mrb[84].mxu0 %v3624_v6  ;;  %v3626_v27 = vmul.f32 %v7808_v56, %v9932_v24  ;;  %v10675_v6 = vld [vmem:[#allocation48_spill] sm:$0xff] }
 0xfe5   :  { %7813 = vrcp.f32 %v3592_v33 }
 0xfe7   :  { %v7810_v5 = vpop.eup %7809 }
 0xfe8   :  { %v3596_v57 = vpop.xlane.xlu0 %3595  ;;  %v3625_v31 = vmul.f32 %v7810_v5, %v9936_v30 }
 0xfea   :  { %6557 = vmatprep.mubr.f32.mxu0 %v3625_v31 }
 0xfeb   :  { %v7812_v52 = vpop.eup %7811  ;;  %6558 = vmatmul.mubr.f32.gmra.mrb[86].mxu0 %v3626_v27  ;;  %v10676_v27 = vld [vmem:[#allocation47_spill] sm:$0xff] }
 0xfec   :  { %v3600_v46 = vpop.xlane.xlu0 %3599  ;;  %v3627_v17 = vmul.f32 %v7812_v52, %v9940_v58 }
 0xfee   :  { %6560 = vmatprep.mubr.f32.mxu0 %v3627_v17 }
 0xfef   :  { %v7814_v53 = vpop.eup %7813 }
 0xff0   :  { %v3602_v60 = vpop.xlane.xlu0 %3601  ;;  %v3629_v34 = vmul.f32 %v7814_v53, %v9945_v62 }
 0xff4   :  { %v3845_v3 = vpop.permute.xlu0 %3844 }
 0xff5   :  { %v10042_v49 = vsel %vm1451_vm3, %v10670_v25, %v3845_v3  ;;  %v10677_v3 = vld [vmem:[#allocation49_spill] sm:$0xff] }
 0xff8   :  { %v3847_v63 = vpop.permute.xlu0 %3846 }
 0xff9   :  { %v10046_v48 = vsel %vm1451_vm3, %v10671_v50, %v3847_v63 }
 0xffc   :  { %v10048_v30 = vpop.permute.xlu0 %3908 }
0x1000   :  { %v10050_v24 = vpop.permute.xlu0 %3848 }
0x1004   :  { %v10052_v32 = vpop.permute.xlu0 %3850  ;;  %v3590_v58 = vpop.xlane.xlu1 %3589 }
0x1005   :  { %7815 = vrcp.f32 %v3590_v58 }
0x1006   :  { %7817 = vrcp.f32 %v3596_v57 }
0x1008   :  { %v10054_v20 = vpop.permute.xlu0 %3914  ;;  %v3594_v59 = vpop.xlane.xlu1 %3593 }
0x1009   :  { %7819 = vrcp.f32 %v3594_v59  ;;  %v10678_v59 = vld [vmem:[#allocation51_spill] sm:$0xff] }
0x100a   :  { %7821 = vrcp.f32 %v3600_v46 }
0x100c   :  { %v10056_v51 = vpop.permute.xlu0 %3854  ;;  %v3598_v47 = vpop.xlane.xlu1 %3597 }
0x100d   :  { %7823 = vrcp.f32 %v3598_v47 }
0x100e   :  { %7825 = vrcp.f32 %v3602_v60 }
0x100f   :  { %v7816_v43 = vpop.eup %7815 }
0x1010   :  { %v10058_v61 = vpop.permute.xlu0 %3918  ;;  %v10060_v1 = vpop.permute.xlu1 %3910  ;;  %v3628_v8 = vmul.f32 %v7816_v43, %v9960_v41 }
0x1011   :  { %v7818_v55 = vpop.eup %7817 }
0x1012   :  { %6561 = vmatmul.mubr.f32.gmra.mrb[88].mxu0 %v3628_v8  ;;  %v3631_v10 = vmul.f32 %v7818_v55, %v9948_v44  ;;  %v4070_v8 = vld [vmem:[#allocation2 + $0x80] sm:$0xff] }
0x1013   :  { %v7820_v28 = vpop.eup %7819  ;;  %6563 = vmatprep.mubr.f32.mxu0 %v3629_v34  ;;  %v4071_v34 = vld [vmem:[#allocation2 + $0x88] sm:$0xff] }
0x1014   :  { %v10064_v9 = vpop.permute.xlu0 %3858  ;;  %v10066_v14 = vpop.permute.xlu1 %3912  ;;  %v3630_v42 = vmul.f32 %v7820_v28, %v9965_v13  ;;  %v10672_v13 = vld [vmem:[#allocation44_spill] sm:$0xff]  ;;  %v7092_v55 = vpack.c.bf16 %v4071_v34, %v4070_v8  ;;  %v4072_v28 = vld [vmem:[#allocation2 + $0x90] sm:$0xff] }
0x1015   :  { %v7822_v35 = vpop.eup %7821 }
0x1016   :  { %6564 = vmatmul.mubr.f32.gmra.mrb[90].mxu0 %v3630_v42  ;;  %v3633_v2 = vmul.f32 %v7822_v35, %v9951_v16  ;;  %7093 = vmatprep.subr.bf16.mxu0 %v7092_v55  ;;  %v4073_v42 = vld [vmem:[#allocation2 + $0x98] sm:$0xff] }
0x1017   :  { %v7824_v18 = vpop.eup %7823  ;;  %6566 = vmatprep.mubr.f32.mxu0 %v3631_v10  ;;  %7095 = vmatpush3.bf16.msra.mxu0 %v7092_v55  ;;  %v7096_v10 = vpack.c.bf16 %v4073_v42, %v4072_v28 }
0x1018   :  { %v10070_v0 = vpop.permute.xlu0 %3922  ;;  %v10072_v41 = vpop.permute.xlu1 %3852  ;;  %v3632_v62 = vmul.f32 %v7824_v18, %v9970_v22 }
0x1019   :  { %v7826_v19 = vpop.eup %7825  ;;  %7097 = vmatprep.subr.bf16.mxu0 %v7096_v10 }
0x101a   :  { %6567 = vmatmul.mubr.f32.gmra.mrb[92].mxu0 %v3632_v62  ;;  %v3634_v44 = vmul.f32 %v7826_v19, %v9954_v4 }
0x101b   :  { %6569 = vmatprep.mubr.f32.mxu0 %v3633_v2  ;;  %7099 = vmatpush3.bf16.msra.mxu0 %v7096_v10 }
0x101c   :  { %v3863_v36 = vpop.permute.xlu0 %3862  ;;  %v10076_v7 = vpop.permute.xlu1 %3916 }
0x101d   :  { %v4029_v39 = vsel %vm1451_vm3, %v10672_v13, %v3863_v36 }
0x101e   :  { %6570 = vmatmul.mubr.f32.gmra.mrb[94].mxu0 %v3634_v44 }
0x1020   :  { %v3927_v37 = vpop.permute.xlu0 %3926  ;;  %v10081_v29 = vpop.permute.xlu1 %3856 }
0x1021   :  { %v10084_v22 = vsel %vm4036_vm5, %v4029_v39, %v3927_v37 }
0x1024   :  { %v3867_v15 = vpop.permute.xlu0 %3866  ;;  %v10086_v16 = vpop.permute.xlu1 %3920 }
0x1025   :  { %v4031_v38 = vsel %vm1451_vm3, %v10673_v12, %v3867_v15 }
0x1028   :  { %v3931_v21 = vpop.permute.xlu0 %3930  ;;  %v3861_v23 = vpop.permute.xlu1 %3860 }
0x1029   :  { %v10091_v4 = vsel %vm4036_vm5, %v4031_v38, %v3931_v21  ;;  %v4028_v40 = vsel %vm1451_vm3, %v10674_v26, %v3861_v23 }
0x102c   :  { %v3871_v11 = vpop.permute.xlu0 %3870  ;;  %v3925_v45 = vpop.permute.xlu1 %3924 }
0x102d   :  { %v4033_v33 = vsel %vm1451_vm3, %v10675_v6, %v3871_v11  ;;  %v10098_v56 = vsel %vm4036_vm5, %v4028_v40, %v3925_v45  ;;  %v4037_v11 = vsel %vm4036_vm5, %v10042_v49, %v10048_v30  ;;  %v10679_v45 = vld [vmem:[#allocation39_spill] sm:$0xff]  ;;  %v10680_v49 = vld [vmem:[#allocation50_spill] sm:$0xff] }
0x102e   :  { %v4022_v6 = vsel %vm1451_vm3, %v10679_v45, %v10050_v24 }
0x1030   :  { %v3935_v5 = vpop.permute.xlu0 %3934  ;;  %v3865_v57 = vpop.permute.xlu1 %3864 }
0x1031   :  { %v10101_v31 = vsel %vm4036_vm5, %v4033_v33, %v3935_v5  ;;  %v4030_v52 = vsel %vm1451_vm3, %v10676_v27, %v3865_v57  ;;  %v4038_v5 = vsel %vm4036_vm5, %v10046_v48, %v10060_v1  ;;  %v4039_v57 = vsel %vm4036_vm5, %v4022_v6, %v10066_v14  ;;  %v10681_v1 = vld [vmem:[#allocation38_spill] sm:$0xff] }
0x1032   :  { %v4023_v14 = vsel %vm1451_vm3, %v10681_v1, %v10052_v32  ;;  %v10683_v32 = vld [vmem:[#allocation40_spill] sm:$0xff] }
0x1033   :  { %v4025_v34 = vsel %vm1451_vm3, %v10683_v32, %v10056_v51  ;;  %v10685_v51 = vld [vmem:[#allocation42_spill] sm:$0xff] }
0x1034   :  { %v3929_v46 = vpop.permute.xlu1 %3928  ;;  %v3875_v26 = vpop.permute.xlu0 %3874 }
0x1035   :  { %v10106_v17 = vsel %vm4036_vm5, %v4030_v52, %v3929_v46  ;;  %v4035_v30 = vsel %vm1451_vm3, %v10680_v49, %v3875_v26 }
0x1038   :  { %v3869_v60 = vpop.permute.xlu1 %3868 }
0x1039   :  { %v4032_v25 = vsel %vm1451_vm3, %v10677_v3, %v3869_v60 }
0x103c   :  { %v3933_v63 = vpop.permute.xlu1 %3932 }
0x103d   :  { %v10111_v50 = vsel %vm4036_vm5, %v4032_v25, %v3933_v63  ;;  %v4040_v25 = vsel %vm4036_vm5, %v4023_v14, %v10054_v20  ;;  %v10682_v63 = vld [vmem:[#allocation41_spill] sm:$0xff]  ;;  %v4042_v20 = vsel %vm4036_vm5, %v4025_v34, %v10058_v61 }
0x1040   :  { %v3873_v58 = vpop.permute.xlu1 %3872 }
0x1041   :  { %v4034_v47 = vsel %vm1451_vm3, %v10678_v59, %v3873_v58  ;;  %v4024_v58 = vsel %vm1451_vm3, %v10682_v63, %v10072_v41  ;;  %v10684_v41 = vld [vmem:[#allocation43_spill] sm:$0xff]  ;;  %v10691_v63 = vld [vmem:[#allocation13_spill] sm:$0xff] }
0x1042   :  { %v4026_v55 = vsel %vm1451_vm3, %v10684_v41, %v10081_v29 }
0x1043   :  { %v4043_v42 = vsel %vm4036_vm5, %v4026_v55, %v10086_v16  ;;  %v10693_v55 = vld [vmem:[#allocation15_spill] sm:$0xff] }
0x1044   :  { %v3937_v53 = vpop.permute.xlu1 %3936 }
0x1045   :  { %v10116_v43 = vsel %vm4036_vm5, %v4034_v47, %v3937_v53  ;;  %v4041_v47 = vsel %vm4036_vm5, %v4024_v58, %v10076_v7 }
0x10af   :  { %v6550_v35 = vpop.f32.mrb[80].mxu0 }
0x10b0   :  { %3974 = vrot.lane.b32.xlu0 %v6550_v35, %s7940_s6  ;;  %v3749_v18 = vpop.f32.mrb[81].mxu0 }
0x10b3   :  { %v6553_v62 = vpop.f32.mrb[82].mxu0 }
0x10b4   :  { %3972 = vrot.lane.b32.xlu0 %v3749_v18, %s7940_s6  ;;  %v3759_v19 = vpop.f32.mrb[83].mxu0  ;;  %v4027_v18 = vsel %vm1451_vm3, %v10685_v51, %v10064_v9 }
0x10b5   :  { %3976 = vrot.lane.b32.xlu1 %v3759_v19, %s7940_s6  ;;  %v4044_v61 = vsel %vm4036_vm5, %v4027_v18, %v10070_v0 }
0x10b7   :  { %v6556_v2 = vpop.f32.mrb[84].mxu0 }
0x10b8   :  { %3938 = vrot.lane.b32.xlu0 %v9859_v54, %s7939_s5  ;;  %v3769_v36 = vpop.f32.mrb[85].mxu0 }
0x10b9   :  { %3980 = vrot.lane.b32.xlu1 %v3769_v36, %s7940_s6 }
0x10bc   :  { %3978 = vrot.lane.b32.xlu0 %v6553_v62, %s7940_s6 }
0x10be   :  { %v6559_v44 = vpop.f32.mrb[86].mxu0 }
0x10bf   :  { %v3779_v13 = vpop.f32.mrb[87].mxu0 }
0x10c0   :  { %3984 = vrot.lane.b32.xlu1 %v3779_v13, %s7940_s6  ;;  %3982 = vrot.lane.b32.xlu0 %v6556_v2, %s7940_s6 }
0x10c4   :  { %3986 = vrot.lane.b32.xlu0 %v6559_v44, %s7940_s6 }
0x10e5   :  { %v6562_v39 = vpop.f32.mrb[88].mxu0 }
0x10e6   :  { %3990 = vrot.lane.b32.xlu0 %v6562_v39, %s7940_s6  ;;  %v3789_v37 = vpop.f32.mrb[89].mxu0 }
0x10e7   :  { %3988 = vrot.lane.b32.xlu1 %v3789_v37, %s7940_s6 }
0x10e9   :  { %v6565_v54 = vpop.f32.mrb[90].mxu0 }
0x10ea   :  { %3994 = vrot.lane.b32.xlu0 %v6565_v54, %s7940_s6  ;;  %v3799_v15 = vpop.f32.mrb[91].mxu0 }
0x10eb   :  { %3992 = vrot.lane.b32.xlu1 %v3799_v15, %s7940_s6 }
0x10ed   :  { %v6568_v12 = vpop.f32.mrb[92].mxu0 }
0x10ee   :  { %3998 = vrot.lane.b32.xlu0 %v6568_v12, %s7940_s6  ;;  %v3809_v38 = vpop.f32.mrb[93].mxu0  ;;  %v10214_v12 = vld [vmem:[#allocation2 + $0x138] ss:$0 sm:$0xff] }
0x10ef   :  { %3996 = vrot.lane.b32.xlu1 %v3809_v38, %s7940_s6 }
0x10f1   :  { %v6571_v21 = vpop.f32.mrb[94].mxu0 }
0x10f2   :  { %4002 = vrot.lane.b32.xlu0 %v6571_v21, %s7940_s6  ;;  %v3819_v23 = vpop.f32.mrb[95].mxu0 }
0x10f3   :  { %4000 = vrot.lane.b32.xlu1 %v3819_v23, %s7940_s6  ;;  %v10686_v23 = vld [vmem:[#allocation8_spill] sm:$0xff] }
0x1122   :  { %v3975_v40 = vpop.permute.xlu0 %3974 }
0x1123   :  { %v4055_v46 = vsel %vm4053_vm6, %v4038_v5, %v3975_v40  ;;  %v10687_v40 = vld [vmem:[#allocation9_spill] sm:$0xff] }
0x1126   :  { %v3973_v33 = vpop.permute.xlu0 %3972 }
0x1127   :  { %v4054_v27 = vsel %vm4053_vm6, %v4037_v11, %v3973_v33  ;;  %v3977_v52 = vpop.permute.xlu1 %3976 }
0x1128   :  { %v4056_v60 = vsel %vm4053_vm6, %v4039_v57, %v3977_v52  ;;  %6580 = vmatprep.mubr.msk.f32.mxu0 %vm57_vm0, %v4054_v27  ;;  %v10688_v27 = vld [vmem:[#allocation10_spill] sm:$0xff] }
0x1129   :  { %6581 = vmatmul.mubr.msk.f32.vlgmr.msra.gmra.mrb[96].mxu0 %vm57_vm0, %v4055_v46  ;;  %v10689_v46 = vld [vmem:[#allocation11_spill] sm:$0xff] }
0x112a   :  { %v3939_v24 = vpop.permute.xlu0 %3938  ;;  %6583 = vmatprep.mubr.msk.f32.mxu0 %vm57_vm0, %v4056_v60 }
0x112b   :  { %v4052_v48 = vsel %vm4036_vm5, %v4035_v30, %v3939_v24  ;;  %v3981_v3 = vpop.permute.xlu1 %3980 }
0x112c   :  { %v4058_v8 = vsel %vm4053_vm6, %v4041_v47, %v3981_v3  ;;  %v10690_v3 = vld [vmem:[#allocation12_spill] sm:$0xff] }
0x112e   :  { %v3979_v59 = vpop.permute.xlu0 %3978 }
0x112f   :  { %v4057_v53 = vsel %vm4053_vm6, %v4040_v25, %v3979_v59 }
0x1130   :  { %6584 = vmatmul.mubr.msk.f32.gmra.mrb[98].mxu0 %vm57_vm0, %v4057_v53 }
0x1131   :  { %6586 = vmatprep.mubr.msk.f32.mxu0 %vm57_vm0, %v4058_v8 }
0x1132   :  { %v3985_v7 = vpop.permute.xlu1 %3984  ;;  %v3983_v28 = vpop.permute.xlu0 %3982 }
0x1133   :  { %v4059_v10 = vsel %vm4053_vm6, %v4042_v20, %v3983_v28  ;;  %v4060_v35 = vsel %vm4053_vm6, %v4043_v42, %v3985_v7  ;;  %v10692_v20 = vld [vmem:[#allocation14_spill] sm:$0xff] }
0x1134   :  { %6587 = vmatmul.mubr.msk.f32.gmra.mrb[100].mxu0 %vm57_vm0, %v4059_v10 }
0x1135   :  { %6589 = vmatprep.mubr.msk.f32.mxu0 %vm57_vm0, %v4060_v35 }
0x1136   :  { %v3987_v29 = vpop.permute.xlu0 %3986 }
0x1137   :  { %v4061_v62 = vsel %vm4053_vm6, %v4044_v61, %v3987_v29  ;;  %v10694_v61 = vld [vmem:[#allocation16_spill] sm:$0xff] }
0x1138   :  { %6590 = vmatmul.mubr.msk.f32.gmra.mrb[102].mxu0 %vm57_vm0, %v4061_v62  ;;  %v10695_v62 = vld [vmem:[#allocation17_spill] sm:$0xff] }
0x1158   :  { %v3991_v16 = vpop.permute.xlu0 %3990 }
0x1159   :  { %v3989_v19 = vpop.permute.xlu1 %3988  ;;  %v4063_v36 = vsel %vm4053_vm6, %v10084_v22, %v3991_v16 }
0x115a   :  { %v4062_v2 = vsel %vm4053_vm6, %v10098_v56, %v3989_v19 }
0x115b   :  { %6592 = vmatprep.mubr.msk.f32.mxu0 %vm57_vm0, %v4062_v2 }
0x115c   :  { %6593 = vmatmul.mubr.msk.f32.gmra.mrb[104].mxu0 %vm57_vm0, %v4063_v36  ;;  %v3995_v9 = vpop.permute.xlu0 %3994 }
0x115d   :  { %v3993_v44 = vpop.permute.xlu1 %3992  ;;  %v4065_v13 = vsel %vm4053_vm6, %v10091_v4, %v3995_v9 }
0x115e   :  { %v4064_v0 = vsel %vm4053_vm6, %v10106_v17, %v3993_v44 }
0x115f   :  { %6595 = vmatprep.mubr.msk.f32.mxu0 %vm57_vm0, %v4064_v0 }
0x1160   :  { %6596 = vmatmul.mubr.msk.f32.gmra.mrb[106].mxu0 %vm57_vm0, %v4065_v13  ;;  %v3999_v56 = vpop.permute.xlu0 %3998  ;;  %v10696_v13 = vld [vmem:[#allocation18_spill] sm:$0xff] }
0x1161   :  { %v3997_v39 = vpop.permute.xlu1 %3996  ;;  %v4067_v37 = vsel %vm4053_vm6, %v10101_v31, %v3999_v56 }
0x1162   :  { %v4066_v22 = vsel %vm4053_vm6, %v10111_v50, %v3997_v39  ;;  %v10697_v39 = vld [vmem:[#allocation19_spill] sm:$0xff] }
0x1163   :  { %6598 = vmatprep.mubr.msk.f32.mxu0 %vm57_vm0, %v4066_v22 }
0x1164   :  { %6599 = vmatmul.mubr.msk.f32.gmra.mrb[108].mxu0 %vm57_vm0, %v4067_v37  ;;  %v4003_v17 = vpop.permute.xlu0 %4002 }
0x1165   :  { %v4069_v54 = vsel %vm4053_vm6, %v4052_v48, %v4003_v17  ;;  %v4001_v4 = vpop.permute.xlu1 %4000 }
0x1166   :  { %v4068_v15 = vsel %vm4053_vm6, %v10116_v43, %v4001_v4 }
0x1167   :  { %6601 = vmatprep.mubr.msk.f32.mxu0 %vm57_vm0, %v4068_v15 }
0x1168   :  { %6602 = vmatmul.mubr.msk.f32.gmra.mrb[110].mxu0 %vm57_vm0, %v4069_v54 }
0x11fc   :  { %v6582_v50 = vpop.f32.mrb[96].mxu0 }
0x11fd   :  { %v4199_v31 = vadd.f32 %v6582_v50, %v10214_v12  ;;  %v4193_v38 = vpop.f32.mrb[97].mxu0 }
0x11fe   :  { %v4194_v21 = vadd.f32 %v10214_v12, %v4193_v38 }
0x11ff   :  { %v10219_v26 = vadd.f32 %v4199_v31, %v10686_v23  ;;  %v10698_v31 = vld [vmem:[#allocation20_spill] sm:$0xff] }
0x1200   :  { %v10222_v11 = vadd.f32 %v4194_v21, %v10687_v40  ;;  %v10699_v21 = vld [vmem:[#allocation21_spill] sm:$0xff] }
0x1201   :  { %v4307_v43 = vsel %vm57_vm0, %v10219_v26, 0.0 }
0x1202   :  { %4308 = vadd.xlane.f32.xlu0 %v4307_v43  ;;  %v4304_v45 = vsel %vm57_vm0, %v10222_v11, 0.0 }
0x1203   :  { %v6585_v6 = vpop.f32.mrb[98].mxu0  ;;  %4305 = vadd.xlane.f32.xlu1 %v4304_v45 }
0x1204   :  { %v4209_v33 = vadd.f32 %v6585_v6, %v10214_v12  ;;  %v4203_v5 = vpop.f32.mrb[99].mxu0 }
0x1205   :  { %v4204_v57 = vadd.f32 %v10214_v12, %v4203_v5 }
0x1206   :  { %v10231_v52 = vadd.f32 %v4209_v33, %v10688_v27 }
0x1207   :  { %v10234_v60 = vadd.f32 %v4204_v57, %v10689_v46  ;;  %v6588_v49 = vpop.f32.mrb[100].mxu0  ;;  %v10700_v57 = vld [vmem:[#allocation23_spill] sm:$0xff]  ;;  %v10701_v46 = vld [vmem:[#allocation22_spill] sm:$0xff] }
0x1208   :  { %v4219_v30 = vadd.f32 %v6588_v49, %v10214_v12  ;;  %v4213_v24 = vpop.f32.mrb[101].mxu0  ;;  %v4313_v48 = vsel %vm57_vm0, %v10231_v52, 0.0 }
0x1209   :  { %v4214_v1 = vadd.f32 %v10214_v12, %v4213_v24  ;;  %4314 = vadd.xlane.f32.xlu1 %v4313_v48  ;;  %v4310_v14 = vsel %vm57_vm0, %v10234_v60, 0.0 }
0x120a   :  { %v10243_v25 = vadd.f32 %v4219_v30, %v10690_v3  ;;  %4311 = vadd.xlane.f32.xlu0 %v4310_v14 }
0x120b   :  { %v10246_v58 = vadd.f32 %v4214_v1, %v10691_v63  ;;  %v6591_v59 = vpop.f32.mrb[102].mxu0 }
0x120c   :  { %v4229_v47 = vadd.f32 %v6591_v59, %v10214_v12  ;;  %v4223_v53 = vpop.f32.mrb[103].mxu0  ;;  %v4319_v8 = vsel %vm57_vm0, %v10243_v25, 0.0 }
0x120d   :  { %v4224_v32 = vadd.f32 %v10214_v12, %v4223_v53  ;;  %4320 = vadd.xlane.f32.xlu1 %v4319_v8  ;;  %v4316_v34 = vsel %vm57_vm0, %v10246_v58, 0.0 }
0x120e   :  { %v10255_v41 = vadd.f32 %v4229_v47, %v10692_v20  ;;  %4317 = vadd.xlane.f32.xlu0 %v4316_v34 }
0x120f   :  { %v10258_v7 = vadd.f32 %v4224_v32, %v10693_v55 }
0x1210   :  { %v4325_v28 = vsel %vm57_vm0, %v10255_v41, 0.0 }
0x1211   :  { %4326 = vadd.xlane.f32.xlu1 %v4325_v28  ;;  %v4322_v42 = vsel %vm57_vm0, %v10258_v7, 0.0 }
0x1212   :  { %4323 = vadd.xlane.f32.xlu0 %v4322_v42 }
0x122f   :  { %v6594_v10 = vpop.f32.mrb[104].mxu0 }
0x1230   :  { %v4239_v35 = vadd.f32 %v6594_v10, %v10214_v12  ;;  %v4233_v51 = vpop.f32.mrb[105].mxu0 }
0x1231   :  { %v4234_v18 = vadd.f32 %v10214_v12, %v4233_v51 }
0x1232   :  { %v10267_v29 = vadd.f32 %v4239_v35, %v10694_v61 }
0x1233   :  { %v10270_v16 = vadd.f32 %v4234_v18, %v10695_v62  ;;  %v6597_v19 = vpop.f32.mrb[106].mxu0 }
0x1234   :  { %v4249_v2 = vadd.f32 %v6597_v19, %v10214_v12  ;;  %v4243_v36 = vpop.f32.mrb[107].mxu0  ;;  %v4331_v9 = vsel %vm57_vm0, %v10267_v29, 0.0 }
0x1235   :  { %v4244_v44 = vadd.f32 %v10214_v12, %v4243_v36  ;;  %4332 = vadd.xlane.f32.xlu1 %v4331_v9  ;;  %v4328_v0 = vsel %vm57_vm0, %v10270_v16, 0.0 }
0x1236   :  { %v10279_v56 = vadd.f32 %v4249_v2, %v10696_v13  ;;  %4329 = vadd.xlane.f32.xlu0 %v4328_v0 }
0x1237   :  { %v10282_v22 = vadd.f32 %v4244_v44, %v10697_v39  ;;  %v6600_v37 = vpop.f32.mrb[108].mxu0 }
0x1238   :  { %v4259_v17 = vadd.f32 %v6600_v37, %v10214_v12  ;;  %v4253_v54 = vpop.f32.mrb[109].mxu0  ;;  %v4337_v4 = vsel %vm57_vm0, %v10279_v56, 0.0 }
0x1239   :  { %v4254_v15 = vadd.f32 %v10214_v12, %v4253_v54  ;;  %4338 = vadd.xlane.f32.xlu1 %v4337_v4  ;;  %v4334_v50 = vsel %vm57_vm0, %v10282_v22, 0.0  ;;  %v4555_v4 = vld [vmem:[#allocation2 + $0xa0] sm:$0xff] }
0x123a   :  { %v10291_v38 = vadd.f32 %v4259_v17, %v10698_v31  ;;  %4335 = vadd.xlane.f32.xlu0 %v4334_v50  ;;  %v4557_v50 = vld [vmem:[#allocation2 + $0xb0] sm:$0xff]  ;;  %v4558_v31 = vld [vmem:[#allocation2 + $0xb8] sm:$0xff] }
0x123b   :  { %v10294_v23 = vadd.f32 %v4254_v15, %v10699_v21  ;;  %v6603_v40 = vpop.f32.mrb[110].mxu0  ;;  %v4556_v15 = vld [vmem:[#allocation2 + $0xa8] sm:$0xff]  ;;  %v7104_v21 = vpack.c.bf16 %v4558_v31, %v4557_v50 }
0x123c   :  { %v4269_v43 = vadd.f32 %v6603_v40, %v10214_v12  ;;  %v4263_v45 = vpop.f32.mrb[111].mxu0  ;;  %v4343_v6 = vsel %vm57_vm0, %v10291_v38, 0.0 }
0x123d   :  { %v4264_v33 = vadd.f32 %v10214_v12, %v4263_v45  ;;  %4344 = vadd.xlane.f32.xlu1 %v4343_v6  ;;  %v4340_v5 = vsel %vm57_vm0, %v10294_v23, 0.0 }
0x123e   :  { %v10303_v27 = vadd.f32 %v4269_v43, %v10700_v57  ;;  %4341 = vadd.xlane.f32.xlu0 %v4340_v5 }
0x123f   :  { %v10306_v49 = vadd.f32 %v4264_v33, %v10701_v46 }
0x1240   :  { %v4349_v30 = vsel %vm57_vm0, %v10303_v27, 0.0 }
0x1241   :  { %4350 = vadd.xlane.f32.xlu1 %v4349_v30  ;;  %v4346_v24 = vsel %vm57_vm0, %v10306_v49, 0.0 }
0x1242   :  { %4347 = vadd.xlane.f32.xlu0 %v4346_v24 }
0x128f   :  { %v4309_v12 = vpop.xlane.xlu0 %4308 }
0x1290   :  { %v4354_v48 = vmul.f32 0.03125, %v4309_v12  ;;  %v4306_v1 = vpop.xlane.xlu1 %4305 }
0x1291   :  { %v4353_v14 = vmul.f32 0.03125, %v4306_v1 }
0x1292   :  { %v10313_v3 = vsub.f32 %v10219_v26, %v4354_v48 }
0x1293   :  { %v10316_v63 = vsub.f32 %v10222_v11, %v4353_v14 }
0x1294   :  { %v4386_v59 = vmul.f32 %v10313_v3, %v10313_v3 }
0x1295   :  { %v4385_v47 = vmul.f32 %v10316_v63, %v10316_v63 }
0x1296   :  { %v4315_v53 = vpop.xlane.xlu1 %4314  ;;  %v4404_v8 = vsel %vm57_vm0, %v4386_v59, 0.0 }
0x1297   :  { %v4356_v32 = vmul.f32 0.03125, %v4315_v53  ;;  %v4312_v34 = vpop.xlane.xlu0 %4311  ;;  %4405 = vadd.xlane.f32.xlu1 %v4404_v8  ;;  %v4401_v20 = vsel %vm57_vm0, %v4385_v47, 0.0 }
0x1298   :  { %v4355_v55 = vmul.f32 0.03125, %v4312_v34  ;;  %4402 = vadd.xlane.f32.xlu0 %v4401_v20 }
0x1299   :  { %v10325_v26 = vsub.f32 %v10231_v52, %v4356_v32 }
0x129a   :  { %v10328_v11 = vsub.f32 %v10234_v60, %v4355_v55  ;;  %v4321_v28 = vpop.xlane.xlu1 %4320 }
0x129b   :  { %v4358_v42 = vmul.f32 0.03125, %v4321_v28  ;;  %v4318_v10 = vpop.xlane.xlu0 %4317  ;;  %v4388_v35 = vmul.f32 %v10325_v26, %v10325_v26 }
0x129c   :  { %v4357_v51 = vmul.f32 0.03125, %v4318_v10  ;;  %v4387_v18 = vmul.f32 %v10328_v11, %v10328_v11 }
0x129d   :  { %v10335_v61 = vsub.f32 %v10243_v25, %v4358_v42  ;;  %v4410_v62 = vsel %vm57_vm0, %v4388_v35, 0.0 }
0x129e   :  { %v10339_v52 = vsub.f32 %v10246_v58, %v4357_v51  ;;  %4411 = vadd.xlane.f32.xlu1 %v4410_v62  ;;  %v4327_v60 = vpop.xlane.xlu1 %4326  ;;  %v4407_v19 = vsel %vm57_vm0, %v4387_v18, 0.0 }
0x129f   :  { %v4360_v2 = vmul.f32 0.03125, %v4327_v60  ;;  %v4324_v36 = vpop.xlane.xlu0 %4323  ;;  %4408 = vadd.xlane.f32.xlu0 %v4407_v19  ;;  %v4390_v9 = vmul.f32 %v10335_v61, %v10335_v61 }
0x12a0   :  { %v4359_v44 = vmul.f32 0.03125, %v4324_v36  ;;  %v4389_v25 = vmul.f32 %v10339_v52, %v10339_v52 }
0x12a1   :  { %v10347_v0 = vsub.f32 %v10255_v41, %v4360_v2  ;;  %v4416_v58 = vsel %vm57_vm0, %v4390_v9, 0.0  ;;  %v4773_v9 = vld [vmem:[#allocation2 + $0xc0] sm:$0xff] }
0x12a2   :  { %v10351_v13 = vsub.f32 %v10258_v7, %v4359_v44  ;;  %4417 = vadd.xlane.f32.xlu1 %v4416_v58  ;;  %v4413_v39 = vsel %vm57_vm0, %v4389_v25, 0.0  ;;  %v7100_v7 = vpack.c.bf16 %v4556_v15, %v4555_v4  ;;  %v4774_v44 = vld [vmem:[#allocation2 + $0xc8] sm:$0xff] }
0x12a3   :  { %4414 = vadd.xlane.f32.xlu0 %v4413_v39  ;;  %v4392_v37 = vmul.f32 %v10347_v0, %v10347_v0 }
0x12a4   :  { %v4391_v17 = vmul.f32 %v10351_v13, %v10351_v13  ;;  %7101 = vmatprep.subr.bf16.mxu0 %v7100_v7  ;;  %7132 = vmatprep.subr.bf16.mxu1 %v7100_v7 }
0x12a5   :  { %v4422_v54 = vsel %vm57_vm0, %v4392_v37, 0.0  ;;  %7103 = vmatpush3.bf16.msra.mxu0 %v7100_v7  ;;  %7134 = vmatpush3.bf16.msra.mxu1 %v7100_v7 }
0x12a6   :  { %4423 = vadd.xlane.f32.xlu1 %v4422_v54  ;;  %v4419_v41 = vsel %vm57_vm0, %v4391_v17, 0.0  ;;  %7105 = vmatprep.subr.bf16.mxu0 %v7104_v21 }
0x12a7   :  { %4420 = vadd.xlane.f32.xlu0 %v4419_v41  ;;  %7133 = vmatprep.subr.bf16.mxu1 %v7104_v21 }
0x12a9   :  { %7107 = vmatpush3.bf16.msra.mxu0 %v7104_v21  ;;  %7135 = vmatpush3.bf16.msra.mxu1 %v7104_v21 }
0x12c2   :  { %v4333_v40 = vpop.xlane.xlu1 %4332 }
0x12c3   :  { %v4362_v43 = vmul.f32 0.03125, %v4333_v40  ;;  %v4330_v45 = vpop.xlane.xlu0 %4329 }
0x12c4   :  { %v4361_v6 = vmul.f32 0.03125, %v4330_v45 }
0x12c5   :  { %v10361_v33 = vsub.f32 %v10267_v29, %v4362_v43 }
0x12c6   :  { %v10364_v5 = vsub.f32 %v10270_v16, %v4361_v6  ;;  %v4339_v57 = vpop.xlane.xlu1 %4338 }
0x12c7   :  { %v4364_v46 = vmul.f32 0.03125, %v4339_v57  ;;  %v4336_v30 = vpop.xlane.xlu0 %4335  ;;  %v4394_v24 = vmul.f32 %v10361_v33, %v10361_v33 }
0x12c8   :  { %v4363_v12 = vmul.f32 0.03125, %v4336_v30  ;;  %v4393_v48 = vmul.f32 %v10364_v5, %v10364_v5 }
0x12c9   :  { %v10371_v1 = vsub.f32 %v10279_v56, %v4364_v46  ;;  %v4428_v14 = vsel %vm57_vm0, %v4394_v24, 0.0  ;;  %v10408_v46 = vld [vmem:[#allocation2 + $0x140] ss:$0 sm:$0xff] }
0x12ca   :  { %v10375_v29 = vsub.f32 %v10282_v22, %v4363_v12  ;;  %4429 = vadd.xlane.f32.xlu1 %v4428_v14  ;;  %v4345_v16 = vpop.xlane.xlu1 %4344  ;;  %v4425_v59 = vsel %vm57_vm0, %v4393_v48, 0.0 }
0x12cb   :  { %v4366_v47 = vmul.f32 0.03125, %v4345_v16  ;;  %v4342_v53 = vpop.xlane.xlu0 %4341  ;;  %4426 = vadd.xlane.f32.xlu0 %v4425_v59  ;;  %v4396_v8 = vmul.f32 %v10371_v1, %v10371_v1 }
0x12cc   :  { %v4365_v32 = vmul.f32 0.03125, %v4342_v53  ;;  %v4395_v56 = vmul.f32 %v10375_v29, %v10375_v29  ;;  %v10412_v53 = vld [vmem:[#allocation2 + $0x148] ss:$0 sm:$0xff] }
0x12cd   :  { %v10383_v34 = vsub.f32 %v10291_v38, %v4366_v47  ;;  %v4434_v22 = vsel %vm57_vm0, %v4396_v8, 0.0 }
0x12ce   :  { %v10387_v20 = vsub.f32 %v10294_v23, %v4365_v32  ;;  %4435 = vadd.xlane.f32.xlu1 %v4434_v22  ;;  %v4351_v55 = vpop.xlane.xlu1 %4350  ;;  %v4431_v28 = vsel %vm57_vm0, %v4395_v56, 0.0 }
0x12cf   :  { %v4368_v42 = vmul.f32 0.03125, %v4351_v55  ;;  %v4348_v10 = vpop.xlane.xlu0 %4347  ;;  %4432 = vadd.xlane.f32.xlu0 %v4431_v28  ;;  %v4398_v35 = vmul.f32 %v10383_v34, %v10383_v34 }
0x12d0   :  { %v4367_v51 = vmul.f32 0.03125, %v4348_v10  ;;  %v4397_v38 = vmul.f32 %v10387_v20, %v10387_v20 }
0x12d1   :  { %v10395_v18 = vsub.f32 %v10303_v27, %v4368_v42  ;;  %v4440_v23 = vsel %vm57_vm0, %v4398_v35, 0.0 }
0x12d2   :  { %v10399_v62 = vsub.f32 %v10306_v49, %v4367_v51  ;;  %4441 = vadd.xlane.f32.xlu1 %v4440_v23  ;;  %v4437_v60 = vsel %vm57_vm0, %v4397_v38, 0.0  ;;  %v7108_v49 = vpack.c.bf16 %v4774_v44, %v4773_v9 }
0x12d3   :  { %4438 = vadd.xlane.f32.xlu0 %v4437_v60  ;;  %v4400_v19 = vmul.f32 %v10395_v18, %v10395_v18 }
0x12d4   :  { %v4399_v2 = vmul.f32 %v10399_v62, %v10399_v62  ;;  %7109 = vmatprep.subr.bf16.mxu0 %v7108_v49 }
0x12d5   :  { %v4446_v36 = vsel %vm57_vm0, %v4400_v19, 0.0 }
0x12d6   :  { %4447 = vadd.xlane.f32.xlu1 %v4446_v36  ;;  %v4443_v27 = vsel %vm57_vm0, %v4399_v2, 0.0 }
0x12d7   :  { %4444 = vadd.xlane.f32.xlu0 %v4443_v27 }
0x1324   :  { %v4406_v25 = vpop.xlane.xlu1 %4405 }
0x1325   :  { %v4450_v58 = vmul.f32 0.03125, %v4406_v25  ;;  %v4403_v39 = vpop.xlane.xlu0 %4402 }
0x1326   :  { %v4449_v37 = vmul.f32 0.03125, %v4403_v39 }
0x1327   :  { %v4466_v17 = vadd.f32 1e-05, %v4450_v58 }
0x1328   :  { %v4465_v54 = vadd.f32 1e-05, %v4449_v37 }
0x1329   :  { %7827 = vrsqrt.f32 %v4466_v17 }
0x132a   :  { %7829 = vrsqrt.f32 %v4465_v54 }
0x132b   :  { %v4412_v41 = vpop.xlane.xlu1 %4411 }
0x132c   :  { %v4452_v4 = vmul.f32 0.03125, %v4412_v41  ;;  %v4409_v15 = vpop.xlane.xlu0 %4408 }
0x132d   :  { %v4451_v7 = vmul.f32 0.03125, %v4409_v15 }
0x132e   :  { %v4468_v50 = vadd.f32 1e-05, %v4452_v4 }
0x132f   :  { %v4467_v31 = vadd.f32 1e-05, %v4451_v7  ;;  %v4418_v21 = vpop.xlane.xlu1 %4417 }
0x1330   :  { %7831 = vrsqrt.f32 %v4468_v50  ;;  %v4454_v40 = vmul.f32 0.03125, %v4418_v21  ;;  %v4415_v43 = vpop.xlane.xlu0 %4414 }
0x1331   :  { %7833 = vrsqrt.f32 %v4467_v31  ;;  %v4453_v45 = vmul.f32 0.03125, %v4415_v43 }
0x1332   :  { %v4470_v6 = vadd.f32 1e-05, %v4454_v40 }
0x1333   :  { %v7828_v57 = vpop.eup %7827  ;;  %v4469_v30 = vadd.f32 1e-05, %v4453_v45  ;;  %v4424_v24 = vpop.xlane.xlu1 %4423 }
0x1334   :  { %v7830_v12 = vpop.eup %7829  ;;  %v4498_v48 = vmul.f32 %v7828_v57, %v10313_v3  ;;  %7835 = vrsqrt.f32 %v4470_v6  ;;  %v4456_v14 = vmul.f32 0.03125, %v4424_v24  ;;  %v4421_v16 = vpop.xlane.xlu0 %4420 }
0x1335   :  { %7837 = vrsqrt.f32 %v4469_v30  ;;  %v4455_v59 = vmul.f32 0.03125, %v4421_v16  ;;  %v4497_v47 = vmul.f32 %v7830_v12, %v10316_v63 }
0x1336   :  { %v4519_v8 = vmul.f32 %v10408_v46, %v4498_v48  ;;  %v4472_v32 = vadd.f32 1e-05, %v4456_v14 }
0x1337   :  { %v4471_v56 = vadd.f32 1e-05, %v4455_v59  ;;  %v4518_v22 = vmul.f32 %v10408_v46, %v4497_v47 }
0x1338   :  { %7839 = vrsqrt.f32 %v4472_v32  ;;  %v4540_v28 = vadd.f32 %v10412_v53, %v4519_v8 }
0x1339   :  { %7841 = vrsqrt.f32 %v4471_v56  ;;  %v4539_v55 = vadd.f32 %v10412_v53, %v4518_v22 }
0x133a   :  { %v7832_v3 = vpop.eup %7831 }
0x133b   :  { %v7834_v42 = vpop.eup %7833  ;;  %6612 = vmatprep.mubr.msk.f32.mxu0 %vm57_vm0, %v4539_v55  ;;  %v4500_v63 = vmul.f32 %v7832_v3, %v10325_v26 }
0x133c   :  { %6613 = vmatmul.mubr.msk.f32.vlgmr.msra.gmra.mrb[112].mxu0 %vm57_vm0, %v4540_v28  ;;  %v4499_v10 = vmul.f32 %v7834_v42, %v10328_v11 }
0x133d   :  { %v4521_v35 = vmul.f32 %v10408_v46, %v4500_v63  ;;  %7111 = vmatpush3.bf16.msra.mxu0 %v7108_v49 }
0x133e   :  { %v7836_v51 = vpop.eup %7835  ;;  %v4520_v38 = vmul.f32 %v10408_v46, %v4499_v10 }
0x133f   :  { %v7838_v23 = vpop.eup %7837  ;;  %v4502_v60 = vmul.f32 %v7836_v51, %v10335_v61  ;;  %v4542_v36 = vadd.f32 %v10412_v53, %v4521_v35 }
0x1340   :  { %v4541_v19 = vadd.f32 %v10412_v53, %v4520_v38  ;;  %v4501_v2 = vmul.f32 %v7838_v23, %v10339_v52 }
0x1341   :  { %v4523_v26 = vmul.f32 %v10408_v46, %v4502_v60 }
0x1342   :  { %v7840_v27 = vpop.eup %7839  ;;  %6615 = vmatprep.mubr.msk.f32.mxu0 %vm57_vm0, %v4541_v19  ;;  %v4522_v11 = vmul.f32 %v10408_v46, %v4501_v2 }
0x1343   :  { %v7842_v9 = vpop.eup %7841  ;;  %v4504_v44 = vmul.f32 %v7840_v27, %v10347_v0  ;;  %6616 = vmatmul.mubr.msk.f32.gmra.mrb[114].mxu0 %vm57_vm0, %v4542_v36  ;;  %v4544_v25 = vadd.f32 %v10412_v53, %v4523_v26 }
0x1344   :  { %v4543_v61 = vadd.f32 %v10412_v53, %v4522_v11  ;;  %v4503_v49 = vmul.f32 %v7842_v9, %v10351_v13 }
0x1345   :  { %v4525_v52 = vmul.f32 %v10408_v46, %v4504_v44 }
0x1346   :  { %6618 = vmatprep.mubr.msk.f32.mxu0 %vm57_vm0, %v4543_v61  ;;  %v4524_v58 = vmul.f32 %v10408_v46, %v4503_v49 }
0x1347   :  { %6619 = vmatmul.mubr.msk.f32.gmra.mrb[116].mxu0 %vm57_vm0, %v4544_v25  ;;  %v4546_v0 = vadd.f32 %v10412_v53, %v4525_v52 }
0x1348   :  { %v4545_v39 = vadd.f32 %v10412_v53, %v4524_v58  ;;  %v4991_v58 = vld [vmem:[#allocation2 + $0xe0] sm:$0xff] }
0x134a   :  { %6621 = vmatprep.mubr.msk.f32.mxu1 %vm57_vm0, %v4545_v39  ;;  %v4992_v39 = vld [vmem:[#allocation2 + $0xe8] sm:$0xff] }
0x134b   :  { %6622 = vmatmul.mubr.msk.f32.vlgmr.msra.gmra.mrb[96].mxu1 %vm57_vm0, %v4546_v0  ;;  %v4993_v0 = vld [vmem:[#allocation2 + $0xf0] sm:$0xff] }
0x1357   :  { %v4430_v37 = vpop.xlane.xlu1 %4429 }
0x1358   :  { %v4458_v13 = vmul.f32 0.03125, %v4430_v37  ;;  %v4427_v17 = vpop.xlane.xlu0 %4426  ;;  %v7116_v37 = vpack.c.bf16 %v4992_v39, %v4991_v58 }
0x1359   :  { %v4457_v54 = vmul.f32 0.03125, %v4427_v17  ;;  %v4995_v17 = vld [vmem:[#allocation2 + $0x100] sm:$0xff] }
0x135a   :  { %v4474_v41 = vadd.f32 1e-05, %v4458_v13  ;;  %7117 = vmatprep.subr.bf16.mxu1 %v7116_v37 }
0x135b   :  { %v4473_v4 = vadd.f32 1e-05, %v4457_v54  ;;  %v4436_v15 = vpop.xlane.xlu1 %4435  ;;  %v4996_v54 = vld [vmem:[#allocation2 + $0x108] sm:$0xff]  ;;  %7119 = vmatpush3.bf16.msra.mxu1 %v7116_v37 }
0x135c   :  { %7843 = vrsqrt.f32 %v4474_v41  ;;  %v4460_v7 = vmul.f32 0.03125, %v4436_v15  ;;  %v4433_v50 = vpop.xlane.xlu0 %4432  ;;  %v5477_v41 = vld [vmem:[#allocation2 + $0x150] ss:$0 sm:$0xff] }
0x135d   :  { %7845 = vrsqrt.f32 %v4473_v4  ;;  %v4459_v31 = vmul.f32 0.03125, %v4433_v50 }
0x135e   :  { %v4476_v21 = vadd.f32 1e-05, %v4460_v7 }
0x135f   :  { %v4475_v40 = vadd.f32 1e-05, %v4459_v31  ;;  %v4442_v43 = vpop.xlane.xlu1 %4441 }
0x1360   :  { %7847 = vrsqrt.f32 %v4476_v21  ;;  %v4462_v45 = vmul.f32 0.03125, %v4442_v43  ;;  %v4439_v6 = vpop.xlane.xlu0 %4438 }
0x1361   :  { %7849 = vrsqrt.f32 %v4475_v40  ;;  %v4461_v57 = vmul.f32 0.03125, %v4439_v6 }
0x1362   :  { %v4478_v30 = vadd.f32 1e-05, %v4462_v45 }
0x1363   :  { %v4477_v24 = vadd.f32 1e-05, %v4461_v57  ;;  %v4448_v12 = vpop.xlane.xlu1 %4447 }
0x1364   :  { %7851 = vrsqrt.f32 %v4478_v30  ;;  %v4464_v48 = vmul.f32 0.03125, %v4448_v12  ;;  %v4445_v14 = vpop.xlane.xlu0 %4444 }
0x1365   :  { %7853 = vrsqrt.f32 %v4477_v24  ;;  %v4463_v16 = vmul.f32 0.03125, %v4445_v14 }
0x1366   :  { %v7844_v59 = vpop.eup %7843  ;;  %v4480_v47 = vadd.f32 1e-05, %v4464_v48 }
0x1367   :  { %v7846_v8 = vpop.eup %7845  ;;  %v4479_v32 = vadd.f32 1e-05, %v4463_v16  ;;  %v4506_v56 = vmul.f32 %v7844_v59, %v10361_v33 }
0x1368   :  { %7855 = vrsqrt.f32 %v4480_v47  ;;  %v4505_v22 = vmul.f32 %v7846_v8, %v10364_v5 }
0x1369   :  { %7857 = vrsqrt.f32 %v4479_v32  ;;  %v4527_v55 = vmul.f32 %v10408_v46, %v4506_v56 }
0x136a   :  { %v7848_v3 = vpop.eup %7847  ;;  %v4526_v28 = vmul.f32 %v10408_v46, %v4505_v22 }
0x136b   :  { %v7850_v42 = vpop.eup %7849  ;;  %v4508_v63 = vmul.f32 %v7848_v3, %v10371_v1  ;;  %v4548_v51 = vadd.f32 %v10412_v53, %v4527_v55 }
0x136c   :  { %v4547_v10 = vadd.f32 %v10412_v53, %v4526_v28  ;;  %v4507_v35 = vmul.f32 %v7850_v42, %v10375_v29 }
0x136d   :  { %v4529_v33 = vmul.f32 %v10408_v46, %v4508_v63 }
0x136e   :  { %v7852_v38 = vpop.eup %7851  ;;  %6624 = vmatprep.mubr.msk.f32.mxu1 %vm57_vm0, %v4547_v10  ;;  %v4528_v5 = vmul.f32 %v10408_v46, %v4507_v35 }
0x136f   :  { %v7854_v23 = vpop.eup %7853  ;;  %6625 = vmatmul.mubr.msk.f32.gmra.mrb[98].mxu1 %vm57_vm0, %v4548_v51  ;;  %v4510_v60 = vmul.f32 %v7852_v38, %v10383_v34  ;;  %v4550_v29 = vadd.f32 %v10412_v53, %v4529_v33 }
0x1370   :  { %v4549_v1 = vadd.f32 %v10412_v53, %v4528_v5  ;;  %v4509_v19 = vmul.f32 %v7854_v23, %v10387_v20 }
0x1371   :  { %v4531_v2 = vmul.f32 %v10408_v46, %v4510_v60 }
0x1372   :  { %v7856_v36 = vpop.eup %7855  ;;  %6627 = vmatprep.mubr.msk.f32.mxu1 %vm57_vm0, %v4549_v1  ;;  %v4530_v26 = vmul.f32 %v10408_v46, %v4509_v19 }
0x1373   :  { %v7858_v27 = vpop.eup %7857  ;;  %6628 = vmatmul.mubr.msk.f32.gmra.mrb[100].mxu1 %vm57_vm0, %v4550_v29  ;;  %v4512_v11 = vmul.f32 %v7856_v36, %v10395_v18  ;;  %v4552_v20 = vadd.f32 %v10412_v53, %v4531_v2  ;;  %v4775_v18 = vld [vmem:[#allocation2 + $0xd0] sm:$0xff] }
0x1374   :  { %v4551_v34 = vadd.f32 %v10412_v53, %v4530_v26  ;;  %v4511_v9 = vmul.f32 %v7858_v27, %v10399_v62  ;;  %v4776_v62 = vld [vmem:[#allocation2 + $0xd8] sm:$0xff] }
0x1375   :  { %v4533_v44 = vmul.f32 %v10408_v46, %v4512_v11  ;;  %v7112_v25 = vpack.c.bf16 %v4776_v62, %v4775_v18  ;;  %v5494_v18 = vld [vmem:[#allocation2 + $0x158] ss:$0 sm:$0xff] }
0x1376   :  { %6630 = vmatprep.mubr.msk.f32.mxu1 %vm57_vm0, %v4551_v34  ;;  %v4532_v61 = vmul.f32 %v10408_v46, %v4511_v9  ;;  %v4994_v46 = vld [vmem:[#allocation2 + $0xf8] sm:$0xff] }
0x1377   :  { %6631 = vmatmul.mubr.msk.f32.gmra.mrb[102].mxu1 %vm57_vm0, %v4552_v20  ;;  %v4554_v49 = vadd.f32 %v10412_v53, %v4533_v44  ;;  %7113 = vmatprep.subr.bf16.mxu0 %v7112_v25  ;;  %v7120_v13 = vpack.c.bf16 %v4994_v46, %v4993_v0 }
0x1378   :  { %v4553_v52 = vadd.f32 %v10412_v53, %v4532_v61  ;;  %7115 = vmatpush3.bf16.msra.mxu0 %v7112_v25  ;;  %v7124_v53 = vpack.c.bf16 %v4996_v54, %v4995_v17  ;;  %v4997_v61 = vld [vmem:[#allocation2 + $0x110] sm:$0xff] }
0x1379   :  { %7121 = vmatprep.subr.bf16.mxu1 %v7120_v13 }
0x137a   :  { %6633 = vmatprep.mubr.msk.f32.mxu1 %vm57_vm0, %v4553_v52  ;;  %7123 = vmatpush3.bf16.msra.mxu1 %v7120_v13 }
0x137b   :  { %6634 = vmatmul.mubr.msk.f32.gmra.mrb[104].mxu1 %vm57_vm0, %v4554_v49  ;;  %7125 = vmatprep.subr.bf16.mxu1 %v7124_v53  ;;  %v4998_v49 = vld [vmem:[#allocation2 + $0x118] sm:$0xff] }
0x137c   :  { %v7128_v52 = vpack.c.bf16 %v4998_v49, %v4997_v61 }
0x137e   :  { %7127 = vmatpush3.bf16.msra.mxu1 %v7124_v53 }
0x137f   :  { %7129 = vmatprep.subr.bf16.mxu1 %v7128_v52 }
0x1382   :  { %7131 = vmatpush3.bf16.msra.mxu1 %v7128_v52 }
0x140f   :  { %v6614_v4 = vpop.f32.mrb[112].mxu0 }
0x1410   :  { %v4684_v15 = vadd.f32 %v6614_v4, %v5477_v41  ;;  %v4678_v7 = vpop.f32.mrb[113].mxu0 }
0x1411   :  { %v4679_v50 = vadd.f32 %v5477_v41, %v4678_v7 }
0x1412   :  { %v4758_v21 = vmax.f32 %v4684_v15, 0.0 }
0x1413   :  { %v4757_v31 = vmax.f32 %v4679_v50, 0.0 }
0x1415   :  { %6644 = vmatprep.mubr.msk.f32.mxu0 %vm57_vm0, %v4757_v31 }
0x1416   :  { %v6617_v40 = vpop.f32.mrb[114].mxu0  ;;  %6645 = vmatmul.mubr.msk.f32.vlgmr.msra.gmra.mrb[118].mxu0 %vm57_vm0, %v4758_v21 }
0x1417   :  { %v4694_v43 = vadd.f32 %v6617_v40, %v5477_v41  ;;  %v4688_v45 = vpop.f32.mrb[115].mxu0 }
0x1418   :  { %v4689_v6 = vadd.f32 %v5477_v41, %v4688_v45 }
0x1419   :  { %v4760_v24 = vmax.f32 %v4694_v43, 0.0 }
0x141a   :  { %v4759_v57 = vmax.f32 %v4689_v6, 0.0  ;;  %v6620_v30 = vpop.f32.mrb[116].mxu0 }
0x141b   :  { %v4704_v12 = vadd.f32 %v6620_v30, %v5477_v41  ;;  %v4698_v48 = vpop.f32.mrb[117].mxu0 }
0x141c   :  { %v4699_v14 = vadd.f32 %v5477_v41, %v4698_v48  ;;  %6647 = vmatprep.mubr.msk.f32.mxu0 %vm57_vm0, %v4759_v57 }
0x141d   :  { %6648 = vmatmul.mubr.msk.f32.gmra.mrb[120].mxu0 %vm57_vm0, %v4760_v24  ;;  %v4762_v47 = vmax.f32 %v4704_v12, 0.0 }
0x141e   :  { %v4761_v16 = vmax.f32 %v4699_v14, 0.0  ;;  %v6623_v59 = vpop.f32.mrb[96].mxu1 }
0x141f   :  { %v4714_v8 = vadd.f32 %v6623_v59, %v5477_v41  ;;  %v4708_v32 = vpop.f32.mrb[97].mxu1 }
0x1420   :  { %v4709_v56 = vadd.f32 %v5477_v41, %v4708_v32  ;;  %6650 = vmatprep.mubr.msk.f32.mxu0 %vm57_vm0, %v4761_v16 }
0x1421   :  { %6651 = vmatmul.mubr.msk.f32.gmra.mrb[122].mxu0 %vm57_vm0, %v4762_v47  ;;  %v4764_v55 = vmax.f32 %v4714_v8, 0.0 }
0x1422   :  { %v4763_v22 = vmax.f32 %v4709_v56, 0.0 }
0x1424   :  { %6653 = vmatprep.mubr.msk.f32.mxu0 %vm57_vm0, %v4763_v22 }
0x1425   :  { %6654 = vmatmul.mubr.msk.f32.gmra.mrb[124].mxu0 %vm57_vm0, %v4764_v55 }
0x1442   :  { %v6626_v3 = vpop.f32.mrb[98].mxu1 }
0x1443   :  { %v4724_v28 = vadd.f32 %v6626_v3, %v5477_v41  ;;  %v4718_v42 = vpop.f32.mrb[99].mxu1 }
0x1444   :  { %v4719_v63 = vadd.f32 %v5477_v41, %v4718_v42 }
0x1445   :  { %v4766_v51 = vmax.f32 %v4724_v28, 0.0 }
0x1446   :  { %v4765_v10 = vmax.f32 %v4719_v63, 0.0  ;;  %v6629_v35 = vpop.f32.mrb[100].mxu1 }
0x1447   :  { %v4734_v33 = vadd.f32 %v6629_v35, %v5477_v41  ;;  %v4728_v38 = vpop.f32.mrb[101].mxu1 }
0x1448   :  { %v4729_v5 = vadd.f32 %v5477_v41, %v4728_v38  ;;  %6656 = vmatprep.mubr.msk.f32.mxu0 %vm57_vm0, %v4765_v10 }
0x1449   :  { %6657 = vmatmul.mubr.msk.f32.gmra.mrb[126].mxu0 %vm57_vm0, %v4766_v51  ;;  %v4768_v1 = vmax.f32 %v4734_v33, 0.0 }
0x144a   :  { %v4767_v23 = vmax.f32 %v4729_v5, 0.0  ;;  %v6632_v60 = vpop.f32.mrb[102].mxu1 }
0x144b   :  { %v4744_v19 = vadd.f32 %v6632_v60, %v5477_v41  ;;  %v4738_v29 = vpop.f32.mrb[103].mxu1 }
0x144c   :  { %v4739_v2 = vadd.f32 %v5477_v41, %v4738_v29  ;;  %6659 = vmatprep.mubr.msk.f32.mxu0 %vm57_vm0, %v4767_v23 }
0x144d   :  { %6660 = vmatmul.mubr.msk.f32.gmra.mrb[128].mxu0 %vm57_vm0, %v4768_v1  ;;  %v4770_v27 = vmax.f32 %v4744_v19, 0.0  ;;  %v5511_v1 = vld [vmem:[#allocation2 + $0x160] ss:$0 sm:$0xff] }
0x144e   :  { %v4769_v36 = vmax.f32 %v4739_v2, 0.0  ;;  %v6635_v26 = vpop.f32.mrb[104].mxu1 }
0x144f   :  { %v4754_v11 = vadd.f32 %v6635_v26, %v5477_v41  ;;  %v4748_v34 = vpop.f32.mrb[105].mxu1 }
0x1450   :  { %v4749_v9 = vadd.f32 %v5477_v41, %v4748_v34  ;;  %6662 = vmatprep.mubr.msk.f32.mxu0 %vm57_vm0, %v4769_v36 }
0x1451   :  { %6663 = vmatmul.mubr.msk.f32.gmra.mrb[130].mxu0 %vm57_vm0, %v4770_v27  ;;  %v4772_v44 = vmax.f32 %v4754_v11, 0.0 }
0x1452   :  { %v4771_v20 = vmax.f32 %v4749_v9, 0.0 }
0x1454   :  { %6665 = vmatprep.mubr.msk.f32.mxu0 %vm57_vm0, %v4771_v20 }
0x1455   :  { %6666 = vmatmul.mubr.msk.f32.gmra.mrb[132].mxu0 %vm57_vm0, %v4772_v44 }
0x14e9   :  { %v6646_v62 = vpop.f32.mrb[118].mxu0 }
0x14ea   :  { %v4902_v25 = vadd.f32 %v6646_v62, %v5494_v18  ;;  %v4896_v58 = vpop.f32.mrb[119].mxu0 }
0x14eb   :  { %v4897_v39 = vadd.f32 %v5494_v18, %v4896_v58 }
0x14ec   :  { %v4976_v37 = vmax.f32 %v4902_v25, 0.0 }
0x14ed   :  { %v4975_v0 = vmax.f32 %v4897_v39, 0.0 }
0x14ef   :  { %6684 = vmatprep.mubr.msk.f32.mxu1 %vm559_vm2, %v4975_v0 }
0x14f0   :  { %v6649_v46 = vpop.f32.mrb[120].mxu0  ;;  %6685 = vmatmul.mubr.msk.f32.vlgmr.msra.gmra.mrb[106].mxu1 %vm559_vm2, %v4976_v37 }
0x14f1   :  { %v4912_v13 = vadd.f32 %v6649_v46, %v5494_v18  ;;  %v4906_v17 = vpop.f32.mrb[121].mxu0 }
0x14f2   :  { %v4907_v54 = vadd.f32 %v5494_v18, %v4906_v17 }
0x14f3   :  { %v4978_v4 = vmax.f32 %v4912_v13, 0.0 }
0x14f4   :  { %v4977_v53 = vmax.f32 %v4907_v54, 0.0  ;;  %v6652_v41 = vpop.f32.mrb[122].mxu0 }
0x14f5   :  { %v4922_v15 = vadd.f32 %v6652_v41, %v5494_v18  ;;  %v4916_v7 = vpop.f32.mrb[123].mxu0 }
0x14f6   :  { %v4917_v50 = vadd.f32 %v5494_v18, %v4916_v7  ;;  %6687 = vmatprep.mubr.msk.f32.mxu1 %vm559_vm2, %v4977_v53 }
0x14f7   :  { %6688 = vmatmul.mubr.msk.f32.gmra.mrb[108].mxu1 %vm559_vm2, %v4978_v4  ;;  %v4980_v40 = vmax.f32 %v4922_v15, 0.0 }
0x14f8   :  { %v4979_v31 = vmax.f32 %v4917_v50, 0.0  ;;  %v6655_v21 = vpop.f32.mrb[124].mxu0 }
0x14f9   :  { %v4932_v43 = vadd.f32 %v6655_v21, %v5494_v18  ;;  %v4926_v45 = vpop.f32.mrb[125].mxu0 }
0x14fa   :  { %v4927_v6 = vadd.f32 %v5494_v18, %v4926_v45  ;;  %6690 = vmatprep.mubr.msk.f32.mxu1 %vm559_vm2, %v4979_v31 }
0x14fb   :  { %6691 = vmatmul.mubr.msk.f32.gmra.mrb[110].mxu1 %vm559_vm2, %v4980_v40  ;;  %v4982_v30 = vmax.f32 %v4932_v43, 0.0 }
0x14fc   :  { %v4981_v57 = vmax.f32 %v4927_v6, 0.0 }
0x14fe   :  { %6693 = vmatprep.mubr.msk.f32.mxu1 %vm559_vm2, %v4981_v57 }
0x14ff   :  { %6694 = vmatmul.mubr.msk.f32.gmra.mrb[112].mxu1 %vm559_vm2, %v4982_v30 }
0x151c   :  { %v6658_v24 = vpop.f32.mrb[126].mxu0 }
0x151d   :  { %v4942_v12 = vadd.f32 %v6658_v24, %v5494_v18  ;;  %v4936_v48 = vpop.f32.mrb[127].mxu0 }
0x151e   :  { %v4937_v14 = vadd.f32 %v5494_v18, %v4936_v48 }
0x151f   :  { %v4984_v47 = vmax.f32 %v4942_v12, 0.0 }
0x1520   :  { %v4983_v16 = vmax.f32 %v4937_v14, 0.0  ;;  %v6661_v59 = vpop.f32.mrb[128].mxu0 }
0x1521   :  { %v4952_v8 = vadd.f32 %v6661_v59, %v5494_v18  ;;  %v4946_v32 = vpop.f32.mrb[129].mxu0 }
0x1522   :  { %v4947_v56 = vadd.f32 %v5494_v18, %v4946_v32  ;;  %6696 = vmatprep.mubr.msk.f32.mxu1 %vm559_vm2, %v4983_v16 }
0x1523   :  { %6697 = vmatmul.mubr.msk.f32.gmra.mrb[114].mxu1 %vm559_vm2, %v4984_v47  ;;  %v4986_v3 = vmax.f32 %v4952_v8, 0.0 }
0x1524   :  { %v4985_v22 = vmax.f32 %v4947_v56, 0.0  ;;  %v6664_v55 = vpop.f32.mrb[130].mxu0 }
0x1525   :  { %v4962_v28 = vadd.f32 %v6664_v55, %v5494_v18  ;;  %v4956_v42 = vpop.f32.mrb[131].mxu0 }
0x1526   :  { %v4957_v63 = vadd.f32 %v5494_v18, %v4956_v42  ;;  %6699 = vmatprep.mubr.msk.f32.mxu1 %vm559_vm2, %v4985_v22 }
0x1527   :  { %6700 = vmatmul.mubr.msk.f32.gmra.mrb[116].mxu1 %vm559_vm2, %v4986_v3  ;;  %v4988_v51 = vmax.f32 %v4962_v28, 0.0 }
0x1528   :  { %v4987_v10 = vmax.f32 %v4957_v63, 0.0  ;;  %v6667_v35 = vpop.f32.mrb[132].mxu0 }
0x1529   :  { %v4972_v33 = vadd.f32 %v6667_v35, %v5494_v18  ;;  %v4966_v38 = vpop.f32.mrb[133].mxu0 }
0x152a   :  { %v4967_v5 = vadd.f32 %v5494_v18, %v4966_v38  ;;  %6702 = vmatprep.mubr.msk.f32.mxu1 %vm559_vm2, %v4987_v10 }
0x152b   :  { %6703 = vmatmul.mubr.msk.f32.gmra.mrb[118].mxu1 %vm559_vm2, %v4988_v51  ;;  %v4990_v60 = vmax.f32 %v4972_v33, 0.0 }
0x152c   :  { %v4989_v23 = vmax.f32 %v4967_v5, 0.0 }
0x152e   :  { %6705 = vmatprep.mubr.msk.f32.mxu1 %vm559_vm2, %v4989_v23 }
0x152f   :  { %6706 = vmatmul.mubr.msk.f32.gmra.mrb[120].mxu1 %vm559_vm2, %v4990_v60 }
0x15c3   :  { %v6686_v19 = vpop.f32.mrb[106].mxu1 }
0x15c4   :  { %v5124_v29 = vadd.f32 %v6686_v19, %v5511_v1  ;;  %v5118_v2 = vpop.f32.mrb[107].mxu1 }
0x15c5   :  { %v5119_v36 = vadd.f32 %v5511_v1, %v5118_v2 }
0x15c6   :  { %5198 = vst [vmem:[#allocation5 + $0x8] sm:$0xff] %v5124_v29 }
0x15c7   :  { %5197 = vst [vmem:[#allocation5] sm:$0xff] %v5119_v36 }
0x15ca   :  { %v6689_v26 = vpop.f32.mrb[108].mxu1 }
0x15cb   :  { %v5134_v27 = vadd.f32 %v6689_v26, %v5511_v1  ;;  %v5128_v11 = vpop.f32.mrb[109].mxu1 }
0x15cc   :  { %v5129_v34 = vadd.f32 %v5511_v1, %v5128_v11 }
0x15cd   :  { %5200 = vst [vmem:[#allocation5 + $0x18] sm:$0xff] %v5134_v27 }
0x15ce   :  { %5199 = vst [vmem:[#allocation5 + $0x10] sm:$0xff] %v5129_v34  ;;  %v6692_v9 = vpop.f32.mrb[110].mxu1 }
0x15cf   :  { %v5144_v20 = vadd.f32 %v6692_v9, %v5511_v1  ;;  %v5138_v44 = vpop.f32.mrb[111].mxu1 }
0x15d0   :  { %v5139_v61 = vadd.f32 %v5511_v1, %v5138_v44 }
0x15d1   :  { %5202 = vst [vmem:[#allocation5 + $0x28] sm:$0xff] %v5144_v20 }
0x15d2   :  { %5201 = vst [vmem:[#allocation5 + $0x20] sm:$0xff] %v5139_v61  ;;  %v6695_v49 = vpop.f32.mrb[112].mxu1 }
0x15d3   :  { %v5154_v52 = vadd.f32 %v6695_v49, %v5511_v1  ;;  %v5148_v18 = vpop.f32.mrb[113].mxu1 }
0x15d4   :  { %v5149_v62 = vadd.f32 %v5511_v1, %v5148_v18 }
0x15d5   :  { %5204 = vst [vmem:[#allocation5 + $0x38] sm:$0xff] %v5154_v52 }
0x15d6   :  { %5203 = vst [vmem:[#allocation5 + $0x30] sm:$0xff] %v5149_v62 }
0x15f6   :  { %v6698_v25 = vpop.f32.mrb[114].mxu1 }
0x15f7   :  { %v5164_v58 = vadd.f32 %v6698_v25, %v5511_v1  ;;  %v5158_v39 = vpop.f32.mrb[115].mxu1 }
0x15f8   :  { %v5159_v0 = vadd.f32 %v5511_v1, %v5158_v39 }
0x15f9   :  { %5206 = vst [vmem:[#allocation5 + $0x48] sm:$0xff] %v5164_v58 }
0x15fa   :  { %5205 = vst [vmem:[#allocation5 + $0x40] sm:$0xff] %v5159_v0  ;;  %v6701_v37 = vpop.f32.mrb[116].mxu1 }
0x15fb   :  { %v5174_v46 = vadd.f32 %v6701_v37, %v5511_v1  ;;  %v5168_v13 = vpop.f32.mrb[117].mxu1 }
0x15fc   :  { %v5169_v17 = vadd.f32 %v5511_v1, %v5168_v13 }
0x15fd   :  { %5208 = vst [vmem:[#allocation5 + $0x58] sm:$0xff] %v5174_v46 }
0x15fe   :  { %5207 = vst [vmem:[#allocation5 + $0x50] sm:$0xff] %v5169_v17  ;;  %v6704_v54 = vpop.f32.mrb[118].mxu1 }
0x15ff   :  { %v5184_v53 = vadd.f32 %v6704_v54, %v5511_v1  ;;  %v5178_v41 = vpop.f32.mrb[119].mxu1 }
0x1600   :  { %v5179_v4 = vadd.f32 %v5511_v1, %v5178_v41 }
0x1601   :  { %5210 = vst [vmem:[#allocation5 + $0x68] sm:$0xff] %v5184_v53 }
0x1602   :  { %5209 = vst [vmem:[#allocation5 + $0x60] sm:$0xff] %v5179_v4  ;;  %v6707_v15 = vpop.f32.mrb[120].mxu1 }
0x1603   :  { %v5194_v7 = vadd.f32 %v6707_v15, %v5511_v1  ;;  %v5188_v50 = vpop.f32.mrb[121].mxu1 }
0x1604   :  { %v5189_v31 = vadd.f32 %v5511_v1, %v5188_v50 }
0x1605   :  { %5212 = vst [vmem:[#allocation5 + $0x78] sm:$0xff] %v5194_v7 }
0x1606   :  { %5211 = vst [vmem:[#allocation5 + $0x70] sm:$0xff] %v5189_v31 }
0x1607   :  { %7908 = shalt.err (!%p7905_p12)
}
0x1608   :  { %s7909_s1 = scalar_lea.hbm %s10527_s4, 2048 }
0x1609   :  { %p7910_p13 = scmp.ne.s32.totalorder %s10527_s4, %s7909_s1  ;;  %p7913_p0 = scmp.lt.u32.totalorder %s7909_s1, %s10527_s4 }
0x160b   :  { %p7915_p1 = pnand %p7913_p0, %p7910_p13 }
0x160d   :  { %7918 = shalt.err (!%p7915_p1)
}
0x160e   :  { %5224 = dma.vmem_to_hbm [thread:$0]  %s5219_s8, 2048, %s10527_s4, [#allocation4], %s7924_s25, %s7924_s25, %s7925_s26  }
0x160f   :  { %7921 = dma.done.wait [#allocation4], 2048  }
0x1610   :  { %7922 = vsyncadd [#allocation4], 4294965248 }
0x1611   :  { %5228 = vsyncpa [#allocation3], 1 }
0x1612   :  { %5229 = vsyncpa [#allocation4], 1 }

</bundles_post_ra>
